<compile_context>
chip_gen: v6e
topology: v6e:2x2x1
jax: 0.10.0
libtpu: 0.0.40
codegen_flags: <defaults>
</compile_context>

<pallas_src>
import jax
import jax.numpy as jnp
from jax import lax
from jax.experimental import pallas as pl
from jax.experimental.pallas import tpu as pltpu


_INV_SQRT2 = 0.7071067811865476
_CHANNELS = 768
_HEADROOM_BYTES = 6 * 1024 * 1024   # head intermediates + compiler scratch


def _gelu_exact(x):
    # PyTorch nn.GELU default (approximate='none'): 0.5*x*(1+erf(x/sqrt(2)))
    return 0.5 * x * (1.0 + lax.erf(x * _INV_SQRT2))


def _round_up(x, m):
    return (x + m - 1) // m * m


def _padded_vmem_bytes(shape, dtype):
    """VMEM footprint of one buffer incl. sublane/lane padding of last 2 dims."""
    itemsize = jnp.dtype(dtype).itemsize
    sublane = 8 * max(1, 4 // itemsize)          # sub-32-bit dtypes pack sublanes
    dims = list(shape)
    dims[-1] = _round_up(int(dims[-1]), 128)
    if len(dims) >= 2:
        dims[-2] = _round_up(int(dims[-2]), sublane)
    total = 1
    for d in dims:
        total *= int(d)
    return total * itemsize


def _vmem_budget_bytes():
    """~75% of physical VMEM (48 MiB on v7x, ~96 MiB on v5e/v6e); safe fallback."""
    cap = 64 * 1024 * 1024
    try:
        info = pltpu.get_tpu_info()
        cap = int(getattr(info, "vmem_capacity_bytes", cap))
    except Exception:
        pass
    return max(32 * 1024 * 1024, (cap * 3) // 4)


def _select_tiles(n, hw, weight_resident_bytes, budget_bytes):
    """Pick (tn, thw) jointly so the whole working set fits the VMEM budget."""
    tn_mult = [t for t in (256, 128, 64, 32, 16, 8) if t <= n and n % t == 0]
    tn_cands = tn_mult if tn_mult else [n]       # full batch if no 8-mult divisor
    thw_cands = sorted(
        {hw} | {t for t in (4096, 2048, 1024, 512, 256, 128, 64, 32, 16, 8)
                if t < hw and hw % t == 0},
        reverse=True)
    for tn in tn_cands:                          # prefer large batch tiles (MXU M, step amortization)
        for thw in thw_cands:                    # then the largest HW tile that fits
            feat_buf = _padded_vmem_bytes((tn, thw, _CHANNELS), jnp.bfloat16)
            scratch = _padded_vmem_bytes((tn, _CHANNELS), jnp.float32)
            out_buf = _padded_vmem_bytes((tn, 1), jnp.float32)
            total = (weight_resident_bytes + 2 * feat_buf + scratch
                     + 2 * out_buf + _HEADROOM_BYTES)
            if total <= budget_bytes:
                return tn, thw
    return tn_cands[-1], thw_cands[-1]           # smallest legal combination


def _cost_estimate(n, hw, params):
    head_flops = 2 * (768 * 256 + 256 * 768 + 768 * 1024 + 1024 * 512 + 512 + 768)
    flops = n * (head_flops + hw * _CHANNELS)               # + pooling adds
    transcendentals = n * (768 + 1024 + 512)                # sigmoid + 2x erf
    feat_bytes = n * hw * _CHANNELS * 2                     # bf16 stream
    weight_bytes = sum(int(p.size) * jnp.dtype(p.dtype).itemsize for p in params)
    return pl.CostEstimate(flops=flops, transcendentals=transcendentals,
                           bytes_accessed=feat_bytes + weight_bytes + n * 4)


def _make_head_kernel(hw_total):
    inv_hw = 1.0 / float(hw_total)

    def kernel(feat_ref,
               wa1_ref, ba1_ref, wa2_ref, ba2_ref,
               wr1_ref, br1_ref, wr2_ref, br2_ref,
               woutr_ref, woutg_ref, bout_ref,
               out_ref, pool_acc):
        k = pl.program_id(1)

        @pl.when(k == 0)
        def _():
            pool_acc[...] = jnp.zeros_like(pool_acc)

        # Partial global-average-pool over this HW tile: bf16 stream, f32 acc.
        # Channels sit on the lane axis of the (TN, 768) result, exactly what
        # the MLP head wants.
        pool_acc[...] += jnp.sum(feat_ref[...].astype(jnp.float32), axis=1)

        @pl.when(k == pl.num_programs(1) - 1)
        def _():
            pooled = pool_acc[...] * inv_hw                     # (TN, 768) f32

            def mxu(x_f32, w_ref):
                # bf16 operands to the MXU, f32 accumulation
                return jnp.dot(x_f32.astype(jnp.bfloat16), w_ref[...],
                               preferred_element_type=jnp.float32)

            # attention: Linear(768,256) -> ReLU -> Linear(256,768) -> Sigmoid
            h = jnp.maximum(mxu(pooled, wa1_ref) + ba1_ref[...], 0.0)
            att = jax.nn.sigmoid(mxu(h, wa2_ref) + ba2_ref[...])
            gated = pooled * att                                # (TN, 768) f32

            # regressor (BN folded into the Linears, Dropout = identity in eval)
            r = _gelu_exact(mxu(gated, wr1_ref) + br1_ref[...])  # (TN, 1024)
            r = _gelu_exact(mxu(r, wr2_ref) + br2_ref[...])      # (TN, 512)

            # fused output 0.7*regressor[8](r) + 0.3*shortcut(gated),
            # split into two dots (no (TN,1280) concat intermediate)
            out = (jnp.dot(r, woutr_ref[...], preferred_element_type=jnp.float32)
                   + jnp.dot(gated, woutg_ref[...], preferred_element_type=jnp.float32)
                   + bout_ref[...])
            out_ref[...] = out.astype(out_ref.dtype)

    return kernel


def age_predictor_head(features, params, *, channels_last=True):
    """features: (N, H, W, 768) channels-last backbone feature map (preferred,
    TPU-natural).  Pass channels_last=False for a PyTorch-style (N, 768, H, W)
    map (costs one extra HBM transpose pass in the wrapper)."""
    if not channels_last:
        features = jnp.transpose(features, (0, 2, 3, 1))
    n, h, w, c = features.shape
    assert c == _CHANNELS
    hw = h * w

    # Free reshape to (N, HW, 768); stream in bf16 (halves the dominant DMA).
    feat = features.reshape(n, hw, c).astype(jnp.bfloat16)

    # TODO(synk): single-buffer the weight streams (pl.Buffered(1)) once
    # pipeline_mode is verified for the top-level TPU pipeline; budget charges
    # them double-buffered (2x) for now.
    weight_resident = 2 * sum(_padded_vmem_bytes(p.shape, p.dtype) for p in params)
    budget = _vmem_budget_bytes()
    tn, thw = _select_tiles(n, hw, weight_resident, budget)
    grid = (n // tn, hw // thw)

    feat_spec = pl.BlockSpec((tn, thw, _CHANNELS), lambda i, k: (i, k, 0))
    # full-array weight blocks with constant index_maps -> stay VMEM-resident
    param_specs = [pl.BlockSpec(p.shape, lambda i, k: (0, 0)) for p in params]

    return pl.pallas_call(
        _make_head_kernel(hw),
        out_shape=jax.ShapeDtypeStruct((n, 1), jnp.float32),
        grid_spec=pltpu.PrefetchScalarGridSpec(
            num_scalar_prefetch=0,
            grid=grid,
            in_specs=[feat_spec] + param_specs,
            out_specs=pl.BlockSpec((tn, 1), lambda i, k: (i, 0)),
            scratch_shapes=[pltpu.VMEM((tn, _CHANNELS), jnp.float32)],
        ),
        compiler_params=pltpu.CompilerParams(
            dimension_semantics=("parallel", "arbitrary"),
            vmem_limit_bytes=int(budget),
        ),
        cost_estimate=_cost_estimate(n, hw, params),
    )(feat, *params)


def init_params(key):
    """Deterministic PyTorch-style init; BN folded, output layers fused.

    Linear weights are stored (fan_in, fan_out) so the kernel does x @ W.
    Large matrices are cast to bfloat16 (MXU-native, half the DMA)."""
    def linear(k, fan_in, fan_out):
        k1, k2 = jax.random.split(k)
        bound = 1.0 / (fan_in ** 0.5)
        wgt = jax.random.uniform(k1, (fan_in, fan_out), jnp.float32, -bound, bound)
        b = jax.random.uniform(k2, (1, fan_out), jnp.float32, -bound, bound)
        return wgt, b

    keys = jax.random.split(key, 6)
    wa1, ba1 = linear(keys[0], 768, 256)      # attention[0]
    wa2, ba2 = linear(keys[1], 256, 768)      # attention[2]
    wr1, br1 = linear(keys[2], 768, 1024)     # regressor[0]
    wr2, br2 = linear(keys[3], 1024, 512)     # regressor[4]
    wr3, br3 = linear(keys[4], 512, 1)        # regressor[8]
    ws, bs = linear(keys[5], 768, 1)          # shortcut

    # BatchNorm1d eval-mode with default stats (gamma=1, beta=0, mean=0, var=1)
    # folds to a pure per-feature scale; fold it into the preceding Linear.
    # TODO(synk): with a trained checkpoint fold the real running_mean/var +
    # affine params instead of the fresh-init scale below.
    eps = 1e-5
    bn_scale = 1.0 / jnp.sqrt(jnp.float32(1.0 + eps))
    wr1_f, br1_f = wr1 * bn_scale, br1 * bn_scale
    wr2_f, br2_f = wr2 * bn_scale, br2 * bn_scale

    # Fuse: 0.7*(r @ wr3 + br3) + 0.3*(g @ ws + bs)  ==  r @ wout_r + g @ wout_g + bout
    wout_r = 0.7 * wr3                                        # (512, 1) f32
    wout_g = 0.3 * ws                                         # (768, 1) f32
    bout = 0.7 * br3 + 0.3 * bs                               # (1, 1)   f32

    bf = jnp.bfloat16
    return [wa1.astype(bf), ba1, wa2.astype(bf), ba2,
            wr1_f.astype(bf), br1_f, wr2_f.astype(bf), br2_f,
            wout_r, wout_g, bout]


def _reference(features_nhwc, params):
    """Pure-JAX reference of the same forward (mirrors the bf16 streams)."""
    (wa1, ba1, wa2, ba2, wr1, br1, wr2, br2, wout_r, wout_g, bout) = params

    def bdot(x, w):
        return jnp.dot(x.astype(jnp.bfloat16), w,
                       preferred_element_type=jnp.float32)

    f = features_nhwc.astype(jnp.bfloat16).astype(jnp.float32)
    pooled = jnp.mean(f, axis=(1, 2))                          # (N, 768)
    h = jnp.maximum(bdot(pooled, wa1) + ba1, 0.0)
    att = jax.nn.sigmoid(bdot(h, wa2) + ba2)
    g = pooled * att
    r = _gelu_exact(bdot(g, wr1) + br1)
    r = _gelu_exact(bdot(r, wr2) + br2)
    return (jnp.dot(r, wout_r, preferred_element_type=jnp.float32)
            + jnp.dot(g, wout_g, preferred_element_type=jnp.float32) + bout)


if __name__ == "__main__":
    key = jax.random.PRNGKey(0)
    k_feat, k_params = jax.random.split(key)

    # Backbone feature-map stand-in, channels-last (TPU-natural layout):
    # ConvNeXt-Tiny emits 768 channels at H/32 x W/32 spatial resolution.
    features = jax.random.normal(k_feat, (2, 4, 4, 768), dtype=jnp.float32)
    params = init_params(k_params)

    out = age_predictor_head(features, params)
    out = jax.block_until_ready(out)

    ref = _reference(features, params)
    assert out.shape == (2, 1)
    assert jnp.allclose(out, ref, atol=5e-3, rtol=5e-3), (out, ref)

    print("KERNEL_OK")
</pallas_src>

<mosaic_0001>
module attributes {stable_mosaic.version = 11 : i64} {
  func.func @kernel(%arg0: i32, %arg1: i32, %arg2: memref<2x16x768xbf16, #tpu.memory_space<vmem>>, %arg3: memref<768x256xbf16, #tpu.memory_space<vmem>>, %arg4: memref<1x256xf32, #tpu.memory_space<vmem>>, %arg5: memref<256x768xbf16, #tpu.memory_space<vmem>>, %arg6: memref<1x768xf32, #tpu.memory_space<vmem>>, %arg7: memref<768x1024xbf16, #tpu.memory_space<vmem>>, %arg8: memref<1x1024xf32, #tpu.memory_space<vmem>>, %arg9: memref<1024x512xbf16, #tpu.memory_space<vmem>>, %arg10: memref<1x512xf32, #tpu.memory_space<vmem>>, %arg11: memref<512x1xf32, #tpu.memory_space<vmem>>, %arg12: memref<768x1xf32, #tpu.memory_space<vmem>>, %arg13: memref<1x1xf32, #tpu.memory_space<vmem>>, %arg14: memref<2x1xf32, #tpu.memory_space<vmem>>, %arg15: memref<2x768xf32, #tpu.memory_space<vmem>>) attributes {dimension_semantics = [#tpu.dimension_semantics<parallel>, #tpu.dimension_semantics<arbitrary>], iteration_bounds = array<i64: 1, 1>, scalar_prefetch = 0 : i64, scratch_operands = 1 : i64, tpu.core_type = #tpu.core_type<tc>, window_params = [{transform_indices = @transform_0, window_bounds = array<i64: 2, 16, 768>}, {pipeline_mode = #tpu.pipeline_mode<synchronous>, transform_indices = @transform_1, window_bounds = array<i64: 768, 256>}, {pipeline_mode = #tpu.pipeline_mode<synchronous>, transform_indices = @transform_2, window_bounds = array<i64: 1, 256>}, {pipeline_mode = #tpu.pipeline_mode<synchronous>, transform_indices = @transform_3, window_bounds = array<i64: 256, 768>}, {pipeline_mode = #tpu.pipeline_mode<synchronous>, transform_indices = @transform_4, window_bounds = array<i64: 1, 768>}, {pipeline_mode = #tpu.pipeline_mode<synchronous>, transform_indices = @transform_5, window_bounds = array<i64: 768, 1024>}, {pipeline_mode = #tpu.pipeline_mode<synchronous>, transform_indices = @transform_6, window_bounds = array<i64: 1, 1024>}, {pipeline_mode = #tpu.pipeline_mode<synchronous>, transform_indices = @transform_7, window_bounds = array<i64: 1024, 512>}, {pipeline_mode = #tpu.pipeline_mode<synchronous>, transform_indices = @transform_8, window_bounds = array<i64: 1, 512>}, {pipeline_mode = #tpu.pipeline_mode<synchronous>, transform_indices = @transform_9, window_bounds = array<i64: 512, 1>}, {pipeline_mode = #tpu.pipeline_mode<synchronous>, transform_indices = @transform_10, window_bounds = array<i64: 768, 1>}, {pipeline_mode = #tpu.pipeline_mode<synchronous>, transform_indices = @transform_11, window_bounds = array<i64: 1, 1>}, {transform_indices = @transform_12, window_bounds = array<i64: 2, 1>}]} {
    %c0_i32 = arith.constant 0 : i32
    %0 = arith.cmpi eq, %arg1, %c0_i32 : i32
    %1 = arith.extui %0 : i1 to i32
    %c0_i32_0 = arith.constant 0 : i32
    %2 = arith.cmpi ne, %1, %c0_i32_0 : i32
    scf.if %2 {
      %cst_9 = arith.constant 0.000000e+00 : f32
      %12 = vector.broadcast %cst_9 : f32 to vector<2x768xf32>
      %c0_10 = arith.constant 0 : index
      %c0_11 = arith.constant 0 : index
      %13 = vector.load %arg15[%c0_10, %c0_11] : memref<2x768xf32, #tpu.memory_space<vmem>>, vector<2x768xf32>
      tpu.vector_store %arg15[%c0_10, %c0_11], %12 {strides = array<i32>} : memref<2x768xf32, #tpu.memory_space<vmem>>, vector<2x768xf32>,
    } else {
    }
    %c0 = arith.constant 0 : index
    %c0_1 = arith.constant 0 : index
    %3 = vector.load %arg15[%c0, %c0_1] : memref<2x768xf32, #tpu.memory_space<vmem>>, vector<2x768xf32>
    %c0_2 = arith.constant 0 : index
    %c0_3 = arith.constant 0 : index
    %c0_4 = arith.constant 0 : index
    %4 = vector.load %arg2[%c0_2, %c0_3, %c0_4] : memref<2x16x768xbf16, #tpu.memory_space<vmem>>, vector<2x16x768xbf16>
    %5 = arith.extf %4 : vector<2x16x768xbf16> to vector<2x16x768xf32>
    %cst = arith.constant dense<0.000000e+00> : vector<2x768xf32>
    %6 = vector.multi_reduction <add>, %5, %cst [1] : vector<2x16x768xf32> to vector<2x768xf32>
    %7 = arith.addf %3, %6 : vector<2x768xf32>
    %c0_5 = arith.constant 0 : index
    %c0_6 = arith.constant 0 : index
    %8 = vector.load %arg15[%c0_5, %c0_6] : memref<2x768xf32, #tpu.memory_space<vmem>>, vector<2x768xf32>
    tpu.vector_store %arg15[%c0_5, %c0_6], %7 {strides = array<i32>} : memref<2x768xf32, #tpu.memory_space<vmem>>, vector<2x768xf32>,
    %c0_i32_7 = arith.constant 0 : i32
    %9 = arith.cmpi eq, %arg1, %c0_i32_7 : i32
    %10 = arith.extui %9 : i1 to i32
    %c0_i32_8 = arith.constant 0 : i32
    %11 = arith.cmpi ne, %10, %c0_i32_8 : i32
    scf.if %11 {
      %c0_9 = arith.constant 0 : index
      %c0_10 = arith.constant 0 : index
      %12 = vector.load %arg15[%c0_9, %c0_10] : memref<2x768xf32, #tpu.memory_space<vmem>>, vector<2x768xf32>
      %cst_11 = arith.constant 6.250000e-02 : f32
      %13 = vector.broadcast %cst_11 : f32 to vector<2x768xf32>
      %14 = arith.mulf %12, %13 : vector<2x768xf32>
      %15 = arith.truncf %14 : vector<2x768xf32> to vector<2x768xbf16>
      %c0_12 = arith.constant 0 : index
      %c0_13 = arith.constant 0 : index
      %16 = vector.load %arg3[%c0_12, %c0_13] : memref<768x256xbf16, #tpu.memory_space<vmem>>, vector<768x256xbf16>
      %cst_14 = arith.constant dense<0.000000e+00> : vector<2x256xf32>
      %17 = tpu.matmul %15, %16, %cst_14 {dimension_numbers = #tpu.dot_dimension_numbers<[1], [0], [0], [1], [0, 0, 1, 1], [], []>} : vector<2x768xbf16>, vector<768x256xbf16>, vector<2x256xf32> -> vector<2x256xf32>
      %c0_15 = arith.constant 0 : index
      %c0_16 = arith.constant 0 : index
      %18 = vector.load %arg4[%c0_15, %c0_16] : memref<1x256xf32, #tpu.memory_space<vmem>>, vector<1x256xf32>
      %19 = vector.broadcast %18 : vector<1x256xf32> to vector<2x256xf32>
      %20 = arith.addf %17, %19 : vector<2x256xf32>
      %cst_17 = arith.constant 0.000000e+00 : f32
      %21 = vector.broadcast %cst_17 : f32 to vector<2x256xf32>
      %22 = arith.maximumf %20, %21 : vector<2x256xf32>
      %23 = arith.truncf %22 : vector<2x256xf32> to vector<2x256xbf16>
      %c0_18 = arith.constant 0 : index
      %c0_19 = arith.constant 0 : index
      %24 = vector.load %arg5[%c0_18, %c0_19] : memref<256x768xbf16, #tpu.memory_space<vmem>>, vector<256x768xbf16>
      %cst_20 = arith.constant dense<0.000000e+00> : vector<2x768xf32>
      %25 = tpu.matmul %23, %24, %cst_20 {dimension_numbers = #tpu.dot_dimension_numbers<[1], [0], [0], [1], [0, 0, 1, 1], [], []>} : vector<2x256xbf16>, vector<256x768xbf16>, vector<2x768xf32> -> vector<2x768xf32>
      %c0_21 = arith.constant 0 : index
      %c0_22 = arith.constant 0 : index
      %26 = vector.load %arg6[%c0_21, %c0_22] : memref<1x768xf32, #tpu.memory_space<vmem>>, vector<1x768xf32>
      %27 = vector.broadcast %26 : vector<1x768xf32> to vector<2x768xf32>
      %28 = arith.addf %25, %27 : vector<2x768xf32>
      %29 = arith.negf %28 : vector<2x768xf32>
      %30 = math.exp %29 : vector<2x768xf32>
      %cst_23 = arith.constant 1.000000e+00 : f32
      %31 = vector.broadcast %cst_23 : f32 to vector<2x768xf32>
      %32 = arith.addf %31, %30 : vector<2x768xf32>
      %33 = arith.divf %31, %32 : vector<2x768xf32>
      %34 = arith.mulf %14, %33 : vector<2x768xf32>
      %35 = arith.truncf %34 : vector<2x768xf32> to vector<2x768xbf16>
      %c0_24 = arith.constant 0 : index
      %c0_25 = arith.constant 0 : index
      %36 = vector.load %arg7[%c0_24, %c0_25] : memref<768x1024xbf16, #tpu.memory_space<vmem>>, vector<768x1024xbf16>
      %cst_26 = arith.constant dense<0.000000e+00> : vector<2x1024xf32>
      %37 = tpu.matmul %35, %36, %cst_26 {dimension_numbers = #tpu.dot_dimension_numbers<[1], [0], [0], [1], [0, 0, 1, 1], [], []>} : vector<2x768xbf16>, vector<768x1024xbf16>, vector<2x1024xf32> -> vector<2x1024xf32>
      %c0_27 = arith.constant 0 : index
      %c0_28 = arith.constant 0 : index
      %38 = vector.load %arg8[%c0_27, %c0_28] : memref<1x1024xf32, #tpu.memory_space<vmem>>, vector<1x1024xf32>
      %39 = vector.broadcast %38 : vector<1x1024xf32> to vector<2x1024xf32>
      %40 = arith.addf %37, %39 : vector<2x1024xf32>
      %cst_29 = arith.constant 5.000000e-01 : f32
      %41 = vector.broadcast %cst_29 : f32 to vector<2x1024xf32>
      %42 = arith.mulf %41, %40 : vector<2x1024xf32>
      %cst_30 = arith.constant 0.707106769 : f32
      %43 = vector.broadcast %cst_30 : f32 to vector<2x1024xf32>
      %44 = arith.mulf %40, %43 : vector<2x1024xf32>
      %45 = math.erf %44 : vector<2x1024xf32>
      %cst_31 = arith.constant 1.000000e+00 : f32
      %46 = vector.broadcast %cst_31 : f32 to vector<2x1024xf32>
      %47 = arith.addf %46, %45 : vector<2x1024xf32>
      %48 = arith.mulf %42, %47 : vector<2x1024xf32>
      %49 = arith.truncf %48 : vector<2x1024xf32> to vector<2x1024xbf16>
      %c0_32 = arith.constant 0 : index
      %c0_33 = arith.constant 0 : index
      %50 = vector.load %arg9[%c0_32, %c0_33] : memref<1024x512xbf16, #tpu.memory_space<vmem>>, vector<1024x512xbf16>
      %cst_34 = arith.constant dense<0.000000e+00> : vector<2x512xf32>
      %51 = tpu.matmul %49, %50, %cst_34 {dimension_numbers = #tpu.dot_dimension_numbers<[1], [0], [0], [1], [0, 0, 1, 1], [], []>} : vector<2x1024xbf16>, vector<1024x512xbf16>, vector<2x512xf32> -> vector<2x512xf32>
      %c0_35 = arith.constant 0 : index
      %c0_36 = arith.constant 0 : index
      %52 = vector.load %arg10[%c0_35, %c0_36] : memref<1x512xf32, #tpu.memory_space<vmem>>, vector<1x512xf32>
      %53 = vector.broadcast %52 : vector<1x512xf32> to vector<2x512xf32>
      %54 = arith.addf %51, %53 : vector<2x512xf32>
      %cst_37 = arith.constant 5.000000e-01 : f32
      %55 = vector.broadcast %cst_37 : f32 to vector<2x512xf32>
      %56 = arith.mulf %55, %54 : vector<2x512xf32>
      %cst_38 = arith.constant 0.707106769 : f32
      %57 = vector.broadcast %cst_38 : f32 to vector<2x512xf32>
      %58 = arith.mulf %54, %57 : vector<2x512xf32>
      %59 = math.erf %58 : vector<2x512xf32>
      %cst_39 = arith.constant 1.000000e+00 : f32
      %60 = vector.broadcast %cst_39 : f32 to vector<2x512xf32>
      %61 = arith.addf %60, %59 : vector<2x512xf32>
      %62 = arith.mulf %56, %61 : vector<2x512xf32>
      %c0_40 = arith.constant 0 : index
      %c0_41 = arith.constant 0 : index
      %63 = vector.load %arg11[%c0_40, %c0_41] : memref<512x1xf32, #tpu.memory_space<vmem>>, vector<512x1xf32>
      %cst_42 = arith.constant dense<0.000000e+00> : vector<2x1xf32>
      %64 = tpu.matmul %62, %63, %cst_42 {dimension_numbers = #tpu.dot_dimension_numbers<[1], [0], [0], [1], [0, 0, 1, 1], [], []>} : vector<2x512xf32>, vector<512x1xf32>, vector<2x1xf32> -> vector<2x1xf32>
      %c0_43 = arith.constant 0 : index
      %c0_44 = arith.constant 0 : index
      %65 = vector.load %arg12[%c0_43, %c0_44] : memref<768x1xf32, #tpu.memory_space<vmem>>, vector<768x1xf32>
      %cst_45 = arith.constant dense<0.000000e+00> : vector<2x1xf32>
      %66 = tpu.matmul %34, %65, %cst_45 {dimension_numbers = #tpu.dot_dimension_numbers<[1], [0], [0], [1], [0, 0, 1, 1], [], []>} : vector<2x768xf32>, vector<768x1xf32>, vector<2x1xf32> -> vector<2x1xf32>
      %67 = arith.addf %64, %66 : vector<2x1xf32>
      %c0_46 = arith.constant 0 : index
      %c0_47 = arith.constant 0 : index
      %68 = vector.load %arg13[%c0_46, %c0_47] : memref<1x1xf32, #tpu.memory_space<vmem>>, vector<1x1xf32>
      %69 = vector.broadcast %68 : vector<1x1xf32> to vector<2x1xf32>
      %70 = arith.addf %67, %69 : vector<2x1xf32>
      %c0_48 = arith.constant 0 : index
      %c0_49 = arith.constant 0 : index
      %71 = vector.load %arg14[%c0_48, %c0_49] : memref<2x1xf32, #tpu.memory_space<vmem>>, vector<2x1xf32>
      tpu.vector_store %arg14[%c0_48, %c0_49], %70 {strides = array<i32>} : memref<2x1xf32, #tpu.memory_space<vmem>>, vector<2x1xf32>,
    } else {
    }
    return
  }
  func.func @transform_0(%arg0: i32, %arg1: i32) -> (i32, i32, i32) {
    %c0_i32 = arith.constant 0 : i32
    %c0_i32_0 = arith.constant 0 : i32
    return %arg0, %arg1, %c0_i32 : i32, i32, i32
  }
  func.func @transform_1(%arg0: i32, %arg1: i32) -> (i32, i32) {
    %c0_i32 = arith.constant 0 : i32
    %c0_i32_0 = arith.constant 0 : i32
    %c0_i32_1 = arith.constant 0 : i32
    return %c0_i32, %c0_i32_0 : i32, i32
  }
  func.func @transform_2(%arg0: i32, %arg1: i32) -> (i32, i32) {
    %c0_i32 = arith.constant 0 : i32
    %c0_i32_0 = arith.constant 0 : i32
    %c0_i32_1 = arith.constant 0 : i32
    return %c0_i32, %c0_i32_0 : i32, i32
  }
  func.func @transform_3(%arg0: i32, %arg1: i32) -> (i32, i32) {
    %c0_i32 = arith.constant 0 : i32
    %c0_i32_0 = arith.constant 0 : i32
    %c0_i32_1 = arith.constant 0 : i32
    return %c0_i32, %c0_i32_0 : i32, i32
  }
  func.func @transform_4(%arg0: i32, %arg1: i32) -> (i32, i32) {
    %c0_i32 = arith.constant 0 : i32
    %c0_i32_0 = arith.constant 0 : i32
    %c0_i32_1 = arith.constant 0 : i32
    return %c0_i32, %c0_i32_0 : i32, i32
  }
  func.func @transform_5(%arg0: i32, %arg1: i32) -> (i32, i32) {
    %c0_i32 = arith.constant 0 : i32
    %c0_i32_0 = arith.constant 0 : i32
    %c0_i32_1 = arith.constant 0 : i32
    return %c0_i32, %c0_i32_0 : i32, i32
  }
  func.func @transform_6(%arg0: i32, %arg1: i32) -> (i32, i32) {
    %c0_i32 = arith.constant 0 : i32
    %c0_i32_0 = arith.constant 0 : i32
    %c0_i32_1 = arith.constant 0 : i32
    return %c0_i32, %c0_i32_0 : i32, i32
  }
  func.func @transform_7(%arg0: i32, %arg1: i32) -> (i32, i32) {
    %c0_i32 = arith.constant 0 : i32
    %c0_i32_0 = arith.constant 0 : i32
    %c0_i32_1 = arith.constant 0 : i32
    return %c0_i32, %c0_i32_0 : i32, i32
  }
  func.func @transform_8(%arg0: i32, %arg1: i32) -> (i32, i32) {
    %c0_i32 = arith.constant 0 : i32
    %c0_i32_0 = arith.constant 0 : i32
    %c0_i32_1 = arith.constant 0 : i32
    return %c0_i32, %c0_i32_0 : i32, i32
  }
  func.func @transform_9(%arg0: i32, %arg1: i32) -> (i32, i32) {
    %c0_i32 = arith.constant 0 : i32
    %c0_i32_0 = arith.constant 0 : i32
    %c0_i32_1 = arith.constant 0 : i32
    return %c0_i32, %c0_i32_0 : i32, i32
  }
  func.func @transform_10(%arg0: i32, %arg1: i32) -> (i32, i32) {
    %c0_i32 = arith.constant 0 : i32
    %c0_i32_0 = arith.constant 0 : i32
    %c0_i32_1 = arith.constant 0 : i32
    return %c0_i32, %c0_i32_0 : i32, i32
  }
  func.func @transform_11(%arg0: i32, %arg1: i32) -> (i32, i32) {
    %c0_i32 = arith.constant 0 : i32
    %c0_i32_0 = arith.constant 0 : i32
    %c0_i32_1 = arith.constant 0 : i32
    return %c0_i32, %c0_i32_0 : i32, i32
  }
  func.func @transform_12(%arg0: i32, %arg1: i32) -> (i32, i32) {
    %c0_i32 = arith.constant 0 : i32
    %c0_i32_0 = arith.constant 0 : i32
    return %arg0, %c0_i32 : i32, i32
  }
}

</mosaic_0001>

<bundles_post_ra>
// kernel: tpu_custom_call.1
= control target key start
LH: loop header
LB: loop body
LE: loop exit
PB: predicated region body
PF: predicated region fallthrough
CT: control target
= control target key end

     0   :  { %s10145_s0 = inlined_call_operand.hbm [shape: bf16[2,16,768], index: 0, kind: input, shape index: {}]   ;;  %s10146_s1 = inlined_call_operand.hbm [shape: bf16[768,256], index: 1, kind: input, shape index: {}]   ;;  %s10147_s2 = inlined_call_operand.hbm [shape: f32[1,256], index: 2, kind: input, shape index: {}]   ;;  %s10148_s3 = inlined_call_operand.hbm [shape: bf16[256,768], index: 3, kind: input, shape index: {}]   ;;  %s10149_s4 = inlined_call_operand.hbm [shape: f32[1,768], index: 4, kind: input, shape index: {}]   ;;  %s10150_s5 = inlined_call_operand.hbm [shape: bf16[768,1024], index: 5, kind: input, shape index: {}]   ;;  %s10151_s6 = inlined_call_operand.hbm [shape: f32[1,1024], index: 6, kind: input, shape index: {}]   ;;  %s10152_s7 = inlined_call_operand.hbm [shape: bf16[1024,512], index: 7, kind: input, shape index: {}]   ;;  %s10153_s8 = inlined_call_operand.hbm [shape: f32[1,512], index: 8, kind: input, shape index: {}]   ;;  %s10154_s9 = inlined_call_operand.vmem [shape: f32[512,1], index: 9, kind: input, shape index: {}]   ;;  %s10155_s10 = inlined_call_operand.vmem [shape: f32[768,1], index: 10, kind: input, shape index: {}]   ;;  %s10156_s11 = inlined_call_operand.<no memory space> [shape: f32[1,1], index: 11, kind: input, shape index: {}]   ;;  %s10157_s12 = inlined_call_operand.vmem [shape: f32[2,1], index: 12, kind: output, shape index: {}]  }
   0x1   :  { %v17_v0 = vstv %s10156_s11 }
   0x2   :  { %18 = vst [vmem:[#allocation3] sm:$0x1] %v17_v0 }
   0x3   :  { %19 = vsyncpa [#allocation5], 0 }
   0x4   :  { %20 = vsyncpa [#allocation7], 0 }
   0x5   :  { %21 = vsyncpa [#allocation10], 0 }
   0x6   :  { %22 = vsyncpa [#allocation13], 0 }
   0x7   :  { %23 = vsyncpa [#allocation16], 0  ;;  %s9240_s23 = smov [#allocation6]  }
   0x8   :  { %s41_s24 = sshll.u32 %s9240_s23, 4  ;;  %s42_s24 = int_to_ptr.vmem [resolvable:$true] %s41_s24 }
   0x9   :  { %s9058_s25 = scalar_lea.vmem %s42_s24, 12288  ;;  %p9063_p1 = scmp.lt.s32.totalorder %s42_s24, %s42_s24 }
   0xa   :  { %p9059_p0 = scmp.ne.s32.totalorder %s42_s24, %s9058_s25  ;;  %p9064_p2 = scmp.lt.s32.totalorder %s9058_s25, %s9058_s25 }
   0xc   :  { %p9065_p3 = por %p9064_p2, %p9063_p1 }
   0xe   :  { %p9066_p4 = pnand %p9065_p3, %p9059_p0 }
  0x10   :  { %9069 = shalt.err (!%p9066_p4)
}
  0x11   :  { %s9241_s26 = smov 128   ;;  %s9242_s27 = smov 8  }
  0x12   :  { %47 = dma.hbm_to_vmem [thread:$0]  %s10146_s1, 12288, %s42_s24, [#allocation7], %s9241_s26, %s9241_s26, %s9242_s27  }
  0x13   :  { %s9243_s29 = smov [#allocation9]   ;;  %s9244_s13 = smov [#allocation12]  }
  0x14   :  { %s63_s30 = sshll.u32 %s9243_s29, 4  ;;  %s85_s14 = sshll.u32 %s9244_s13, 4  ;;  %s64_s30 = int_to_ptr.vmem [resolvable:$true] %s63_s30  ;;  %s86_s14 = int_to_ptr.vmem [resolvable:$true] %s85_s14 }
  0x15   :  { %s9078_s15 = scalar_lea.vmem %s64_s30, 12288  ;;  %p9083_p6 = scmp.lt.s32.totalorder %s64_s30, %s64_s30 }
  0x16   :  { %p9079_p5 = scmp.ne.s32.totalorder %s64_s30, %s9078_s15  ;;  %p9084_p7 = scmp.lt.s32.totalorder %s9078_s15, %s9078_s15 }
  0x18   :  { %p9085_p8 = por %p9084_p7, %p9083_p6 }
  0x1a   :  { %p9086_p9 = pnand %p9085_p8, %p9079_p5 }
  0x1c   :  { %9089 = shalt.err (!%p9086_p9)
}
  0x1d   :  { %s9245_s16 = smov 384   ;;  %s9246_s17 = smov 24  }
  0x1e   :  { %69 = dma.hbm_to_vmem [thread:$0]  %s10148_s3, 12288, %s64_s30, [#allocation10], %s9245_s16, %s9245_s16, %s9246_s17  }
  0x1f   :  { %s9098_s1 = scalar_lea.vmem %s86_s14, 49152  ;;  %p9103_p11 = scmp.lt.s32.totalorder %s86_s14, %s86_s14 }
  0x20   :  { %p9099_p10 = scmp.ne.s32.totalorder %s86_s14, %s9098_s1  ;;  %p9104_p12 = scmp.lt.s32.totalorder %s9098_s1, %s9098_s1 }
  0x22   :  { %p9105_p13 = por %p9104_p12, %p9103_p11 }
  0x24   :  { %p9106_p0 = pnand %p9105_p13, %p9099_p10 }
  0x26   :  { %9109 = shalt.err (!%p9106_p0)
}
  0x27   :  { %s9247_s20 = smov 512   ;;  %s9248_s21 = smov 32  }
  0x28   :  { %91 = dma.hbm_to_vmem [thread:$0]  %s10150_s5, 49152, %s86_s14, [#allocation13], %s9247_s20, %s9247_s20, %s9248_s21  }
  0x29   :  { %s9249_s24 = smov [#allocation15]  }
  0x2a   :  { %s107_s25 = sshll.u32 %s9249_s24, 4  ;;  %s108_s25 = int_to_ptr.vmem [resolvable:$true] %s107_s25 }
  0x2b   :  { %s9118_s26 = scalar_lea.vmem %s108_s25, 32768  ;;  %p9123_p2 = scmp.lt.s32.totalorder %s108_s25, %s108_s25 }
  0x2c   :  { %p9119_p1 = scmp.ne.s32.totalorder %s108_s25, %s9118_s26  ;;  %p9124_p3 = scmp.lt.s32.totalorder %s9118_s26, %s9118_s26 }
  0x2e   :  { %p9125_p4 = por %p9124_p3, %p9123_p2 }
  0x30   :  { %p9126_p5 = pnand %p9125_p4, %p9119_p1 }
  0x32   :  { %9129 = shalt.err (!%p9126_p5)
}
  0x33   :  { %s9250_s3 = smov 256   ;;  %s9251_s27 = smov 16  }
  0x34   :  { %113 = dma.hbm_to_vmem [thread:$0]  %s10152_s7, 32768, %s108_s25, [#allocation16], %s9250_s3, %s9250_s3, %s9251_s27  }
  0x35   :  { %s9252_s29 = smov [#allocation4]   ;;  %s9253_s13 = smov [#allocation8]  }
  0x36   :  { %s29_s30 = sshll.u32 %s9252_s29, 4  ;;  %s54_s5 = sshll.u32 %s9253_s13, 4  ;;  %s30_s30 = int_to_ptr.vmem [resolvable:$true] %s29_s30  ;;  %s55_s5 = int_to_ptr.vmem [resolvable:$true] %s54_s5 }
  0x37   :  { %s9138_s14 = scalar_lea.vmem %s30_s30, 1536  ;;  %p9143_p7 = scmp.lt.s32.totalorder %s30_s30, %s30_s30 }
  0x38   :  { %p9139_p6 = scmp.ne.s32.totalorder %s30_s30, %s9138_s14  ;;  %p9144_p8 = scmp.lt.s32.totalorder %s9138_s14, %s9138_s14 }
  0x3a   :  { %p9145_p9 = por %p9144_p8, %p9143_p7 }
  0x3c   :  { %p9146_p10 = pnand %p9145_p9, %p9139_p6 }
  0x3e   :  { %9149 = shalt.err (!%p9146_p10)
}
  0x3f   :  { %35 = dma.hbm_to_vmem [thread:$0]  %s10145_s0, 1536, %s30_s30, [#allocation5], %s9245_s16, %s9245_s16, %s9246_s17  }
  0x40   :  { %s9158_s7 = scalar_lea.vmem %s55_s5, 32  ;;  %p9163_p12 = scmp.lt.s32.totalorder %s55_s5, %s55_s5 }
  0x41   :  { %p9159_p11 = scmp.ne.s32.totalorder %s55_s5, %s9158_s7  ;;  %p9164_p13 = scmp.lt.s32.totalorder %s9158_s7, %s9158_s7 }
  0x43   :  { %p9165_p0 = por %p9164_p13, %p9163_p12 }
  0x45   :  { %p9166_p1 = pnand %p9165_p0, %p9159_p11 }
  0x47   :  { %9169 = shalt.err (!%p9166_p1)
}
  0x48   :  { %57 = dma.hbm_to_vmem [thread:$0]  %s10147_s2, 32, %s55_s5, [#allocation7]  }
  0x49   :  { %s9254_s20 = smov [#allocation11]   ;;  %s9255_s22 = smov [#allocation14]  }
  0x4a   :  { %s76_s21 = sshll.u32 %s9254_s20, 4  ;;  %s98_s23 = sshll.u32 %s9255_s22, 4  ;;  %s77_s21 = int_to_ptr.vmem [resolvable:$true] %s76_s21  ;;  %s99_s23 = int_to_ptr.vmem [resolvable:$true] %s98_s23 }
  0x4b   :  { %s9178_s24 = scalar_lea.vmem %s77_s21, 96  ;;  %p9183_p3 = scmp.lt.s32.totalorder %s77_s21, %s77_s21 }
  0x4c   :  { %p9179_p2 = scmp.ne.s32.totalorder %s77_s21, %s9178_s24  ;;  %p9184_p4 = scmp.lt.s32.totalorder %s9178_s24, %s9178_s24 }
  0x4e   :  { %p9185_p5 = por %p9184_p4, %p9183_p3 }
  0x50   :  { %p9186_p6 = pnand %p9185_p5, %p9179_p2 }
  0x52   :  { %9189 = shalt.err (!%p9186_p6)
}
  0x53   :  { %79 = dma.hbm_to_vmem [thread:$0]  %s10149_s4, 96, %s77_s21, [#allocation10]  }
  0x54   :  { %s9198_s17 = scalar_lea.vmem %s99_s23, 128  ;;  %p9203_p8 = scmp.lt.s32.totalorder %s99_s23, %s99_s23 }
  0x55   :  { %p9199_p7 = scmp.ne.s32.totalorder %s99_s23, %s9198_s17  ;;  %p9204_p9 = scmp.lt.s32.totalorder %s9198_s17, %s9198_s17 }
  0x57   :  { %p9205_p10 = por %p9204_p9, %p9203_p8 }
  0x59   :  { %p9206_p11 = pnand %p9205_p10, %p9199_p7 }
  0x5b   :  { %9209 = shalt.err (!%p9206_p11)
}
  0x5c   :  { %101 = dma.hbm_to_vmem [thread:$0]  %s10151_s6, 128, %s99_s23, [#allocation13]  }
  0x5d   :  { %s9256_s26 = smov [#allocation17]  }
  0x5e   :  { %s120_s3 = sshll.u32 %s9256_s26, 4  ;;  %s121_s3 = int_to_ptr.vmem [resolvable:$true] %s120_s3 }
  0x5f   :  { %s9218_s27 = scalar_lea.vmem %s121_s3, 64  ;;  %p9223_p13 = scmp.lt.s32.totalorder %s121_s3, %s121_s3 }
  0x60   :  { %p9219_p12 = scmp.ne.s32.totalorder %s121_s3, %s9218_s27  ;;  %p9224_p0 = scmp.lt.s32.totalorder %s9218_s27, %s9218_s27 }
  0x62   :  { %p9225_p1 = por %p9224_p0, %p9223_p13 }
  0x64   :  { %p9226_p2 = pnand %p9225_p1, %p9219_p12 }
  0x66   :  { %9229 = shalt.err (!%p9226_p2)
}
  0x67   :  { %123 = dma.hbm_to_vmem [thread:$0]  %s10153_s8, 64, %s121_s3, [#allocation16]  }
  0x68   :  { %9230 = dma.done.wait [#allocation5], 1536  }
  0x69   :  { %9231 = vsyncadd [#allocation5], 4294965760 }
  0x6a   :  { %9232 = dma.done.wait [#allocation7], 12320  }
  0x6b   :  { %9233 = vsyncadd [#allocation7], 4294954976 }
  0x6c   :  { %9234 = dma.done.wait [#allocation10], 12384  }
  0x6d   :  { %9235 = vsyncadd [#allocation10], 4294954912 }
  0x6e   :  { %9236 = dma.done.wait [#allocation13], 49280  }
  0x6f   :  { %9237 = vsyncadd [#allocation13], 4294918016 }
  0x70   :  { %9238 = dma.done.wait [#allocation16], 32832  }
  0x71   :  { %9239 = vsyncadd [#allocation16], 4294934464  ;;  %v9257_v1 = vmov 0.0   ;;  %v8329_v2 = vld [vmem:[#allocation6 + $0x74] ss:$8 sps:$4 sm:$0xff]   ;;  %v302_v42 = vlaneseq  ;;  %v165_v55 = vld [vmem:[#allocation4] sm:$0xff] }
  0x72   :  { %162 = vst [vmem:[#allocation2 + $0x8] sm:$0xf] %v9257_v1  ;;  %v8331_v3 = vld [vmem:[#allocation6 + $0x70] ss:$8 sps:$4 sm:$0xff]   ;;  %1007 = vmatprep.subr.bf16.mxu0 %v8329_v2  ;;  %v8332_v4 = vld [vmem:[#allocation6 + $0x174] ss:$8 sps:$4 sm:$0xff]   ;;  %v177_v61 = vunpack.c.l.bf16 %v165_v55  ;;  %v178_v62 = vunpack.c.h.bf16 %v165_v55 }
  0x73   :  { %v8334_v5 = vld [vmem:[#allocation6 + $0x170] ss:$8 sps:$4 sm:$0xff]   ;;  %1008 = vmatpush1.bf16.msra.mxu0 %v8331_v3  ;;  %v8335_v6 = vld [vmem:[#allocation6 + $0x64] ss:$8 sps:$4 sm:$0xff]   ;;  %v8337_v7 = vld [vmem:[#allocation6 + $0x60] ss:$8 sps:$4 sm:$0xff]   ;;  %1048 = vmatprep.subr.bf16.mxu1 %v8332_v4 }
  0x74   :  { %v8338_v8 = vld [vmem:[#allocation6 + $0x164] ss:$8 sps:$4 sm:$0xff]   ;;  %1049 = vmatpush1.bf16.msra.mxu1 %v8334_v5  ;;  %1009 = vmatprep.subr.bf16.mxu0 %v8335_v6  ;;  %v8340_v9 = vld [vmem:[#allocation6 + $0x160] ss:$8 sps:$4 sm:$0xff]   ;;  %v8341_v10 = vld [vmem:[#allocation6 + $0x54] ss:$8 sps:$4 sm:$0xff]  }
  0x75   :  { %1050 = vmatprep.subr.bf16.mxu1 %v8338_v8  ;;  %v8343_v11 = vld [vmem:[#allocation6 + $0x50] ss:$8 sps:$4 sm:$0xff]   ;;  %v8344_v12 = vld [vmem:[#allocation6 + $0x154] ss:$8 sps:$4 sm:$0xff]   ;;  %v8347_v13 = vld [vmem:[#allocation6 + $0x44] ss:$8 sps:$4 sm:$0xff]  }
  0x76   :  { %v8346_v14 = vld [vmem:[#allocation6 + $0x150] ss:$8 sps:$4 sm:$0xff]   ;;  %v8350_v15 = vld [vmem:[#allocation6 + $0x144] ss:$8 sps:$4 sm:$0xff]   ;;  %v8349_v16 = vld [vmem:[#allocation6 + $0x40] ss:$8 sps:$4 sm:$0xff]  }
  0x77   :  { %1010 = vmatpush1.bf16.msra.mxu0 %v8337_v7  ;;  %v8353_v17 = vld [vmem:[#allocation6 + $0x34] ss:$8 sps:$4 sm:$0xff]   ;;  %v8352_v18 = vld [vmem:[#allocation6 + $0x140] ss:$8 sps:$4 sm:$0xff]   ;;  %v8355_v20 = vld [vmem:[#allocation6 + $0x30] ss:$8 sps:$4 sm:$0xff]  }
  0x78   :  { %1011 = vmatprep.subr.bf16.mxu0 %v8341_v10  ;;  %1051 = vmatpush1.bf16.msra.mxu1 %v8340_v9  ;;  %v8356_v19 = vld [vmem:[#allocation6 + $0x134] ss:$8 sps:$4 sm:$0xff]   ;;  %v8359_v21 = vld [vmem:[#allocation6 + $0x24] ss:$8 sps:$4 sm:$0xff]   ;;  %v8358_v22 = vld [vmem:[#allocation6 + $0x130] ss:$8 sps:$4 sm:$0xff]  }
  0x79   :  { %1052 = vmatprep.subr.bf16.mxu1 %v8344_v12  ;;  %v8362_v23 = vld [vmem:[#allocation6 + $0x124] ss:$8 sps:$4 sm:$0xff]   ;;  %v8361_v24 = vld [vmem:[#allocation6 + $0x20] ss:$8 sps:$4 sm:$0xff]   ;;  %v8365_v25 = vld [vmem:[#allocation6 + $0x14] ss:$8 sps:$4 sm:$0xff]  }
  0x7a   :  { %v8364_v26 = vld [vmem:[#allocation6 + $0x120] ss:$8 sps:$4 sm:$0xff]   ;;  %v8368_v27 = vld [vmem:[#allocation6 + $0x114] ss:$8 sps:$4 sm:$0xff]   ;;  %v8367_v28 = vld [vmem:[#allocation6 + $0x10] ss:$8 sps:$4 sm:$0xff]  }
  0x7b   :  { %1012 = vmatpush1.bf16.msra.mxu0 %v8343_v11  ;;  %v8371_v29 = vld [vmem:[#allocation6 + $0x4] ss:$8 sps:$4 sm:$0xff]   ;;  %v8370_v30 = vld [vmem:[#allocation6 + $0x110] ss:$8 sps:$4 sm:$0xff]   ;;  %v8373_v32 = vld [vmem:[#allocation6] ss:$8 sps:$4 sm:$0xff]  }
  0x7c   :  { %1013 = vmatprep.subr.bf16.mxu0 %v8347_v13  ;;  %1053 = vmatpush1.bf16.msra.mxu1 %v8346_v14  ;;  %v8374_v31 = vld [vmem:[#allocation6 + $0x104] ss:$8 sps:$4 sm:$0xff]   ;;  %v8377_v33 = vld [vmem:[#allocation6 + $0xf4] ss:$8 sps:$4 sm:$0xff]   ;;  %v8376_v34 = vld [vmem:[#allocation6 + $0x100] ss:$8 sps:$4 sm:$0xff]  }
  0x7d   :  { %1054 = vmatprep.subr.bf16.mxu1 %v8350_v15  ;;  %v8380_v35 = vld [vmem:[#allocation6 + $0x1f4] ss:$8 sps:$4 sm:$0xff]   ;;  %v8379_v36 = vld [vmem:[#allocation6 + $0xf0] ss:$8 sps:$4 sm:$0xff]   ;;  %v8383_v37 = vld [vmem:[#allocation6 + $0xe4] ss:$8 sps:$4 sm:$0xff]  }
  0x7e   :  { %v8382_v38 = vld [vmem:[#allocation6 + $0x1f0] ss:$8 sps:$4 sm:$0xff]   ;;  %v8386_v39 = vld [vmem:[#allocation6 + $0x1e4] ss:$8 sps:$4 sm:$0xff]   ;;  %v9258_v40 = vmov 1983009808  }
  0x7f   :  { %1014 = vmatpush1.bf16.msra.mxu0 %v8349_v16  ;;  %v300_v41 = vunpack.c.l.s4 %v9258_v40  ;;  %v8385_v43 = vld [vmem:[#allocation6 + $0xe0] ss:$8 sps:$4 sm:$0xff]   ;;  %v8389_v44 = vld [vmem:[#allocation6 + $0xd4] ss:$8 sps:$4 sm:$0xff]   ;;  %v9360_v48 = vshrl.u32 %v302_v42, 7  ;;  %vm352_vm0 = vcmask 1041409  }
  0x80   :  { %1015 = vmatprep.subr.bf16.mxu0 %v8353_v17  ;;  %1055 = vmatpush1.bf16.msra.mxu1 %v8352_v18  ;;  %v8388_v45 = vld [vmem:[#allocation6 + $0x1e0] ss:$8 sps:$4 sm:$0xff]   ;;  %v8392_v46 = vld [vmem:[#allocation6 + $0x1d4] ss:$8 sps:$4 sm:$0xff]   ;;  %v8391_v49 = vld [vmem:[#allocation6 + $0xd0] ss:$8 sps:$4 sm:$0xff]  }
  0x81   :  { %1056 = vmatprep.subr.bf16.mxu1 %v8356_v19  ;;  %v301_v47 = vunpack.c.0.s8 %v300_v41  ;;  %v8394_v50 = vld [vmem:[#allocation6 + $0x1d0] ss:$8 sps:$4 sm:$0xff]   ;;  %v8395_v51 = vld [vmem:[#allocation6 + $0xc4] ss:$8 sps:$4 sm:$0xff]   ;;  %v8397_v52 = vld [vmem:[#allocation6 + $0xc0] ss:$8 sps:$4 sm:$0xff]  }
  0x82   :  { %v8398_v53 = vld [vmem:[#allocation6 + $0x1c4] ss:$8 sps:$4 sm:$0xff]   ;;  %v8401_v54 = vld [vmem:[#allocation6 + $0xb4] ss:$8 sps:$4 sm:$0xff]   ;;  %v8400_v8 = vld [vmem:[#allocation6 + $0x1c0] ss:$8 sps:$4 sm:$0xff]  }
  0x83   :  { %1016 = vmatpush1.bf16.msra.mxu0 %v8355_v20  ;;  %v166_v56 = vld [vmem:[#allocation4 + $0x8] sm:$0xff]  ;;  %v9363_v57 = vsub.s32 %v301_v47, %v9360_v48  ;;  %v168_v58 = vld [vmem:[#allocation4 + $0x18] sm:$0xff]  ;;  %v169_v59 = vld [vmem:[#allocation4 + $0x20] sm:$0xff]  ;;  %vm354_vm1 = vcmask 1043459   ;;  %vm356_vm2 = vcmask 1045509   ;;  %vm358_vm3 = vcmask 1047559  }
  0x84   :  { %1017 = vmatprep.subr.bf16.mxu0 %v8359_v21  ;;  %1057 = vmatpush1.bf16.msra.mxu1 %v8358_v22  ;;  %v171_v60 = vld [vmem:[#allocation4 + $0x30] sm:$0xff]  ;;  %v179_v63 = vunpack.c.l.bf16 %v166_v56  ;;  %v180_v0 = vunpack.c.h.bf16 %v166_v56  ;;  %v172_v1 = vld [vmem:[#allocation4 + $0x38] sm:$0xff]  ;;  %v174_v2 = vld [vmem:[#allocation4 + $0x48] sm:$0xff]  ;;  %v183_v4 = vunpack.c.l.bf16 %v168_v58  ;;  %v184_v5 = vunpack.c.h.bf16 %v168_v58 }
  0x85   :  { %1058 = vmatprep.subr.bf16.mxu1 %v8362_v23  ;;  %v175_v3 = vld [vmem:[#allocation4 + $0x50] sm:$0xff]  ;;  %v185_v6 = vunpack.c.l.bf16 %v169_v59  ;;  %v186_v7 = vunpack.c.h.bf16 %v169_v59  ;;  %v189_v9 = vunpack.c.l.bf16 %v171_v60  ;;  %v190_v10 = vunpack.c.h.bf16 %v171_v60 }
  0x86   :  { %v191_v11 = vunpack.c.l.bf16 %v172_v1  ;;  %v192_v12 = vunpack.c.h.bf16 %v172_v1  ;;  %v8404_v13 = vld [vmem:[#allocation6 + $0x1b4] ss:$8 sps:$4 sm:$0xff]   ;;  %v195_v14 = vunpack.c.l.bf16 %v174_v2  ;;  %v196_v15 = vunpack.c.h.bf16 %v174_v2  ;;  %v8403_v18 = vld [vmem:[#allocation6 + $0xb0] ss:$8 sps:$4 sm:$0xff]   ;;  %v8419_v2 = vld [vmem:[#allocation6 + $0x84] ss:$8 sps:$4 sm:$0xff]  }
  0x87   :  { %1018 = vmatpush1.bf16.msra.mxu0 %v8361_v24  ;;  %v197_v16 = vunpack.c.l.bf16 %v175_v3  ;;  %v198_v17 = vunpack.c.h.bf16 %v175_v3  ;;  %v8406_v19 = vld [vmem:[#allocation6 + $0x1b0] ss:$8 sps:$4 sm:$0xff]   ;;  %v201_v20 = vadd.f32 %v183_v4, %v177_v61  ;;  %v208_v21 = vadd.f32 %v184_v5, %v178_v62  ;;  %v8407_v24 = vld [vmem:[#allocation6 + $0xa4] ss:$8 sps:$4 sm:$0xff]  }
  0x88   :  { %1019 = vmatprep.subr.bf16.mxu0 %v8365_v25  ;;  %1059 = vmatpush1.bf16.msra.mxu1 %v8364_v26  ;;  %v215_v22 = vadd.f32 %v185_v6, %v179_v63  ;;  %v222_v23 = vadd.f32 %v186_v7, %v180_v0  ;;  %v243_v25 = vadd.f32 %v195_v14, %v189_v9  ;;  %v8415_v60 = vld [vmem:[#allocation6 + $0x90] ss:$8 sps:$4 sm:$0xff]   ;;  %vm7285_vm4 = vcmask 1024  }
  0x89   :  { %1060 = vmatprep.subr.bf16.mxu1 %v8368_v27  ;;  %v250_v26 = vadd.f32 %v196_v15, %v190_v10  ;;  %v257_v27 = vadd.f32 %v197_v16, %v191_v11  ;;  %v8418_v1 = vld [vmem:[#allocation6 + $0x190] ss:$8 sps:$4 sm:$0xff]   ;;  %v8422_v11 = vld [vmem:[#allocation6 + $0x184] ss:$8 sps:$4 sm:$0xff]   ;;  %v8421_v16 = vld [vmem:[#allocation6 + $0x80] ss:$8 sps:$4 sm:$0xff]  }
  0x8b   :  { %1020 = vmatpush1.bf16.msra.mxu0 %v8367_v28  ;;  %v264_v28 = vadd.f32 %v198_v17, %v192_v12 }
  0x8c   :  { %1021 = vmatprep.subr.bf16.mxu0 %v8371_v29  ;;  %1061 = vmatpush1.bf16.msra.mxu1 %v8370_v30  ;;  %v8410_v29 = vld [vmem:[#allocation6 + $0x1a4] ss:$8 sps:$4 sm:$0xff]   ;;  %v202_v30 = vrot.slane %v201_v20, 4 }
  0x8d   :  { %1062 = vmatprep.subr.bf16.mxu1 %v8374_v31  ;;  %v209_v31 = vrot.slane %v208_v21, 4 }
  0x8f   :  { %1022 = vmatpush1.bf16.msra.mxu0 %v8373_v32  ;;  %v216_v32 = vrot.slane %v215_v22, 4  ;;  %v210_v40 = vadd.f32 %v209_v31, %v208_v21 }
  0x90   :  { %1023 = vmatprep.subr.bf16.mxu0 %v8377_v33  ;;  %1063 = vmatpush1.bf16.msra.mxu1 %v8376_v34  ;;  %v223_v33 = vrot.slane %v222_v23, 4  ;;  %v244_v34 = vrot.slane %v243_v25, 4 }
  0x91   :  { %1064 = vmatprep.subr.bf16.mxu1 %v8380_v35  ;;  %v251_v35 = vrot.slane %v250_v26, 4  ;;  %v217_v41 = vadd.f32 %v216_v32, %v215_v22 }
  0x92   :  { %v224_v42 = vadd.f32 %v223_v33, %v222_v23 }
  0x93   :  { %1024 = vmatpush2.bf16.msra.mxu0 %v8379_v36  ;;  %v258_v36 = vrot.slane %v257_v27, 4 }
  0x94   :  { %1025 = vmatprep.subr.bf16.mxu0 %v8383_v37  ;;  %1065 = vmatpush2.bf16.msra.mxu1 %v8382_v38  ;;  %v265_v37 = vrot.slane %v264_v28, 4  ;;  %v8409_v38 = vld [vmem:[#allocation6 + $0xa0] ss:$8 sps:$4 sm:$0xff]  }
  0x95   :  { %1066 = vmatprep.subr.bf16.mxu1 %v8386_v39  ;;  %v203_v39 = vadd.f32 %v202_v30, %v201_v20  ;;  %v259_v47 = vadd.f32 %v258_v36, %v257_v27 }
  0x97   :  { %1026 = vmatpush2.bf16.msra.mxu0 %v8385_v43  ;;  %v8412_v43 = vld [vmem:[#allocation6 + $0x1a0] ss:$8 sps:$4 sm:$0xff]   ;;  %v260_v58 = vrot.slane %v259_v47, 2 }
  0x98   :  { %1027 = vmatprep.subr.bf16.mxu0 %v8389_v44  ;;  %1067 = vmatpush2.bf16.msra.mxu1 %v8388_v45  ;;  %v8413_v44 = vld [vmem:[#allocation6 + $0x94] ss:$8 sps:$4 sm:$0xff]   ;;  %v245_v45 = vadd.f32 %v244_v34, %v243_v25 }
  0x99   :  { %1068 = vmatprep.subr.bf16.mxu1 %v8392_v46  ;;  %v252_v46 = vadd.f32 %v251_v35, %v250_v26  ;;  %v261_v5 = vadd.f32 %v260_v58, %v259_v47  ;;  %v8427_v25 = vld [vmem:[#allocation6 + $0x274] ss:$8 sps:$4 sm:$0xff]  }
  0x9a   :  { %v246_v55 = vrot.slane %v245_v45, 2 }
  0x9b   :  { %1028 = vmatpush2.bf16.msra.mxu0 %v8391_v49  ;;  %v266_v49 = vadd.f32 %v265_v37, %v264_v28  ;;  %v253_v56 = vrot.slane %v252_v46, 2  ;;  %v262_v14 = vrot.slane %v261_v5, 1  ;;  %v8424_v28 = vld [vmem:[#allocation6 + $0x180] ss:$8 sps:$4 sm:$0xff]  }
  0x9c   :  { %1029 = vmatprep.subr.bf16.mxu0 %v8395_v51  ;;  %1069 = vmatpush2.bf16.msra.mxu1 %v8394_v50  ;;  %v204_v50 = vrot.slane %v203_v39, 2  ;;  %v211_v51 = vrot.slane %v210_v40, 2  ;;  %v247_v3 = vadd.f32 %v246_v55, %v245_v45 }
  0x9d   :  { %1070 = vmatprep.subr.bf16.mxu1 %v8398_v53  ;;  %v225_v53 = vrot.slane %v224_v42, 2  ;;  %v267_v59 = vrot.slane %v266_v49, 2  ;;  %v254_v4 = vadd.f32 %v253_v56, %v252_v46  ;;  %v263_v23 = vadd.f32 %v262_v14, %v261_v5 }
  0x9e   :  { %v205_v61 = vadd.f32 %v204_v50, %v203_v39  ;;  %v212_v62 = vadd.f32 %v211_v51, %v210_v40  ;;  %v248_v12 = vrot.slane %v247_v3, 1  ;;  %v167_v39 = vld [vmem:[#allocation4 + $0x10] sm:$0xff]  ;;  %v170_v40 = vld [vmem:[#allocation4 + $0x28] sm:$0xff] }
  0x9f   :  { %1030 = vmatpush2.bf16.msra.mxu0 %v8397_v52  ;;  %v218_v52 = vrot.slane %v217_v41, 2  ;;  %v226_v0 = vadd.f32 %v225_v53, %v224_v42  ;;  %v268_v6 = vadd.f32 %v267_v59, %v266_v49  ;;  %v182_v45 = vunpack.c.h.bf16 %v167_v39 }
  0xa0   :  { %1031 = vmatprep.subr.bf16.mxu0 %v8401_v54  ;;  %1071 = vmatpush2.bf16.msra.mxu1 %v8400_v8  ;;  %v8416_v54 = vld [vmem:[#allocation6 + $0x194] ss:$8 sps:$4 sm:$0xff]   ;;  %v206_v7 = vrot.slane %v205_v61, 1  ;;  %v213_v8 = vrot.slane %v212_v62, 1  ;;  %v249_v21 = vadd.f32 %v248_v12, %v247_v3  ;;  %v187_v46 = vunpack.c.l.bf16 %v170_v40 }
  0xa1   :  { %1072 = vmatprep.subr.bf16.mxu1 %v8404_v13  ;;  %v219_v63 = vadd.f32 %v218_v52, %v217_v41  ;;  %v227_v10 = vrot.slane %v226_v0, 1  ;;  %v255_v13 = vrot.slane %v254_v4, 1  ;;  %v269_v15 = vrot.slane %v268_v6, 1  ;;  %v173_v41 = vld [vmem:[#allocation4 + $0x40] sm:$0xff] }
  0xa2   :  { %v207_v17 = vadd.f32 %v206_v7, %v205_v61  ;;  %v188_v49 = vunpack.c.h.bf16 %v170_v40  ;;  %v193_v50 = vunpack.c.l.bf16 %v173_v41  ;;  %v194_v51 = vunpack.c.h.bf16 %v173_v41  ;;  %v8434_v40 = vld [vmem:[#allocation6 + $0x240] ss:$8 sps:$4 sm:$0xff]   ;;  %v8439_v41 = vld [vmem:[#allocation6 + $0x234] ss:$8 sps:$4 sm:$0xff]  }
  0xa3   :  { %1032 = vmatpush2.bf16.msra.mxu0 %v8403_v18  ;;  %v220_v9 = vrot.slane %v219_v63, 1  ;;  %v214_v18 = vadd.f32 %v213_v8, %v212_v62  ;;  %v228_v20 = vadd.f32 %v227_v10, %v226_v0  ;;  %v256_v22 = vadd.f32 %v255_v13, %v254_v4  ;;  %v8430_v13 = vld [vmem:[#allocation6 + $0x264] ss:$8 sps:$4 sm:$0xff]  }
  0xa4   :  { %1033 = vmatprep.subr.bf16.mxu0 %v8407_v24  ;;  %1073 = vmatpush2.bf16.msra.mxu1 %v8406_v19  ;;  %v270_v24 = vadd.f32 %v269_v15, %v268_v6  ;;  %v236_v56 = vadd.f32 %v188_v49, %v182_v45  ;;  %v8437_v45 = vld [vmem:[#allocation6 + $0x230] ss:$8 sps:$4 sm:$0xff]  }
  0xa5   :  { %1074 = vmatprep.subr.bf16.mxu1 %v8410_v29  ;;  %v221_v19 = vadd.f32 %v220_v9, %v219_v63  ;;  %v297_v26 = vcombine.low %v207_v17, %v214_v18  ;;  %v322_v29 = vcombine.low %v249_v21, %v256_v22  ;;  %v8425_v9 = vld [vmem:[#allocation6 + $0x270] ss:$8 sps:$4 sm:$0xff]  }
  0xa6   :  { %v323_v30 = vcombine.low %v263_v23, %v270_v24  ;;  %v237_v62 = vrot.slane %v236_v56, 4 }
  0xa7   :  { %1034 = vmatpush2.bf16.msra.mxu0 %v8409_v38  ;;  %v298_v27 = vcombine.low %v221_v19, %v228_v20  ;;  %v305_v31 = vrot.slane %v297_v26, %v9363_v57  ;;  %v330_v33 = vrot.slane %v322_v29, %v9363_v57 }
  0xa8   :  { %1035 = vmatprep.subr.bf16.mxu0 %v8413_v44  ;;  %1075 = vmatpush2.bf16.msra.mxu1 %v8412_v43  ;;  %v337_v34 = vrot.slane %v323_v30, %v9363_v57  ;;  %v176_v43 = vld [vmem:[#allocation4 + $0x58] sm:$0xff]  ;;  %v181_v44 = vunpack.c.l.bf16 %v167_v39  ;;  %v238_v4 = vadd.f32 %v237_v62, %v236_v56  ;;  %v8446_v56 = vld [vmem:[#allocation6 + $0x200] ss:$8 sps:$4 sm:$0xff]  }
  0xa9   :  { %1076 = vmatprep.subr.bf16.mxu1 %v8416_v54  ;;  %v312_v32 = vrot.slane %v298_v27, %v9363_v57  ;;  %v199_v53 = vunpack.c.l.bf16 %v176_v43  ;;  %v200_v54 = vunpack.c.h.bf16 %v176_v43  ;;  %v8433_v27 = vld [vmem:[#allocation6 + $0x254] ss:$8 sps:$4 sm:$0xff]  }
  0xaa   :  { %v338_v36 = vcombine.low %v330_v33, %v337_v34  ;;  %v229_v55 = vadd.f32 %v187_v46, %v181_v44  ;;  %v8431_v34 = vld [vmem:[#allocation6 + $0x250] ss:$8 sps:$4 sm:$0xff]  }
  0xab   :  { %1036 = vmatpush2.bf16.msra.mxu0 %v8415_v60  ;;  %v313_v35 = vcombine.low %v305_v31, %v312_v32  ;;  %v271_v59 = vadd.f32 %v199_v53, %v193_v50  ;;  %v278_v60 = vadd.f32 %v200_v54, %v194_v51  ;;  %v164_v43 = vld [vmem:[#allocation2 + $0x8] sm:$0xf] }
  0xac   :  { %1037 = vmatprep.subr.bf16.mxu0 %v8419_v2  ;;  %1077 = vmatpush2.bf16.msra.mxu1 %v8418_v1  ;;  %v351_v37 = vrot.slane %v338_v36, 7  ;;  %v230_v58 = vrot.slane %v229_v55, 4  ;;  %v8436_v36 = vld [vmem:[#allocation6 + $0x244] ss:$8 sps:$4 sm:$0xff]   ;;  %v8445_v53 = vld [vmem:[#allocation6 + $0x214] ss:$8 sps:$4 sm:$0xff]  }
  0xad   :  { %1078 = vmatprep.subr.bf16.mxu1 %v8422_v11  ;;  %v272_v0 = vrot.slane %v271_v59, 4  ;;  %v279_v1 = vrot.slane %v278_v60, 4  ;;  %v239_v11 = vrot.slane %v238_v4, 2  ;;  %v8443_v54 = vld [vmem:[#allocation6 + $0x210] ss:$8 sps:$4 sm:$0xff]  }
  0xae   :  { %v353_v38 = vsel %vm352_vm0, %v351_v37, %v313_v35  ;;  %v231_v63 = vadd.f32 %v230_v58, %v229_v55  ;;  %v8448_v55 = vld [vmem:[#allocation6 + $0x204] ss:$8 sps:$4 sm:$0xff]  }
  0xaf   :  { %1038 = vmatpush2.bf16.msra.mxu0 %v8421_v16  ;;  %v355_v42 = vsel %vm354_vm1, %v351_v37, %v353_v38  ;;  %v273_v6 = vadd.f32 %v272_v0, %v271_v59  ;;  %v280_v7 = vadd.f32 %v279_v1, %v278_v60  ;;  %v240_v19 = vadd.f32 %v239_v11, %v238_v4  ;;  %v8451_v59 = vld [vmem:[#allocation6 + $0x2f4] ss:$8 sps:$4 sm:$0xff]   ;;  %v8454_v0 = vld [vmem:[#allocation6 + $0x2e4] ss:$8 sps:$4 sm:$0xff]   ;;  %v8464_v11 = vld [vmem:[#allocation6 + $0x2a0] ss:$8 sps:$4 sm:$0xff]  }
  0xb0   :  { %1089 = vmatprep.subr.bf16.mxu0 %v8427_v25  ;;  %1079 = vmatpush2.bf16.msra.mxu1 %v8424_v28  ;;  %v357_v47 = vsel %vm356_vm2, %v351_v37, %v355_v42  ;;  %v232_v5 = vrot.slane %v231_v63, 2  ;;  %v8428_v25 = vld [vmem:[#allocation6 + $0x260] ss:$8 sps:$4 sm:$0xff]   ;;  %v8457_v4 = vld [vmem:[#allocation6 + $0x2d4] ss:$8 sps:$4 sm:$0xff]  }
  0xb1   :  { %v359_v52 = vsel %vm358_vm3, %v351_v37, %v357_v47  ;;  %v274_v15 = vrot.slane %v273_v6, 2  ;;  %v281_v16 = vrot.slane %v280_v7, 2  ;;  %v241_v26 = vrot.slane %v240_v19, 1  ;;  %v8442_v47 = vld [vmem:[#allocation6 + $0x224] ss:$8 sps:$4 sm:$0xff]  }
  0xb2   :  { %v9373_v61 = vmul.f32 0.0625, %v359_v52  ;;  %v233_v14 = vadd.f32 %v232_v5, %v231_v63  ;;  %v8440_v52 = vld [vmem:[#allocation6 + $0x220] ss:$8 sps:$4 sm:$0xff]   ;;  %v8449_v63 = vld [vmem:[#allocation6 + $0x2f0] ss:$8 sps:$4 sm:$0xff]  }
  0xb3   :  { %v275_v22 = vadd.f32 %v274_v15, %v273_v6  ;;  %v282_v23 = vadd.f32 %v281_v16, %v280_v7  ;;  %v242_v31 = vadd.f32 %v241_v26, %v240_v19  ;;  %v8455_v5 = vld [vmem:[#allocation6 + $0x2d0] ss:$8 sps:$4 sm:$0xff]   ;;  %v8460_v6 = vld [vmem:[#allocation6 + $0x2c4] ss:$8 sps:$4 sm:$0xff]   ;;  %v8458_v7 = vld [vmem:[#allocation6 + $0x2c0] ss:$8 sps:$4 sm:$0xff]  }
  0xb4   :  { %v389_v2 = vrot.slane %v9373_v61, %v9363_v57  ;;  %v382_v3 = vcombine.high %v9373_v61, %v9373_v61  ;;  %v234_v21 = vrot.slane %v233_v14, 1  ;;  %v8470_v15 = vld [vmem:[#allocation6 + $0x280] ss:$8 sps:$4 sm:$0xff]   ;;  %v8476_v19 = vld [vmem:[#allocation9 + $0x158] ss:$24 sps:$4 sm:$0xff]  }
  0xb5   :  { %v276_v29 = vrot.slane %v275_v22, 1  ;;  %v283_v30 = vrot.slane %v282_v23, 1  ;;  %v8490_v26 = vld [vmem:[#allocation9 + $0xfc] ss:$24 sps:$4 sm:$0xff]  }
  0xb6   :  { %v397_v8 = vcombine.high %v389_v2, %v389_v2  ;;  %v396_v10 = vrot.slane %v382_v3, %v9363_v57  ;;  %v413_v12 = vpack.c.bf16 %v389_v2, %v389_v2  ;;  %v235_v28 = vadd.f32 %v234_v21, %v233_v14  ;;  %v8452_v3 = vld [vmem:[#allocation6 + $0x2e0] ss:$8 sps:$4 sm:$0xff]   ;;  %v8472_v14 = vld [vmem:[#allocation6 + $0x284] ss:$8 sps:$4 sm:$0xff]  }
  0xb7   :  { %v277_v32 = vadd.f32 %v276_v29, %v275_v22  ;;  %v284_v33 = vadd.f32 %v283_v30, %v282_v23  ;;  %v8481_v21 = vld [vmem:[#allocation9 + $0x124] ss:$24 sps:$4 sm:$0xff]   ;;  %v8479_v23 = vld [vmem:[#allocation9 + $0x120] ss:$24 sps:$4 sm:$0xff]  }
  0xb8   :  { %v414_v17 = vpack.c.bf16 %v397_v8, %v397_v8  ;;  %v398_v18 = vcombine.high %v396_v10, %v396_v10  ;;  %v415_v20 = vpack.c.bf16 %v396_v10, %v396_v10  ;;  %v314_v35 = vcombine.low %v235_v28, %v242_v31  ;;  %v8463_v8 = vld [vmem:[#allocation6 + $0x2b4] ss:$8 sps:$4 sm:$0xff]   ;;  %v8466_v10 = vld [vmem:[#allocation6 + $0x2a4] ss:$8 sps:$4 sm:$0xff]  }
  0xb9   :  { %v339_v37 = vcombine.low %v277_v32, %v284_v33  ;;  %v8484_v22 = vld [vmem:[#allocation9 + $0x12c] ss:$24 sps:$4 sm:$0xff]   ;;  %v8488_v28 = vld [vmem:[#allocation9 + $0xf8] ss:$24 sps:$4 sm:$0xff]   ;;  %v8494_v32 = vld [vmem:[#allocation9 + $0xc8] ss:$24 sps:$4 sm:$0xff]  }
  0xba   :  { %1039 = vmatprep.mubr.bf16.mxu0 %v414_v17  ;;  %v416_v24 = vpack.c.bf16 %v398_v18, %v398_v18  ;;  %v321_v38 = vrot.slane %v314_v35, %v9363_v57  ;;  %v8473_v17 = vld [vmem:[#allocation9 + $0x150] ss:$24 sps:$4 sm:$0xff]   ;;  %v8475_v18 = vld [vmem:[#allocation9 + $0x154] ss:$24 sps:$4 sm:$0xff]   ;;  %v8493_v29 = vld [vmem:[#allocation9 + $0xc4] ss:$24 sps:$4 sm:$0xff]  }
  0xbb   :  { %1040 = vmatmul.mubr.bf16.vlgmr.msra.gmra.mxu0 %v413_v12  ;;  %v346_v39 = vrot.slane %v339_v37, %v9363_v57  ;;  %v8469_v12 = vld [vmem:[#allocation6 + $0x294] ss:$8 sps:$4 sm:$0xff]   ;;  %1742 = vmatprep.subr.bf16.mxu1 %v8475_v18  ;;  %v8496_v30 = vld [vmem:[#allocation9 + $0xcc] ss:$24 sps:$4 sm:$0xff]  }
  0xbc   :  { %1080 = vmatprep.mubr.bf16.mxu1 %v416_v24  ;;  %1090 = vmatpush1.bf16.msra.mxu0 %v8425_v9  ;;  %v8461_v9 = vld [vmem:[#allocation6 + $0x2b0] ss:$8 sps:$4 sm:$0xff]   ;;  %v8482_v24 = vld [vmem:[#allocation9 + $0x128] ss:$24 sps:$4 sm:$0xff]   ;;  %v8505_v37 = vld [vmem:[#allocation9 + $0x64] ss:$24 sps:$4 sm:$0xff]  }
  0xbd   :  { %1081 = vmatmul.mubr.bf16.vlgmr.msra.gmra.mxu1 %v415_v20  ;;  %1091 = vmatprep.subr.bf16.mxu0 %v8430_v13  ;;  %v362_v42 = vrot.slane %v346_v39, 7  ;;  %v8467_v13 = vld [vmem:[#allocation6 + $0x290] ss:$8 sps:$4 sm:$0xff]  }
  0xbe   :  { %v8478_v20 = vld [vmem:[#allocation9 + $0x15c] ss:$24 sps:$4 sm:$0xff]   ;;  %1743 = vmatpush1.bf16.msra.mxu1 %v8473_v17  ;;  %v8491_v31 = vld [vmem:[#allocation9 + $0xc0] ss:$24 sps:$4 sm:$0xff]   ;;  %v8497_v35 = vld [vmem:[#allocation9 + $0x90] ss:$24 sps:$4 sm:$0xff]  }
  0xbf   :  { %v363_v44 = vsel %vm352_vm0, %v362_v42, %v321_v38  ;;  %1744 = vmatprep.subr.bf16.mxu1 %v8481_v21  ;;  %v8499_v33 = vld [vmem:[#allocation9 + $0x94] ss:$24 sps:$4 sm:$0xff]   ;;  %v8503_v38 = vld [vmem:[#allocation9 + $0x60] ss:$24 sps:$4 sm:$0xff]   ;;  %v8565_v17 = vld [vmem:[#allocation9 + $0x184] ss:$24 sps:$4 sm:$0xff]  }
  0xc0   :  { %1092 = vmatpush1.bf16.msra.mxu0 %v8428_v25  ;;  %v364_v46 = vsel %vm354_vm1, %v362_v42, %v363_v44  ;;  %v8487_v25 = vld [vmem:[#allocation9 + $0xf4] ss:$24 sps:$4 sm:$0xff]   ;;  %v8512_v44 = vld [vmem:[#allocation9 + $0x38] ss:$24 sps:$4 sm:$0xff]   ;;  %v8571_v21 = vld [vmem:[#allocation9 + $0x164] ss:$24 sps:$4 sm:$0xff]  }
  0xc1   :  { %1093 = vmatprep.subr.bf16.mxu0 %v8433_v27  ;;  %v365_v49 = vsel %vm356_vm2, %v362_v42, %v364_v46  ;;  %v8485_v27 = vld [vmem:[#allocation9 + $0xf0] ss:$24 sps:$4 sm:$0xff]   ;;  %v8508_v39 = vld [vmem:[#allocation9 + $0x6c] ss:$24 sps:$4 sm:$0xff]   ;;  %v8563_v18 = vld [vmem:[#allocation9 + $0x180] ss:$24 sps:$4 sm:$0xff]  }
  0xc2   :  { %v366_v50 = vsel %vm358_vm3, %v362_v42, %v365_v49  ;;  %1745 = vmatpush1.bf16.msra.mxu1 %v8479_v23  ;;  %v8514_v42 = vld [vmem:[#allocation9 + $0x3c] ss:$24 sps:$4 sm:$0xff]   ;;  %v8520_v46 = vld [vmem:[#allocation9 + $0xc] ss:$24 sps:$4 sm:$0xff]   ;;  %v8518_v49 = vld [vmem:[#allocation9 + $0x8] ss:$24 sps:$4 sm:$0xff]  }
  0xc3   :  { %v370_v51 = vadd.f32 %v366_v50, %v164_v43  ;;  %1746 = vmatprep.subr.bf16.mxu1 %v8487_v25  ;;  %v8509_v43 = vld [vmem:[#allocation9 + $0x30] ss:$24 sps:$4 sm:$0xff]   ;;  %v8523_v50 = vld [vmem:[#allocation9 + $0x2d4] ss:$24 sps:$4 sm:$0xff]  }
  0xc4   :  { %1094 = vmatpush1.bf16.msra.mxu0 %v8431_v34  ;;  %v8502_v34 = vld [vmem:[#allocation9 + $0x9c] ss:$24 sps:$4 sm:$0xff]  }
  0xc5   :  { %1095 = vmatprep.subr.bf16.mxu0 %v8436_v36  ;;  %372 = vst [vmem:[#allocation2 + $0x8] sm:$0xf] %v370_v51  ;;  %v8500_v36 = vld [vmem:[#allocation9 + $0x98] ss:$24 sps:$4 sm:$0xff]   ;;  %v8526_v51 = vld [vmem:[#allocation9 + $0x2dc] ss:$24 sps:$4 sm:$0xff]  }
  0xc6   :  { %1747 = vmatpush1.bf16.msra.mxu1 %v8485_v27 }
  0xc7   :  { %1748 = vmatprep.subr.bf16.mxu1 %v8493_v29 }
  0xc8   :  { %1096 = vmatpush1.bf16.msra.mxu0 %v8434_v40  ;;  %v8506_v40 = vld [vmem:[#allocation9 + $0x68] ss:$24 sps:$4 sm:$0xff]  }
  0xc9   :  { %1097 = vmatprep.subr.bf16.mxu0 %v8439_v41  ;;  %v8511_v41 = vld [vmem:[#allocation9 + $0x34] ss:$24 sps:$4 sm:$0xff]  }
  0xca   :  { %1749 = vmatpush1.bf16.msra.mxu1 %v8491_v31  ;;  %v2035_v31 = vld [vmem:[#allocation12 + $0x1e0] sm:$0xff] }
  0xcb   :  { %1750 = vmatprep.subr.bf16.mxu1 %v8499_v33  ;;  %v9391_v33 = vsub.s32 0, %v9360_v48 }
  0xcc   :  { %1098 = vmatpush1.bf16.msra.mxu0 %v8437_v45  ;;  %v377_v58 = vld [vmem:[#allocation2 + $0x8] sm:$0xf] }
  0xcd   :  { %1099 = vmatprep.subr.bf16.mxu0 %v8442_v47  ;;  %v9386_v60 = vmul.f32 0.0625, %v377_v58  ;;  %v8517_v45 = vld [vmem:[#allocation9 + $0x4] ss:$24 sps:$4 sm:$0xff]   ;;  %v8515_v47 = vld [vmem:[#allocation9] ss:$24 sps:$4 sm:$0xff]  }
  0xce   :  { %1751 = vmatpush1.bf16.msra.mxu1 %v8497_v35  ;;  %v8530_v58 = vld [vmem:[#allocation9 + $0x2a8] ss:$24 sps:$4 sm:$0xff]   ;;  %v9394_v35 = vsub.s32 1, %v9360_v48 }
  0xcf   :  { %v405_v62 = vrot.slane %v9386_v60, %v9363_v57  ;;  %1752 = vmatprep.subr.bf16.mxu1 %v8505_v37 }
  0xd0   :  { %1100 = vmatpush1.bf16.msra.mxu0 %v8440_v52  ;;  %v8521_v52 = vld [vmem:[#allocation9 + $0x2d0] ss:$24 sps:$4 sm:$0xff]  }
  0xd1   :  { %1101 = vmatprep.subr.bf16.mxu0 %v8445_v53  ;;  %v406_v1 = vcombine.high %v405_v62, %v405_v62  ;;  %v417_v16 = vpack.c.bf16 %v405_v62, %v405_v62  ;;  %v8524_v53 = vld [vmem:[#allocation9 + $0x2d8] ss:$24 sps:$4 sm:$0xff]   ;;  %v8538_v62 = vld [vmem:[#allocation9 + $0x27c] ss:$24 sps:$4 sm:$0xff]  }
  0xd2   :  { %1753 = vmatpush1.bf16.msra.mxu1 %v8503_v38 }
  0xd3   :  { %v418_v2 = vpack.c.bf16 %v406_v1, %v406_v1  ;;  %1754 = vmatprep.subr.bf16.mxu1 %v8511_v41  ;;  %v8541_v1 = vld [vmem:[#allocation9 + $0x244] ss:$24 sps:$4 sm:$0xff]  }
  0xd4   :  { %1102 = vmatpush1.bf16.msra.mxu0 %v8443_v54  ;;  %v8529_v54 = vld [vmem:[#allocation9 + $0x2a4] ss:$24 sps:$4 sm:$0xff]  }
  0xd5   :  { %1103 = vmatprep.subr.bf16.mxu0 %v8448_v55  ;;  %1121 = vmatprep.mubr.bf16.mxu0 %v418_v2  ;;  %v8532_v55 = vld [vmem:[#allocation9 + $0x2ac] ss:$24 sps:$4 sm:$0xff]  }
  0xd6   :  { %1755 = vmatpush1.bf16.msra.mxu1 %v8509_v43  ;;  %v8544_v2 = vld [vmem:[#allocation9 + $0x24c] ss:$24 sps:$4 sm:$0xff]  }
  0xd7   :  { %1756 = vmatprep.subr.bf16.mxu1 %v8517_v45 }
  0xd8   :  { %1104 = vmatpush1.bf16.msra.mxu0 %v8446_v56  ;;  %v8527_v56 = vld [vmem:[#allocation9 + $0x2a0] ss:$24 sps:$4 sm:$0xff]  }
  0xd9   :  { %1105 = vmatprep.subr.bf16.mxu0 %v8451_v59  ;;  %v8535_v59 = vld [vmem:[#allocation9 + $0x274] ss:$24 sps:$4 sm:$0xff]  }
  0xda   :  { %1757 = vmatpush1.bf16.msra.mxu1 %v8515_v47 }
  0xdb   :  { %1758 = vmatprep.subr.bf16.mxu1 %v8523_v50 }
  0xdc   :  { %1106 = vmatpush2.bf16.msra.mxu0 %v8449_v63  ;;  %v8533_v63 = vld [vmem:[#allocation9 + $0x270] ss:$24 sps:$4 sm:$0xff]  }
  0xdd   :  { %1107 = vmatprep.subr.bf16.mxu0 %v8454_v0  ;;  %v8536_v0 = vld [vmem:[#allocation9 + $0x278] ss:$24 sps:$4 sm:$0xff]  }
  0xde   :  { %1759 = vmatpush2.bf16.msra.mxu1 %v8521_v52  ;;  %v2027_v52 = vld [vmem:[#allocation12 + $0x1a0] sm:$0xff] }
  0xdf   :  { %1760 = vmatprep.subr.bf16.mxu1 %v8529_v54  ;;  %v8569_v54 = vld [vmem:[#allocation9 + $0x160] ss:$24 sps:$4 sm:$0xff]  }
  0xe0   :  { %1108 = vmatpush2.bf16.msra.mxu0 %v8452_v3  ;;  %v8539_v3 = vld [vmem:[#allocation9 + $0x240] ss:$24 sps:$4 sm:$0xff]  }
  0xe1   :  { %1109 = vmatprep.subr.bf16.mxu0 %v8457_v4  ;;  %v8542_v4 = vld [vmem:[#allocation9 + $0x248] ss:$24 sps:$4 sm:$0xff]  }
  0xe2   :  { %1761 = vmatpush2.bf16.msra.mxu1 %v8527_v56  ;;  %v8574_v56 = vld [vmem:[#allocation9 + $0x134] ss:$24 sps:$4 sm:$0xff]  }
  0xe3   :  { %1762 = vmatprep.subr.bf16.mxu1 %v8535_v59 }
  0xe4   :  { %1110 = vmatpush2.bf16.msra.mxu0 %v8455_v5  ;;  %v8547_v5 = vld [vmem:[#allocation9 + $0x214] ss:$24 sps:$4 sm:$0xff]  }
  0xe5   :  { %1111 = vmatprep.subr.bf16.mxu0 %v8460_v6  ;;  %v8550_v6 = vld [vmem:[#allocation9 + $0x21c] ss:$24 sps:$4 sm:$0xff]  }
  0xe6   :  { %1763 = vmatpush2.bf16.msra.mxu1 %v8533_v63  ;;  %v2019_v63 = vld [vmem:[#allocation12 + $0x160] sm:$0xff] }
  0xe7   :  { %1764 = vmatprep.subr.bf16.mxu1 %v8541_v1  ;;  %v8577_v1 = vld [vmem:[#allocation9 + $0x104] ss:$24 sps:$4 sm:$0xff]  }
  0xe8   :  { %1112 = vmatpush2.bf16.msra.mxu0 %v8458_v7  ;;  %v8545_v7 = vld [vmem:[#allocation9 + $0x210] ss:$24 sps:$4 sm:$0xff]  }
  0xe9   :  { %1113 = vmatprep.subr.bf16.mxu0 %v8463_v8  ;;  %v8548_v8 = vld [vmem:[#allocation9 + $0x218] ss:$24 sps:$4 sm:$0xff]  }
  0xea   :  { %1765 = vmatpush2.bf16.msra.mxu1 %v8539_v3 }
  0xeb   :  { %1766 = vmatprep.subr.bf16.mxu1 %v8547_v5  ;;  %v2011_v5 = vld [vmem:[#allocation12 + $0x120] sm:$0xff] }
  0xec   :  { %1114 = vmatpush2.bf16.msra.mxu0 %v8461_v9  ;;  %v8553_v9 = vld [vmem:[#allocation9 + $0x1e4] ss:$24 sps:$4 sm:$0xff]  }
  0xed   :  { %1115 = vmatprep.subr.bf16.mxu0 %v8466_v10  ;;  %v8556_v10 = vld [vmem:[#allocation9 + $0x1ec] ss:$24 sps:$4 sm:$0xff]  }
  0xee   :  { %1767 = vmatpush2.bf16.msra.mxu1 %v8545_v7  ;;  %v8580_v7 = vld [vmem:[#allocation9 + $0xd4] ss:$24 sps:$4 sm:$0xff]  }
  0xef   :  { %1768 = vmatprep.subr.bf16.mxu1 %v8553_v9 }
  0xf0   :  { %1116 = vmatpush2.bf16.msra.mxu0 %v8464_v11  ;;  %v8551_v11 = vld [vmem:[#allocation9 + $0x1e0] ss:$24 sps:$4 sm:$0xff]  }
  0xf1   :  { %1117 = vmatprep.subr.bf16.mxu0 %v8469_v12  ;;  %v8554_v12 = vld [vmem:[#allocation9 + $0x1e8] ss:$24 sps:$4 sm:$0xff]  }
  0xf2   :  { %1769 = vmatpush2.bf16.msra.mxu1 %v8551_v11  ;;  %v8583_v11 = vld [vmem:[#allocation9 + $0xa4] ss:$24 sps:$4 sm:$0xff]  }
  0xf4   :  { %1118 = vmatpush2.bf16.msra.mxu0 %v8467_v13  ;;  %v8559_v13 = vld [vmem:[#allocation9 + $0x1b4] ss:$24 sps:$4 sm:$0xff]  }
  0xf5   :  { %1119 = vmatprep.subr.bf16.mxu0 %v8472_v14  ;;  %v8557_v14 = vld [vmem:[#allocation9 + $0x1b0] ss:$24 sps:$4 sm:$0xff]   ;;  %1770 = vmatprep.subr.bf16.mxu1 %v8559_v13  ;;  %v8581_v13 = vld [vmem:[#allocation9 + $0xa0] ss:$24 sps:$4 sm:$0xff]  }
  0xf6   :  { %1771 = vmatpush2.bf16.msra.mxu1 %v8557_v14  ;;  %v8586_v14 = vld [vmem:[#allocation9 + $0x74] ss:$24 sps:$4 sm:$0xff]  }
  0xf7   :  { %1772 = vmatprep.subr.bf16.mxu1 %v8565_v17  ;;  %v8587_v17 = vld [vmem:[#allocation9 + $0x40] ss:$24 sps:$4 sm:$0xff]  }
  0xf8   :  { %1120 = vmatpush2.bf16.msra.mxu0 %v8470_v15  ;;  %v8562_v15 = vld [vmem:[#allocation9 + $0x1bc] ss:$24 sps:$4 sm:$0xff]  }
  0xf9   :  { %1783 = vmatprep.subr.bf16.mxu0 %v8478_v20  ;;  %v8566_v20 = vld [vmem:[#allocation9 + $0x188] ss:$24 sps:$4 sm:$0xff]  }
  0xfa   :  { %1773 = vmatpush2.bf16.msra.mxu1 %v8563_v18  ;;  %v8592_v18 = vld [vmem:[#allocation9 + $0x14] ss:$24 sps:$4 sm:$0xff]  }
  0xfb   :  { %1122 = vmatmul.mubr.bf16.vlgmr.msra.gmra.mxu0 %v417_v16  ;;  %v8560_v16 = vld [vmem:[#allocation9 + $0x1b8] ss:$24 sps:$4 sm:$0xff]   ;;  %1824 = vmatprep.subr.bf16.mxu1 %v8571_v21 }
  0xfc   :  { %1784 = vmatpush1.bf16.msra.mxu0 %v8476_v19  ;;  %v8568_v19 = vld [vmem:[#allocation9 + $0x18c] ss:$24 sps:$4 sm:$0xff]   ;;  %v8593_v21 = vld [vmem:[#allocation9 + $0x2e0] ss:$24 sps:$4 sm:$0xff]  }
  0xfd   :  { %1785 = vmatprep.subr.bf16.mxu0 %v8484_v22 }
 0x100   :  { %1786 = vmatpush1.bf16.msra.mxu0 %v8482_v24 }
 0x101   :  { %1787 = vmatprep.subr.bf16.mxu0 %v8490_v26 }
 0x104   :  { %1788 = vmatpush1.bf16.msra.mxu0 %v8488_v28 }
 0x105   :  { %1789 = vmatprep.subr.bf16.mxu0 %v8496_v30  ;;  %v2031_v30 = vld [vmem:[#allocation12 + $0x1c0] sm:$0xff] }
 0x108   :  { %1790 = vmatpush1.bf16.msra.mxu0 %v8494_v32  ;;  %v7551_v32 = vcombine.high %v2031_v30, %v2035_v31 }
 0x109   :  { %1791 = vmatprep.subr.bf16.mxu0 %v8502_v34  ;;  %v515_v34 = vld [vmem:[#allocation8] sm:$0x3] }
 0x10a   :  { %v524_v37 = vrot.slane %v515_v34, %v9394_v35 }
 0x10c   :  { %1792 = vmatpush1.bf16.msra.mxu0 %v8500_v36  ;;  %v520_v36 = vrot.slane %v515_v34, %v9391_v33  ;;  %v8611_v34 = vld [vmem:[#allocation9 + $0x1c0] ss:$24 sps:$4 sm:$0xff]  }
 0x10d   :  { %1793 = vmatprep.subr.bf16.mxu0 %v8508_v39 }
 0x110   :  { %1794 = vmatpush1.bf16.msra.mxu0 %v8506_v40 }
 0x111   :  { %1795 = vmatprep.subr.bf16.mxu0 %v8514_v42 }
 0x114   :  { %1796 = vmatpush1.bf16.msra.mxu0 %v8512_v44 }
 0x115   :  { %1797 = vmatprep.subr.bf16.mxu0 %v8520_v46 }
 0x118   :  { %1798 = vmatpush1.bf16.msra.mxu0 %v8518_v49 }
 0x119   :  { %1799 = vmatprep.subr.bf16.mxu0 %v8526_v51  ;;  %v2023_v51 = vld [vmem:[#allocation12 + $0x180] sm:$0xff] }
 0x11a   :  { %v7543_v59 = vcombine.high %v2023_v51, %v2027_v52 }
 0x11c   :  { %1800 = vmatpush2.bf16.msra.mxu0 %v8524_v53 }
 0x11d   :  { %1801 = vmatprep.subr.bf16.mxu0 %v8532_v55 }
 0x120   :  { %1802 = vmatpush2.bf16.msra.mxu0 %v8530_v58  ;;  %v7550_v58 = vcombine.low %v2031_v30, %v2035_v31  ;;  %v8610_v30 = vld [vmem:[#allocation9 + $0x1f4] ss:$24 sps:$4 sm:$0xff]   ;;  %v8608_v31 = vld [vmem:[#allocation9 + $0x1f0] ss:$24 sps:$4 sm:$0xff]  }
 0x121   :  { %1803 = vmatprep.subr.bf16.mxu0 %v8538_v62  ;;  %v2015_v62 = vld [vmem:[#allocation12 + $0x140] sm:$0xff] }
 0x122   :  { %v7535_v3 = vcombine.high %v2015_v62, %v2019_v63 }
 0x124   :  { %1804 = vmatpush2.bf16.msra.mxu0 %v8536_v0  ;;  %v8572_v0 = vld [vmem:[#allocation9 + $0x130] ss:$24 sps:$4 sm:$0xff]  }
 0x125   :  { %1805 = vmatprep.subr.bf16.mxu0 %v8544_v2  ;;  %v7542_v2 = vcombine.low %v2023_v51, %v2027_v52 }
 0x128   :  { %1806 = vmatpush2.bf16.msra.mxu0 %v8542_v4  ;;  %v2007_v4 = vld [vmem:[#allocation12 + $0x100] sm:$0xff] }
 0x129   :  { %1807 = vmatprep.subr.bf16.mxu0 %v8550_v6  ;;  %v8575_v6 = vld [vmem:[#allocation9 + $0x100] ss:$24 sps:$4 sm:$0xff]   ;;  %v7527_v9 = vcombine.high %v2007_v4, %v2011_v5 }
 0x12c   :  { %1808 = vmatpush2.bf16.msra.mxu0 %v8548_v8  ;;  %v7534_v8 = vcombine.low %v2015_v62, %v2019_v63  ;;  %v1995_v62 = vld [vmem:[#allocation12 + $0xa0] sm:$0xff] }
 0x12d   :  { %1809 = vmatprep.subr.bf16.mxu0 %v8556_v10  ;;  %v8578_v10 = vld [vmem:[#allocation9 + $0xd0] ss:$24 sps:$4 sm:$0xff]  }
 0x130   :  { %1810 = vmatpush2.bf16.msra.mxu0 %v8554_v12  ;;  %v7526_v12 = vcombine.low %v2007_v4, %v2011_v5  ;;  %v1983_v4 = vld [vmem:[#allocation12 + $0x40] sm:$0xff] }
 0x131   :  { %1811 = vmatprep.subr.bf16.mxu0 %v8562_v15  ;;  %v8584_v15 = vld [vmem:[#allocation9 + $0x70] ss:$24 sps:$4 sm:$0xff]  }
 0x132   :  { %v1987_v5 = vld [vmem:[#allocation12 + $0x60] sm:$0xff] }
 0x134   :  { %1812 = vmatpush2.bf16.msra.mxu0 %v8560_v16  ;;  %v8589_v16 = vld [vmem:[#allocation9 + $0x44] ss:$24 sps:$4 sm:$0xff]  }
 0x135   :  { %1813 = vmatprep.subr.bf16.mxu0 %v8568_v19  ;;  %v8590_v19 = vld [vmem:[#allocation9 + $0x10] ss:$24 sps:$4 sm:$0xff]  }
 0x138   :  { %1814 = vmatpush2.bf16.msra.mxu0 %v8566_v20  ;;  %v8595_v20 = vld [vmem:[#allocation9 + $0x2e4] ss:$24 sps:$4 sm:$0xff]  }
 0x139   :  { %4321 = vmatprep.subr.bf16.mxu0 %v7551_v32  ;;  %v8613_v32 = vld [vmem:[#allocation9 + $0x1c4] ss:$24 sps:$4 sm:$0xff]  }
 0x17b   :  { %v1041_v22 = vpop.f32.mrf.mxu0 }
 0x17c   :  { %v1042_v38 = vadd.f32 %v1041_v22, %v520_v36  ;;  %v8598_v22 = vld [vmem:[#allocation9 + $0x2b4] ss:$24 sps:$4 sm:$0xff]  }
 0x17d   :  { %v1043_v23 = vpop.f32.mrf.mxu0  ;;  %v1082_v24 = vpop.f32.mrf.mxu1  ;;  %v8616_v36 = vld [vmem:[#allocation9 + $0x194] ss:$24 sps:$4 sm:$0xff]  }
 0x17e   :  { %v1044_v39 = vadd.f32 %v1043_v23, %v524_v37  ;;  %v1083_v40 = vadd.f32 %v1082_v24, %v1042_v38  ;;  %v8596_v23 = vld [vmem:[#allocation9 + $0x2b0] ss:$24 sps:$4 sm:$0xff]   ;;  %v8601_v24 = vld [vmem:[#allocation9 + $0x284] ss:$24 sps:$4 sm:$0xff]  }
 0x17f   :  { %v1045_v25 = vpop.f32.mrf.mxu0  ;;  %v1084_v26 = vpop.f32.mrf.mxu1  ;;  %v2159_v37 = vld [vmem:[#allocation12 + $0x5c0] sm:$0xff] }
 0x180   :  { %v1085_v42 = vadd.f32 %v1084_v26, %v1044_v39  ;;  %v8599_v25 = vld [vmem:[#allocation9 + $0x280] ss:$24 sps:$4 sm:$0xff]   ;;  %v8604_v26 = vld [vmem:[#allocation9 + $0x254] ss:$24 sps:$4 sm:$0xff]   ;;  %v8614_v39 = vld [vmem:[#allocation9 + $0x190] ss:$24 sps:$4 sm:$0xff]  }
 0x181   :  { %v1046_v27 = vpop.f32.mrf.mxu0  ;;  %v1086_v28 = vpop.f32.mrf.mxu1  ;;  %v2163_v38 = vld [vmem:[#allocation12 + $0x5e0] sm:$0xff] }
 0x182   :  { %v8602_v27 = vld [vmem:[#allocation9 + $0x250] ss:$24 sps:$4 sm:$0xff]   ;;  %v8607_v28 = vld [vmem:[#allocation9 + $0x224] ss:$24 sps:$4 sm:$0xff]  }
 0x183   :  { %v1087_v29 = vpop.f32.mrf.mxu1 }
 0x184   :  { %v8605_v29 = vld [vmem:[#allocation9 + $0x220] ss:$24 sps:$4 sm:$0xff]  }
 0x1bb   :  { %v1123_v41 = vpop.f32.mrf.mxu0 }
 0x1bc   :  { %v1124_v43 = vadd.f32 %v1123_v41, %v1083_v40  ;;  %v7679_v40 = vcombine.high %v2159_v37, %v2163_v38  ;;  %v2151_v41 = vld [vmem:[#allocation12 + $0x580] sm:$0xff] }
 0x1bd   :  { %v1125_v44 = vpop.f32.mrf.mxu0 }
 0x1be   :  { %v1126_v45 = vadd.f32 %v1125_v44, %v1085_v42  ;;  %v1130_v46 = vmax.f32 %v1124_v43, 0.0  ;;  %v2155_v42 = vld [vmem:[#allocation12 + $0x5a0] sm:$0xff]  ;;  %v7678_v43 = vcombine.low %v2159_v37, %v2163_v38 }
 0x1bf   :  { %v1127_v47 = vpop.f32.mrf.mxu0  ;;  %v7671_v44 = vcombine.high %v2151_v41, %v2155_v42  ;;  %v2079_v38 = vld [vmem:[#allocation12 + $0x340] sm:$0xff] }
 0x1c0   :  { %v1131_v49 = vmax.f32 %v1126_v45, 0.0  ;;  %v9398_v55 = vpack.c.bf16 %v1130_v46, %v1130_v46  ;;  %v2143_v45 = vld [vmem:[#allocation12 + $0x540] sm:$0xff]  ;;  %v7670_v47 = vcombine.low %v2151_v41, %v2155_v42 }
 0x1c1   :  { %v1128_v50 = vpop.f32.mrf.mxu0  ;;  %v2147_v46 = vld [vmem:[#allocation12 + $0x560] sm:$0xff] }
 0x1c2   :  { %v1133_v53 = vpack.c.bf16 %v1131_v49, %v1131_v49  ;;  %v1999_v49 = vld [vmem:[#allocation12 + $0xc0] sm:$0xff]  ;;  %v7663_v51 = vcombine.high %v2143_v45, %v2147_v46 }
 0x1c3   :  { %v2003_v50 = vld [vmem:[#allocation12 + $0xe0] sm:$0xff] }
 0x1c4   :  { %1774 = vmatprep.mubr.bf16.mxu1 %v1133_v53  ;;  %1815 = vmatprep.mubr.bf16.mxu0 %v1133_v53  ;;  %v7519_v52 = vcombine.high %v1999_v49, %v2003_v50  ;;  %v2215_v42 = vld [vmem:[#allocation12 + $0x780] sm:$0xff] }
 0x1c5   :  { %1775 = vmatmul.mubr.bf16.vlgmr.msra.gmra.mxu1 %v9398_v55  ;;  %1816 = vmatmul.mubr.bf16.vlgmr.msra.gmra.mxu0 %v9398_v55 }
 0x1c6   :  { %1825 = vmatpush1.bf16.msra.mxu1 %v8569_v54  ;;  %1856 = vmatprep.mubr.bf16.mxu1 %v1133_v53  ;;  %v2135_v53 = vld [vmem:[#allocation12 + $0x500] sm:$0xff] }
 0x1c7   :  { %1826 = vmatprep.subr.bf16.mxu1 %v8574_v56  ;;  %4322 = vmatpush1.bf16.msra.mxu0 %v7550_v58  ;;  %v2139_v54 = vld [vmem:[#allocation12 + $0x520] sm:$0xff]  ;;  %v7518_v56 = vcombine.low %v1999_v49, %v2003_v50  ;;  %v7662_v58 = vcombine.low %v2143_v45, %v2147_v46 }
 0x1c8   :  { %4323 = vmatprep.subr.bf16.mxu0 %v7543_v59  ;;  %v1991_v59 = vld [vmem:[#allocation12 + $0x80] sm:$0xff]  ;;  %v7655_v63 = vcombine.high %v2135_v53, %v2139_v54 }
 0x1c9   :  { %v2071_v46 = vld [vmem:[#allocation12 + $0x300] sm:$0xff] }
 0x1ca   :  { %1827 = vmatpush1.bf16.msra.mxu1 %v8572_v0  ;;  %v7511_v0 = vcombine.high %v1991_v59, %v1995_v62 }
 0x1cb   :  { %1828 = vmatprep.subr.bf16.mxu1 %v8577_v1  ;;  %4324 = vmatpush1.bf16.msra.mxu0 %v7542_v2  ;;  %v2131_v1 = vld [vmem:[#allocation12 + $0x4e0] sm:$0xff]  ;;  %v7510_v2 = vcombine.low %v1991_v59, %v1995_v62 }
 0x1cc   :  { %4325 = vmatprep.subr.bf16.mxu0 %v7535_v3  ;;  %v7654_v3 = vcombine.low %v2135_v53, %v2139_v54 }
 0x1ce   :  { %1829 = vmatpush1.bf16.msra.mxu1 %v8575_v6 }
 0x1cf   :  { %1830 = vmatprep.subr.bf16.mxu1 %v8580_v7  ;;  %4326 = vmatpush1.bf16.msra.mxu0 %v7534_v8  ;;  %v7503_v7 = vcombine.high %v1983_v4, %v1987_v5  ;;  %v2119_v8 = vld [vmem:[#allocation12 + $0x480] sm:$0xff] }
 0x1d0   :  { %4327 = vmatprep.subr.bf16.mxu0 %v7527_v9  ;;  %v2123_v9 = vld [vmem:[#allocation12 + $0x4a0] sm:$0xff] }
 0x1d2   :  { %1831 = vmatpush1.bf16.msra.mxu1 %v8578_v10  ;;  %v7502_v10 = vcombine.low %v1983_v4, %v1987_v5 }
 0x1d3   :  { %1832 = vmatprep.subr.bf16.mxu1 %v8583_v11  ;;  %4328 = vmatpush1.bf16.msra.mxu0 %v7526_v12  ;;  %v1975_v12 = vld [vmem:[#allocation12] sm:$0xff] }
 0x1d4   :  { %4329 = vmatprep.subr.bf16.mxu0 %v7519_v52  ;;  %v2211_v52 = vld [vmem:[#allocation12 + $0x760] sm:$0xff] }
 0x1d6   :  { %1833 = vmatpush1.bf16.msra.mxu1 %v8581_v13  ;;  %v1979_v13 = vld [vmem:[#allocation12 + $0x20] sm:$0xff] }
 0x1d7   :  { %1834 = vmatprep.subr.bf16.mxu1 %v8586_v14  ;;  %4330 = vmatpush1.bf16.msra.mxu0 %v7518_v56  ;;  %v7639_v14 = vcombine.high %v2119_v8, %v2123_v9  ;;  %v2063_v56 = vld [vmem:[#allocation12 + $0x2c0] sm:$0xff] }
 0x1d8   :  { %4331 = vmatprep.subr.bf16.mxu0 %v7511_v0  ;;  %v2203_v0 = vld [vmem:[#allocation12 + $0x720] sm:$0xff] }
 0x1da   :  { %1835 = vmatpush1.bf16.msra.mxu1 %v8584_v15  ;;  %v7495_v15 = vcombine.high %v1975_v12, %v1979_v13 }
 0x1db   :  { %1836 = vmatprep.subr.bf16.mxu1 %v8589_v16  ;;  %4332 = vmatpush1.bf16.msra.mxu0 %v7510_v2  ;;  %v2111_v16 = vld [vmem:[#allocation12 + $0x440] sm:$0xff] }
 0x1dc   :  { %4333 = vmatprep.subr.bf16.mxu0 %v7503_v7  ;;  %v2055_v2 = vld [vmem:[#allocation12 + $0x280] sm:$0xff] }
 0x1dd   :  { %v2047_v7 = vld [vmem:[#allocation12 + $0x240] sm:$0xff] }
 0x1de   :  { %1837 = vmatpush1.bf16.msra.mxu1 %v8587_v17  ;;  %v2115_v17 = vld [vmem:[#allocation12 + $0x460] sm:$0xff] }
 0x1df   :  { %1838 = vmatprep.subr.bf16.mxu1 %v8592_v18  ;;  %4334 = vmatpush1.bf16.msra.mxu0 %v7502_v10  ;;  %v7494_v18 = vcombine.low %v1975_v12, %v1979_v13  ;;  %v2051_v10 = vld [vmem:[#allocation12 + $0x260] sm:$0xff] }
 0x1e0   :  { %4335 = vmatprep.subr.bf16.mxu0 %v7495_v15  ;;  %v2039_v12 = vld [vmem:[#allocation12 + $0x200] sm:$0xff]  ;;  %v7566_v15 = vcombine.low %v2047_v7, %v2051_v10 }
 0x1e1   :  { %v2043_v13 = vld [vmem:[#allocation12 + $0x220] sm:$0xff] }
 0x1e2   :  { %1839 = vmatpush1.bf16.msra.mxu1 %v8590_v19  ;;  %v7638_v19 = vcombine.low %v2119_v8, %v2123_v9  ;;  %v2191_v8 = vld [vmem:[#allocation12 + $0x6c0] sm:$0xff] }
 0x1e3   :  { %1840 = vmatprep.subr.bf16.mxu1 %v8595_v20  ;;  %4336 = vmatpush1.bf16.msra.mxu0 %v7494_v18  ;;  %v2095_v20 = vld [vmem:[#allocation12 + $0x3c0] sm:$0xff] }
 0x1e4   :  { %v2195_v9 = vld [vmem:[#allocation12 + $0x6e0] sm:$0xff] }
 0x1e5   :  { %v2183_v18 = vld [vmem:[#allocation12 + $0x680] sm:$0xff] }
 0x1e6   :  { %1841 = vmatpush2.bf16.msra.mxu1 %v8593_v21  ;;  %v2099_v21 = vld [vmem:[#allocation12 + $0x3e0] sm:$0xff] }
 0x1e7   :  { %1842 = vmatprep.subr.bf16.mxu1 %v8598_v22  ;;  %v7631_v22 = vcombine.high %v2111_v16, %v2115_v17 }
 0x1ea   :  { %1843 = vmatpush2.bf16.msra.mxu1 %v8596_v23  ;;  %v7615_v23 = vcombine.high %v2095_v20, %v2099_v21 }
 0x1eb   :  { %1844 = vmatprep.subr.bf16.mxu1 %v8601_v24  ;;  %v2103_v24 = vld [vmem:[#allocation12 + $0x400] sm:$0xff] }
 0x1ec   :  { %4337 = vmatprep.subr.bf16.mxu0 %v7615_v23  ;;  %v2175_v23 = vld [vmem:[#allocation12 + $0x640] sm:$0xff] }
 0x1ee   :  { %1845 = vmatpush2.bf16.msra.mxu1 %v8599_v25  ;;  %v2107_v25 = vld [vmem:[#allocation12 + $0x420] sm:$0xff] }
 0x1ef   :  { %1846 = vmatprep.subr.bf16.mxu1 %v8604_v26  ;;  %v7614_v26 = vcombine.low %v2095_v20, %v2099_v21  ;;  %v7622_v37 = vcombine.low %v2103_v24, %v2107_v25  ;;  %v7710_v20 = vcombine.low %v2191_v8, %v2195_v9  ;;  %v7558_v21 = vcombine.low %v2039_v12, %v2043_v13 }
 0x1f1   :  { %4338 = vmatpush2.bf16.msra.mxu0 %v7614_v26  ;;  %v9403_v26 = vld [vmem:[#allocation12 + $0x9c0] sm:$0xff] }
 0x1f2   :  { %1847 = vmatpush2.bf16.msra.mxu1 %v8602_v27  ;;  %v7630_v27 = vcombine.low %v2111_v16, %v2115_v17  ;;  %v7711_v16 = vcombine.high %v2191_v8, %v2195_v9  ;;  %v7559_v17 = vcombine.high %v2039_v12, %v2043_v13 }
 0x1f3   :  { %1848 = vmatprep.subr.bf16.mxu1 %v8607_v28  ;;  %v2087_v28 = vld [vmem:[#allocation12 + $0x380] sm:$0xff] }
 0x1f6   :  { %1849 = vmatpush2.bf16.msra.mxu1 %v8605_v29  ;;  %v2091_v29 = vld [vmem:[#allocation12 + $0x3a0] sm:$0xff] }
 0x1f7   :  { %1850 = vmatprep.subr.bf16.mxu1 %v8610_v30  ;;  %v7623_v30 = vcombine.high %v2103_v24, %v2107_v25  ;;  %v2179_v24 = vld [vmem:[#allocation12 + $0x660] sm:$0xff] }
 0x1fa   :  { %1851 = vmatpush2.bf16.msra.mxu1 %v8608_v31  ;;  %v7607_v31 = vcombine.high %v2087_v28, %v2091_v29 }
 0x1fb   :  { %1852 = vmatprep.subr.bf16.mxu1 %v8613_v32  ;;  %v2223_v32 = vld [vmem:[#allocation12 + $0x7c0] sm:$0xff] }
 0x1fc   :  { %4339 = vmatprep.subr.bf16.mxu0 %v7607_v31  ;;  %v2171_v31 = vld [vmem:[#allocation12 + $0x620] sm:$0xff] }
 0x1fe   :  { %1853 = vmatpush2.bf16.msra.mxu1 %v8611_v34  ;;  %v2227_v34 = vld [vmem:[#allocation12 + $0x7e0] sm:$0xff] }
 0x1ff   :  { %1854 = vmatprep.subr.bf16.mxu1 %v8616_v36  ;;  %v7606_v36 = vcombine.low %v2087_v28, %v2091_v29  ;;  %v7742_v45 = vcombine.low %v2223_v32, %v2227_v34  ;;  %v7695_v28 = vcombine.high %v2175_v23, %v2179_v24 }
 0x201   :  { %4340 = vmatpush2.bf16.msra.mxu0 %v7606_v36  ;;  %v9413_v36 = vld [vmem:[#allocation12 + $0x1e8] sm:$0xff] }
 0x202   :  { %1855 = vmatpush2.bf16.msra.mxu1 %v8614_v39  ;;  %v2083_v39 = vld [vmem:[#allocation12 + $0x360] sm:$0xff] }
 0x203   :  { %4362 = vmatprep.subr.bf16.mxu1 %v7679_v40  ;;  %v7743_v40 = vcombine.high %v2223_v32, %v2227_v34  ;;  %v7599_v41 = vcombine.high %v2079_v38, %v2083_v39  ;;  %v9411_v34 = vld [vmem:[#allocation12 + $0x1c8] sm:$0xff] }
 0x205   :  { %1857 = vmatmul.mubr.bf16.vlgmr.msra.gmra.mxu1 %v9398_v55  ;;  %v2127_v55 = vld [vmem:[#allocation12 + $0x4c0] sm:$0xff]  ;;  %4341 = vmatprep.subr.bf16.mxu0 %v7599_v41  ;;  %v7553_v41 = vcombine.high %v9411_v34, %v9413_v36 }
 0x206   :  { %4363 = vmatpush1.bf16.msra.mxu1 %v7678_v43  ;;  %v7647_v6 = vcombine.high %v2127_v55, %v2131_v1  ;;  %v7646_v11 = vcombine.low %v2127_v55, %v2131_v1  ;;  %v2219_v43 = vld [vmem:[#allocation12 + $0x7a0] sm:$0xff] }
 0x207   :  { %4364 = vmatprep.subr.bf16.mxu1 %v7671_v44  ;;  %v7598_v44 = vcombine.low %v2079_v38, %v2083_v39  ;;  %v7735_v49 = vcombine.high %v2215_v42, %v2219_v43  ;;  %v7734_v54 = vcombine.low %v2215_v42, %v2219_v43  ;;  %v7552_v39 = vcombine.low %v9411_v34, %v9413_v36  ;;  %v9422_v43 = vld [vmem:[#allocation11] sm:$0x3f]  ;;  %v2255_v36 = vld [vmem:[#allocation12 + $0x8c0] sm:$0xff] }
 0x208   :  { %v9420_v42 = vsub.s32 2, %v9360_v48 }
 0x209   :  { %4342 = vmatpush2.bf16.msra.mxu0 %v7598_v44  ;;  %v9425_v44 = vsub.s32 3, %v9360_v48 }
 0x20a   :  { %4365 = vmatpush1.bf16.msra.mxu1 %v7670_v47  ;;  %v2075_v47 = vld [vmem:[#allocation12 + $0x320] sm:$0xff] }
 0x20b   :  { %4366 = vmatprep.subr.bf16.mxu1 %v7663_v51  ;;  %v7591_v50 = vcombine.high %v2071_v46, %v2075_v47  ;;  %v2207_v51 = vld [vmem:[#allocation12 + $0x740] sm:$0xff]  ;;  %v7590_v53 = vcombine.low %v2071_v46, %v2075_v47  ;;  %v1243_v46 = vrot.slane %v9422_v43, %v9420_v42  ;;  %v1239_v47 = vrot.slane %v9422_v43, %v9394_v35 }
 0x20c   :  { %v7727_v59 = vcombine.high %v2207_v51, %v2211_v52  ;;  %v7726_v1 = vcombine.low %v2207_v51, %v2211_v52 }
 0x20d   :  { %4343 = vmatprep.subr.bf16.mxu0 %v7591_v50 }
 0x20e   :  { %4367 = vmatpush1.bf16.msra.mxu1 %v7662_v58  ;;  %4344 = vmatpush2.bf16.msra.mxu0 %v7590_v53  ;;  %v2067_v58 = vld [vmem:[#allocation12 + $0x2e0] sm:$0xff] }
 0x20f   :  { %4368 = vmatprep.subr.bf16.mxu1 %v7655_v63  ;;  %v7583_v62 = vcombine.high %v2063_v56, %v2067_v58  ;;  %v2199_v63 = vld [vmem:[#allocation12 + $0x700] sm:$0xff]  ;;  %v7582_v55 = vcombine.low %v2063_v56, %v2067_v58 }
 0x210   :  { %v7719_v4 = vcombine.high %v2199_v63, %v2203_v0 }
 0x211   :  { %4345 = vmatprep.subr.bf16.mxu0 %v7583_v62 }
 0x212   :  { %4369 = vmatpush1.bf16.msra.mxu1 %v7654_v3  ;;  %4346 = vmatpush2.bf16.msra.mxu0 %v7582_v55  ;;  %v2059_v3 = vld [vmem:[#allocation12 + $0x2a0] sm:$0xff] }
 0x213   :  { %4370 = vmatprep.subr.bf16.mxu1 %v7647_v6  ;;  %v7574_v5 = vcombine.low %v2055_v2, %v2059_v3  ;;  %v7575_v6 = vcombine.high %v2055_v2, %v2059_v3 }
 0x215   :  { %4347 = vmatprep.subr.bf16.mxu0 %v7575_v6 }
 0x216   :  { %4371 = vmatpush1.bf16.msra.mxu1 %v7646_v11  ;;  %v7567_v11 = vcombine.high %v2047_v7, %v2051_v10  ;;  %4348 = vmatpush2.bf16.msra.mxu0 %v7574_v5 }
 0x217   :  { %4372 = vmatprep.subr.bf16.mxu1 %v7639_v14  ;;  %v7718_v14 = vcombine.low %v2199_v63, %v2203_v0 }
 0x218   :  { %4349 = vmatprep.subr.bf16.mxu0 %v7567_v11 }
 0x21a   :  { %4373 = vmatpush1.bf16.msra.mxu1 %v7638_v19  ;;  %v2187_v19 = vld [vmem:[#allocation12 + $0x6a0] sm:$0xff]  ;;  %4350 = vmatpush2.bf16.msra.mxu0 %v7566_v15 }
 0x21b   :  { %4374 = vmatprep.subr.bf16.mxu1 %v7631_v22  ;;  %v7703_v22 = vcombine.high %v2183_v18, %v2187_v19  ;;  %4351 = vmatprep.subr.bf16.mxu0 %v7559_v17  ;;  %v7702_v25 = vcombine.low %v2183_v18, %v2187_v19 }
 0x21e   :  { %4375 = vmatpush1.bf16.msra.mxu1 %v7630_v27  ;;  %4352 = vmatpush2.bf16.msra.mxu0 %v7558_v21  ;;  %v9405_v27 = vld [vmem:[#allocation12 + $0x9e0] sm:$0xff] }
 0x21f   :  { %4376 = vmatprep.subr.bf16.mxu1 %v7623_v30  ;;  %v7807_v29 = vcombine.high %v9403_v26, %v9405_v27  ;;  %v2167_v30 = vld [vmem:[#allocation12 + $0x600] sm:$0xff]  ;;  %v7806_v32 = vcombine.low %v9403_v26, %v9405_v27  ;;  %v1250_v27 = vsub.s32 4, %v9360_v48 }
 0x220   :  { %v7687_v38 = vcombine.high %v2167_v30, %v2171_v31 }
 0x221   :  { %4403 = vmatprep.subr.bf16.mxu0 %v7807_v29  ;;  %v2279_v29 = vld [vmem:[#allocation12 + $0x980] sm:$0xff] }
 0x222   :  { %4377 = vmatpush1.bf16.msra.mxu1 %v7622_v37  ;;  %v7694_v37 = vcombine.low %v2175_v23, %v2179_v24 }
 0x223   :  { %4378 = vmatprep.subr.bf16.mxu1 %v7743_v40  ;;  %v7686_v40 = vcombine.low %v2167_v30, %v2171_v31  ;;  %v2283_v30 = vld [vmem:[#allocation12 + $0x9a0] sm:$0xff] }
 0x226   :  { %4379 = vmatpush2.bf16.msra.mxu1 %v7742_v45  ;;  %v1235_v45 = vrot.slane %v9422_v43, %v9391_v33 }
 0x227   :  { %4380 = vmatprep.subr.bf16.mxu1 %v7735_v49  ;;  %v1247_v49 = vrot.slane %v9422_v43, %v9425_v44 }
 0x22a   :  { %4381 = vmatpush2.bf16.msra.mxu1 %v7734_v54 }
 0x22b   :  { %4382 = vmatprep.subr.bf16.mxu1 %v7727_v59 }
 0x22e   :  { %4383 = vmatpush2.bf16.msra.mxu1 %v7726_v1 }
 0x22f   :  { %4384 = vmatprep.subr.bf16.mxu1 %v7719_v4 }
 0x232   :  { %4385 = vmatpush2.bf16.msra.mxu1 %v7718_v14 }
 0x233   :  { %4386 = vmatprep.subr.bf16.mxu1 %v7711_v16 }
 0x236   :  { %4387 = vmatpush2.bf16.msra.mxu1 %v7710_v20 }
 0x237   :  { %4388 = vmatprep.subr.bf16.mxu1 %v7703_v22 }
 0x23a   :  { %4389 = vmatpush2.bf16.msra.mxu1 %v7702_v25 }
 0x23b   :  { %4390 = vmatprep.subr.bf16.mxu1 %v7695_v28 }
 0x23e   :  { %4391 = vmatpush2.bf16.msra.mxu1 %v7694_v37  ;;  %v2024_v37 = vld [vmem:[#allocation12 + $0x188] sm:$0xff] }
 0x23f   :  { %4392 = vmatprep.subr.bf16.mxu1 %v7687_v38  ;;  %v2028_v38 = vld [vmem:[#allocation12 + $0x1a8] sm:$0xff] }
 0x242   :  { %4393 = vmatpush2.bf16.msra.mxu1 %v7686_v40 }
 0x243   :  { %4444 = vmatprep.subr.bf16.mxu1 %v7553_v41  ;;  %v7799_v41 = vcombine.high %v2279_v29, %v2283_v30 }
 0x285   :  { %v1776_v50 = vpop.f32.mrf.mxu1  ;;  %v1817_v51 = vpop.f32.mrf.mxu0 }
 0x286   :  { %v1777_v52 = vadd.f32 %v1776_v50, %v1235_v45  ;;  %v1818_v53 = vadd.f32 %v1817_v51, %v1243_v46  ;;  %v2271_v46 = vld [vmem:[#allocation12 + $0x940] sm:$0xff]  ;;  %v7545_v50 = vcombine.high %v2024_v37, %v2028_v38  ;;  %v7798_v51 = vcombine.low %v2279_v29, %v2283_v30 }
 0x287   :  { %v1778_v54 = vpop.f32.mrf.mxu1  ;;  %v1819_v56 = vpop.f32.mrf.mxu0 }
 0x288   :  { %v7488_v58 = vmul.f32 -1.442695, %v1777_v52  ;;  %v7490_v59 = vmul.f32 -1.442695, %v1818_v53  ;;  %v1779_v62 = vadd.f32 %v1778_v54, %v1239_v47  ;;  %v1820_v63 = vadd.f32 %v1819_v56, %v1247_v49  ;;  %v2275_v47 = vld [vmem:[#allocation12 + $0x960] sm:$0xff]  ;;  %v2016_v52 = vld [vmem:[#allocation12 + $0x148] sm:$0xff] }
 0x289   :  { %v1780_v0 = vpop.f32.mrf.mxu1  ;;  %v1821_v55 = vpop.f32.mrf.mxu0  ;;  %v2020_v53 = vld [vmem:[#allocation12 + $0x168] sm:$0xff]  ;;  %v7791_v54 = vcombine.high %v2271_v46, %v2275_v47  ;;  %v7544_v56 = vcombine.low %v2024_v37, %v2028_v38 }
 0x28a   :  { %9001 = vpow2.f32 %v7488_v58  ;;  %v7489_v1 = vmul.f32 -1.442695, %v1779_v62  ;;  %v7491_v2 = vmul.f32 -1.442695, %v1820_v63  ;;  %v2263_v58 = vld [vmem:[#allocation12 + $0x900] sm:$0xff]  ;;  %v7537_v26 = vcombine.high %v2016_v52, %v2020_v53  ;;  %v2008_v62 = vld [vmem:[#allocation12 + $0x108] sm:$0xff] }
 0x28b   :  { %9003 = vpow2.f32 %v7490_v59  ;;  %v1781_v3 = vpop.f32.mrf.mxu1  ;;  %v1822_v4 = vpop.f32.mrf.mxu0  ;;  %v2267_v59 = vld [vmem:[#allocation12 + $0x920] sm:$0xff]  ;;  %v2012_v63 = vld [vmem:[#allocation12 + $0x128] sm:$0xff]  ;;  %v1254_v55 = vsub.s32 5, %v9360_v48  ;;  %v7536_v34 = vcombine.low %v2016_v52, %v2020_v53 }
 0x28c   :  { %9005 = vpow2.f32 %v7489_v1  ;;  %v7783_v0 = vcombine.high %v2263_v58, %v2267_v59  ;;  %v1251_v1 = vrot.slane %v9422_v43, %v1250_v27  ;;  %v7782_v3 = vcombine.low %v2263_v58, %v2267_v59  ;;  %v2000_v4 = vld [vmem:[#allocation12 + $0xc8] sm:$0xff]  ;;  %v2235_v52 = vld [vmem:[#allocation12 + $0x820] sm:$0xff] }
 0x28d   :  { %9007 = vpow2.f32 %v7491_v2  ;;  %v7529_v2 = vcombine.high %v2008_v62, %v2012_v63  ;;  %v1980_v58 = vld [vmem:[#allocation12 + $0x28] sm:$0xff] }
 0x297   :  { %v9002_v5 = vpop.eup %9001 }
 0x298   :  { %v9004_v6 = vpop.eup %9003  ;;  %v1883_v7 = vadd.f32 1.0, %v9002_v5  ;;  %v2004_v5 = vld [vmem:[#allocation12 + $0xe8] sm:$0xff] }
 0x299   :  { %v9006_v8 = vpop.eup %9005  ;;  %v1885_v9 = vadd.f32 1.0, %v9004_v6  ;;  %v1255_v6 = vrot.slane %v9422_v43, %v1254_v55 }
 0x29a   :  { %v9008_v10 = vpop.eup %9007  ;;  %9009 = vrcp.f32 %v1883_v7  ;;  %v1884_v11 = vadd.f32 1.0, %v9006_v8 }
 0x29b   :  { %9011 = vrcp.f32 %v1885_v9  ;;  %v1886_v12 = vadd.f32 1.0, %v9008_v10  ;;  %v7528_v9 = vcombine.low %v2008_v62, %v2012_v63  ;;  %v2247_v10 = vld [vmem:[#allocation12 + $0x880] sm:$0xff] }
 0x29c   :  { %9013 = vrcp.f32 %v1884_v11  ;;  %v2251_v11 = vld [vmem:[#allocation12 + $0x8a0] sm:$0xff] }
 0x29d   :  { %9015 = vrcp.f32 %v1886_v12  ;;  %v7766_v38 = vcombine.low %v2247_v10, %v2251_v11  ;;  %v2355_v62 = vld [vmem:[#allocation12 + $0xbe0] sm:$0xff] }
 0x2a7   :  { %v9010_v13 = vpop.eup %9009 }
 0x2a8   :  { %v9012_v14 = vpop.eup %9011 }
 0x2a9   :  { %v9014_v15 = vpop.eup %9013 }
 0x2aa   :  { %v9016_v16 = vpop.eup %9015  ;;  %v1907_v17 = vcombine.low %v9010_v13, %v9014_v15  ;;  %v7521_v13 = vcombine.high %v2000_v4, %v2004_v5 }
 0x2ab   :  { %v1908_v18 = vcombine.low %v9012_v14, %v9016_v16  ;;  %v1992_v16 = vld [vmem:[#allocation12 + $0x88] sm:$0xff] }
 0x2ac   :  { %v1915_v19 = vrot.slane %v1907_v17, %v9363_v57  ;;  %v1996_v17 = vld [vmem:[#allocation12 + $0xa8] sm:$0xff] }
 0x2ad   :  { %v1922_v20 = vrot.slane %v1908_v18, %v9363_v57  ;;  %v7513_v30 = vcombine.high %v1992_v16, %v1996_v17 }
 0x2af   :  { %v1923_v21 = vcombine.low %v1915_v19, %v1922_v20  ;;  %v7767_v20 = vcombine.high %v2247_v10, %v2251_v11 }
 0x2b1   :  { %v1934_v22 = vmul.f32 %v1923_v21, %v9373_v61  ;;  %v7520_v21 = vcombine.low %v2000_v4, %v2004_v5 }
 0x2b3   :  { %v9439_v23 = vrot.slane %v1934_v22, %v9363_v57  ;;  %v1938_v24 = vcombine.high %v1934_v22, %v1934_v22  ;;  %v2239_v22 = vld [vmem:[#allocation12 + $0x840] sm:$0xff] }
 0x2b5   :  { %v9443_v25 = vcombine.high %v9439_v23, %v9439_v23  ;;  %v9446_v28 = vrot.slane %v1938_v24, %v9363_v57  ;;  %v9458_v40 = vpack.c.bf16 %v9439_v23, %v9439_v23  ;;  %v2243_v24 = vld [vmem:[#allocation12 + $0x860] sm:$0xff] }
 0x2b7   :  { %v9450_v31 = vpack.c.bf16 %v9443_v25, %v9443_v25  ;;  %v9454_v61 = vcombine.high %v9446_v28, %v9446_v28  ;;  %v9468_v49 = vpack.c.bf16 %v9446_v28, %v9446_v28 }
 0x2b9   :  { %4353 = vmatprep.mubr.bf16.mxu0 %v9450_v31  ;;  %v9463_v45 = vpack.c.bf16 %v9454_v61, %v9454_v61 }
 0x2ba   :  { %4354 = vmatmul.mubr.bf16.vlgmr.msra.gmra.mxu0 %v9458_v40 }
 0x2bb   :  { %4404 = vmatpush1.bf16.msra.mxu0 %v7806_v32  ;;  %4394 = vmatprep.mubr.bf16.mxu1 %v9463_v45  ;;  %v7790_v32 = vcombine.low %v2271_v46, %v2275_v47  ;;  %v1988_v46 = vld [vmem:[#allocation12 + $0x68] sm:$0xff]  ;;  %v7759_v47 = vcombine.high %v2239_v22, %v2243_v24 }
 0x2bc   :  { %4395 = vmatmul.mubr.bf16.vlgmr.msra.gmra.mxu1 %v9468_v49  ;;  %4405 = vmatprep.subr.bf16.mxu0 %v7799_v41  ;;  %v1984_v41 = vld [vmem:[#allocation12 + $0x48] sm:$0xff] }
 0x2bd   :  { %4445 = vmatpush1.bf16.msra.mxu1 %v7552_v39  ;;  %4476 = vmatprep.mubr.bf16.mxu1 %v9450_v31  ;;  %v2259_v39 = vld [vmem:[#allocation12 + $0x8e0] sm:$0xff]  ;;  %v7505_v53 = vcombine.high %v1984_v41, %v1988_v46 }
 0x2be   :  { %4446 = vmatprep.subr.bf16.mxu1 %v7545_v50  ;;  %v7775_v7 = vcombine.high %v2255_v36, %v2259_v39  ;;  %v7774_v15 = vcombine.low %v2255_v36, %v2259_v39  ;;  %v7512_v50 = vcombine.low %v1992_v16, %v1996_v17  ;;  %v2100_v36 = vld [vmem:[#allocation12 + $0x3e8] sm:$0xff] }
 0x2bf   :  { %4406 = vmatpush1.bf16.msra.mxu0 %v7798_v51  ;;  %v2231_v51 = vld [vmem:[#allocation12 + $0x800] sm:$0xff] }
 0x2c0   :  { %4407 = vmatprep.subr.bf16.mxu0 %v7791_v54  ;;  %v7758_v54 = vcombine.low %v2239_v22, %v2243_v24  ;;  %v7751_v59 = vcombine.high %v2231_v51, %v2235_v52  ;;  %v2331_v22 = vld [vmem:[#allocation12 + $0xb20] sm:$0xff] }
 0x2c1   :  { %4447 = vmatpush1.bf16.msra.mxu1 %v7544_v56  ;;  %v1976_v56 = vld [vmem:[#allocation12 + $0x8] sm:$0xff] }
 0x2c2   :  { %4448 = vmatprep.subr.bf16.mxu1 %v7537_v26  ;;  %v7504_v26 = vcombine.low %v1984_v41, %v1988_v46  ;;  %v7497_v63 = vcombine.high %v1976_v56, %v1980_v58  ;;  %v2319_v46 = vld [vmem:[#allocation12 + $0xac0] sm:$0xff] }
 0x2c3   :  { %4408 = vmatpush1.bf16.msra.mxu0 %v7790_v32  ;;  %v2351_v32 = vld [vmem:[#allocation12 + $0xbc0] sm:$0xff] }
 0x2c4   :  { %4409 = vmatprep.subr.bf16.mxu0 %v7783_v0  ;;  %v7750_v0 = vcombine.low %v2231_v51, %v2235_v52  ;;  %v7871_v39 = vcombine.high %v2351_v32, %v2355_v62  ;;  %v2064_v52 = vld [vmem:[#allocation12 + $0x2c8] sm:$0xff] }
 0x2c5   :  { %4449 = vmatpush1.bf16.msra.mxu1 %v7536_v34  ;;  %v1858_v8 = vpop.f32.mrf.mxu1  ;;  %v2096_v34 = vld [vmem:[#allocation12 + $0x3c8] sm:$0xff] }
 0x2c6   :  { %v1859_v12 = vadd.f32 %v1858_v8, %v1251_v1  ;;  %4450 = vmatprep.subr.bf16.mxu1 %v7529_v2  ;;  %v7496_v1 = vcombine.low %v1976_v56, %v1980_v58  ;;  %v2343_v2 = vld [vmem:[#allocation12 + $0xb80] sm:$0xff]  ;;  %v7617_v4 = vcombine.high %v2096_v34, %v2100_v36  ;;  %v2092_v8 = vld [vmem:[#allocation12 + $0x3a8] sm:$0xff] }
 0x2c7   :  { %4410 = vmatpush1.bf16.msra.mxu0 %v7782_v3  ;;  %v1860_v14 = vpop.f32.mrf.mxu1  ;;  %v2347_v3 = vld [vmem:[#allocation12 + $0xba0] sm:$0xff] }
 0x2c8   :  { %v7492_v18 = vmul.f32 -1.442695, %v1859_v12  ;;  %v1861_v19 = vadd.f32 %v1860_v14, %v1255_v6  ;;  %4411 = vmatprep.subr.bf16.mxu0 %v7775_v7  ;;  %v7870_v6 = vcombine.low %v2351_v32, %v2355_v62  ;;  %v2088_v7 = vld [vmem:[#allocation12 + $0x388] sm:$0xff]  ;;  %v7863_v10 = vcombine.high %v2343_v2, %v2347_v3  ;;  %v2339_v14 = vld [vmem:[#allocation12 + $0xb60] sm:$0xff] }
 0x2c9   :  { %4451 = vmatpush1.bf16.msra.mxu1 %v7528_v9  ;;  %v1862_v43 = vpop.f32.mrf.mxu1  ;;  %v7616_v12 = vcombine.low %v2096_v34, %v2100_v36  ;;  %v7609_v16 = vcombine.high %v2088_v7, %v2092_v8  ;;  %v7862_v17 = vcombine.low %v2343_v2, %v2347_v3  ;;  %v2311_v58 = vld [vmem:[#allocation12 + $0xa80] sm:$0xff]  ;;  %v2056_v62 = vld [vmem:[#allocation12 + $0x288] sm:$0xff] }
 0x2ca   :  { %9017 = vpow2.f32 %v7492_v18  ;;  %v7493_v29 = vmul.f32 -1.442695, %v1861_v19  ;;  %4452 = vmatprep.subr.bf16.mxu1 %v7521_v13  ;;  %v2335_v13 = vld [vmem:[#allocation12 + $0xb40] sm:$0xff]  ;;  %v2080_v18 = vld [vmem:[#allocation12 + $0x348] sm:$0xff]  ;;  %v7608_v43 = vcombine.low %v2088_v7, %v2092_v8 }
 0x2cb   :  { %4412 = vmatpush1.bf16.msra.mxu0 %v7774_v15  ;;  %v1863_v37 = vpop.f32.mrf.mxu1  ;;  %v2084_v19 = vld [vmem:[#allocation12 + $0x368] sm:$0xff]  ;;  %v2307_v2 = vld [vmem:[#allocation12 + $0xa60] sm:$0xff] }
 0x2cc   :  { %9019 = vpow2.f32 %v7493_v29  ;;  %4413 = vmatprep.subr.bf16.mxu0 %v7767_v20  ;;  %v7855_v20 = vcombine.high %v2335_v13, %v2339_v14  ;;  %v7601_v24 = vcombine.high %v2080_v18, %v2084_v19  ;;  %v7854_v29 = vcombine.low %v2335_v13, %v2339_v14  ;;  %v2076_v37 = vld [vmem:[#allocation12 + $0x328] sm:$0xff] }
 0x2cd   :  { %4453 = vmatpush1.bf16.msra.mxu1 %v7520_v21  ;;  %v2327_v21 = vld [vmem:[#allocation12 + $0xb00] sm:$0xff]  ;;  %v7600_v41 = vcombine.low %v2080_v18, %v2084_v19  ;;  %v2052_v7 = vld [vmem:[#allocation12 + $0x268] sm:$0xff] }
 0x2ce   :  { %4454 = vmatprep.subr.bf16.mxu1 %v7513_v30  ;;  %v2072_v30 = vld [vmem:[#allocation12 + $0x308] sm:$0xff]  ;;  %v7846_v51 = vcombine.low %v2327_v21, %v2331_v22 }
 0x2cf   :  { %4414 = vmatpush1.bf16.msra.mxu0 %v7766_v38  ;;  %v7847_v38 = vcombine.high %v2327_v21, %v2331_v22  ;;  %v7592_v56 = vcombine.low %v2072_v30, %v2076_v37  ;;  %v2164_v21 = vld [vmem:[#allocation12 + $0x5e8] sm:$0xff] }
 0x2d0   :  { %4415 = vmatprep.subr.bf16.mxu0 %v7759_v47  ;;  %v2323_v47 = vld [vmem:[#allocation12 + $0xae0] sm:$0xff] }
 0x2d1   :  { %4455 = vmatpush1.bf16.msra.mxu1 %v7512_v50  ;;  %v7593_v50 = vcombine.high %v2072_v30, %v2076_v37  ;;  %v7838_v32 = vcombine.low %v2319_v46, %v2323_v47  ;;  %v2292_v30 = vld [vmem:[#allocation12 + $0x9e8] sm:$0xff] }
 0x2d2   :  { %4456 = vmatprep.subr.bf16.mxu1 %v7505_v53  ;;  %v2068_v53 = vld [vmem:[#allocation12 + $0x2e8] sm:$0xff] }
 0x2d3   :  { %4416 = vmatpush1.bf16.msra.mxu0 %v7758_v54  ;;  %v7839_v54 = vcombine.high %v2319_v46, %v2323_v47  ;;  %v2156_v46 = vld [vmem:[#allocation12 + $0x5a8] sm:$0xff] }
 0x2d4   :  { %4417 = vmatprep.subr.bf16.mxu0 %v7751_v59  ;;  %v2315_v59 = vld [vmem:[#allocation12 + $0xaa0] sm:$0xff] }
 0x2d5   :  { %4457 = vmatpush1.bf16.msra.mxu1 %v7504_v26  ;;  %v7585_v26 = vcombine.high %v2064_v52, %v2068_v53  ;;  %v7831_v34 = vcombine.high %v2311_v58, %v2315_v59 }
 0x2d6   :  { %4458 = vmatprep.subr.bf16.mxu1 %v7497_v63  ;;  %v2060_v63 = vld [vmem:[#allocation12 + $0x2a8] sm:$0xff] }
 0x2d7   :  { %v9018_v5 = vpop.eup %9017  ;;  %4418 = vmatpush1.bf16.msra.mxu0 %v7750_v0 }
 0x2d8   :  { %v1887_v9 = vadd.f32 1.0, %v9018_v5  ;;  %4419 = vmatprep.subr.bf16.mxu0 %v7871_v39  ;;  %v7584_v39 = vcombine.low %v2064_v52, %v2068_v53  ;;  %v7830_v5 = vcombine.low %v2311_v58, %v2315_v59  ;;  %v2284_v52 = vld [vmem:[#allocation12 + $0x9a8] sm:$0xff] }
 0x2d9   :  { %v9020_v11 = vpop.eup %9019  ;;  %4459 = vmatpush1.bf16.msra.mxu1 %v7496_v1  ;;  %v2303_v1 = vld [vmem:[#allocation12 + $0xa40] sm:$0xff]  ;;  %v2144_v58 = vld [vmem:[#allocation12 + $0x548] sm:$0xff] }
 0x2da   :  { %v1888_v15 = vadd.f32 1.0, %v9020_v11  ;;  %4460 = vmatprep.subr.bf16.mxu1 %v7617_v4  ;;  %9021 = vrcp.f32 %v1887_v9  ;;  %v7577_v4 = vcombine.high %v2056_v62, %v2060_v63  ;;  %v7823_v8 = vcombine.high %v2303_v1, %v2307_v2  ;;  %v2295_v11 = vld [vmem:[#allocation12 + $0xa00] sm:$0xff]  ;;  %v2148_v59 = vld [vmem:[#allocation12 + $0x568] sm:$0xff] }
 0x2db   :  { %4420 = vmatpush2.bf16.msra.mxu0 %v7870_v6  ;;  %v2048_v6 = vld [vmem:[#allocation12 + $0x248] sm:$0xff] }
 0x2dc   :  { %9023 = vrcp.f32 %v1888_v15  ;;  %4421 = vmatprep.subr.bf16.mxu0 %v7863_v10  ;;  %v7576_v10 = vcombine.low %v2056_v62, %v2060_v63  ;;  %v7569_v13 = vcombine.high %v2048_v6, %v2052_v7  ;;  %v7822_v15 = vcombine.low %v2303_v1, %v2307_v2  ;;  %v2272_v62 = vld [vmem:[#allocation12 + $0x948] sm:$0xff] }
 0x2dd   :  { %4461 = vmatpush2.bf16.msra.mxu1 %v7616_v12  ;;  %v2299_v12 = vld [vmem:[#allocation12 + $0xa20] sm:$0xff]  ;;  %v2276_v63 = vld [vmem:[#allocation12 + $0x968] sm:$0xff]  ;;  %v7664_v2 = vcombine.low %v2144_v58, %v2148_v59 }
 0x2de   :  { %4462 = vmatprep.subr.bf16.mxu1 %v7609_v16  ;;  %v2040_v16 = vld [vmem:[#allocation12 + $0x208] sm:$0xff]  ;;  %v7815_v18 = vcombine.high %v2295_v11, %v2299_v12  ;;  %v7793_v1 = vcombine.high %v2272_v62, %v2276_v63 }
 0x2df   :  { %4422 = vmatpush2.bf16.msra.mxu0 %v7862_v17  ;;  %v2044_v17 = vld [vmem:[#allocation12 + $0x228] sm:$0xff] }
 0x2e0   :  { %4423 = vmatprep.subr.bf16.mxu0 %v7855_v20  ;;  %v7568_v20 = vcombine.low %v2048_v6, %v2052_v7  ;;  %v7792_v6 = vcombine.low %v2272_v62, %v2276_v63  ;;  %v2128_v7 = vld [vmem:[#allocation12 + $0x4c8] sm:$0xff] }
 0x2e1   :  { %4463 = vmatpush2.bf16.msra.mxu1 %v7608_v43  ;;  %v2160_v43 = vld [vmem:[#allocation12 + $0x5c8] sm:$0xff] }
 0x2e2   :  { %4464 = vmatprep.subr.bf16.mxu1 %v7601_v24  ;;  %v7561_v24 = vcombine.high %v2040_v16, %v2044_v17  ;;  %v2228_v62 = vld [vmem:[#allocation12 + $0x7e8] sm:$0xff] }
 0x2e3   :  { %4424 = vmatpush2.bf16.msra.mxu0 %v7854_v29  ;;  %v2288_v29 = vld [vmem:[#allocation12 + $0x9c8] sm:$0xff] }
 0x2e4   :  { %4425 = vmatprep.subr.bf16.mxu0 %v7847_v38  ;;  %v7560_v38 = vcombine.low %v2040_v16, %v2044_v17  ;;  %v7809_v47 = vcombine.high %v2288_v29, %v2292_v30  ;;  %v2124_v16 = vld [vmem:[#allocation12 + $0x4a8] sm:$0xff] }
 0x2e5   :  { %4465 = vmatpush2.bf16.msra.mxu1 %v7600_v41  ;;  %v2152_v41 = vld [vmem:[#allocation12 + $0x588] sm:$0xff] }
 0x2e6   :  { %4466 = vmatprep.subr.bf16.mxu1 %v7593_v50  ;;  %v7680_v50 = vcombine.low %v2160_v43, %v2164_v21 }
 0x2e7   :  { %4426 = vmatpush2.bf16.msra.mxu0 %v7846_v51  ;;  %v9022_v0 = vpop.eup %9021  ;;  %v2280_v51 = vld [vmem:[#allocation12 + $0x988] sm:$0xff] }
 0x2e8   :  { %4427 = vmatprep.subr.bf16.mxu0 %v7839_v54  ;;  %v7673_v54 = vcombine.high %v2152_v41, %v2156_v46 }
 0x2e9   :  { %v9024_v36 = vpop.eup %9023  ;;  %4467 = vmatpush2.bf16.msra.mxu1 %v7592_v56  ;;  %v7808_v56 = vcombine.low %v2288_v29, %v2292_v30  ;;  %v2116_v29 = vld [vmem:[#allocation12 + $0x468] sm:$0xff] }
 0x2ea   :  { %v1924_v3 = vcombine.low %v9022_v0, %v9024_v36  ;;  %4468 = vmatprep.subr.bf16.mxu1 %v7585_v26  ;;  %v7801_v26 = vcombine.high %v2280_v51, %v2284_v52  ;;  %v7665_v0 = vcombine.high %v2144_v58, %v2148_v59  ;;  %v2136_v36 = vld [vmem:[#allocation12 + $0x508] sm:$0xff] }
 0x2eb   :  { %4428 = vmatpush2.bf16.msra.mxu0 %v7838_v32  ;;  %v7672_v32 = vcombine.low %v2152_v41, %v2156_v46  ;;  %v2244_v41 = vld [vmem:[#allocation12 + $0x868] sm:$0xff] }
 0x2ec   :  { %4429 = vmatprep.subr.bf16.mxu0 %v7831_v34  ;;  %v1931_v9 = vrot.slane %v1924_v3, %v9363_v57  ;;  %v7800_v34 = vcombine.low %v2280_v51, %v2284_v52  ;;  %v2264_v3 = vld [vmem:[#allocation12 + $0x908] sm:$0xff] }
 0x2ed   :  { %4469 = vmatpush2.bf16.msra.mxu1 %v7584_v39  ;;  %v2140_v39 = vld [vmem:[#allocation12 + $0x528] sm:$0xff] }
 0x2ee   :  { %4470 = vmatprep.subr.bf16.mxu1 %v7577_v4  ;;  %v1935_v14 = vmul.f32 %v1931_v9, %v9386_v60  ;;  %v7814_v60 = vcombine.low %v2295_v11, %v2299_v12  ;;  %v2268_v4 = vld [vmem:[#allocation12 + $0x928] sm:$0xff] }
 0x2ef   :  { %4430 = vmatpush2.bf16.msra.mxu0 %v7830_v5  ;;  %v7657_v5 = vcombine.high %v2136_v36, %v2140_v39  ;;  %v7785_v9 = vcombine.high %v2264_v3, %v2268_v4  ;;  %v2256_v11 = vld [vmem:[#allocation12 + $0x8c8] sm:$0xff] }
 0x2f0   :  { %4431 = vmatprep.subr.bf16.mxu0 %v7823_v8  ;;  %v9490_v19 = vrot.slane %v1935_v14, %v9363_v57  ;;  %v7681_v57 = vcombine.high %v2160_v43, %v2164_v21  ;;  %v2132_v8 = vld [vmem:[#allocation12 + $0x4e8] sm:$0xff]  ;;  %v7784_v14 = vcombine.low %v2264_v3, %v2268_v4 }
 0x2f1   :  { %4471 = vmatpush2.bf16.msra.mxu1 %v7576_v10  ;;  %v7656_v10 = vcombine.low %v2136_v36, %v2140_v39  ;;  %v2260_v12 = vld [vmem:[#allocation12 + $0x8e8] sm:$0xff] }
 0x2f2   :  { %4472 = vmatprep.subr.bf16.mxu1 %v7569_v13  ;;  %v9494_v22 = vcombine.high %v9490_v19, %v9490_v19  ;;  %v9503_v53 = vpack.c.bf16 %v9490_v19, %v9490_v19  ;;  %v7649_v13 = vcombine.high %v2128_v7, %v2132_v8  ;;  %v7777_v17 = vcombine.high %v2256_v11, %v2260_v12  ;;  %v2252_v43 = vld [vmem:[#allocation12 + $0x8a8] sm:$0xff] }
 0x2f3   :  { %4432 = vmatpush2.bf16.msra.mxu0 %v7822_v15  ;;  %v2120_v15 = vld [vmem:[#allocation12 + $0x488] sm:$0xff] }
 0x2f4   :  { %4433 = vmatprep.subr.bf16.mxu0 %v7815_v18  ;;  %v9498_v37 = vpack.c.bf16 %v9494_v22, %v9494_v22  ;;  %v7648_v18 = vcombine.low %v2128_v7, %v2132_v8  ;;  %v7641_v21 = vcombine.high %v2120_v15, %v2124_v16  ;;  %v2108_v51 = vld [vmem:[#allocation12 + $0x428] sm:$0xff] }
 0x2f5   :  { %4473 = vmatpush2.bf16.msra.mxu1 %v7568_v20  ;;  %v2248_v20 = vld [vmem:[#allocation12 + $0x888] sm:$0xff] }
 0x2f6   :  { %4435 = vmatprep.mubr.bf16.mxu0 %v9498_v37  ;;  %4474 = vmatprep.subr.bf16.mxu1 %v7561_v24  ;;  %v7776_v24 = vcombine.low %v2256_v11, %v2260_v12  ;;  %v7769_v30 = vcombine.high %v2248_v20, %v2252_v43  ;;  %v2236_v58 = vld [vmem:[#allocation12 + $0x828] sm:$0xff] }
 0x2f7   :  { %4434 = vmatpush2.bf16.msra.mxu0 %v7814_v60  ;;  %v2112_v60 = vld [vmem:[#allocation12 + $0x448] sm:$0xff] }
 0x2f8   :  { %4485 = vmatprep.subr.bf16.mxu0 %v7681_v57  ;;  %v7640_v57 = vcombine.low %v2120_v15, %v2124_v16  ;;  %v7633_v46 = vcombine.high %v2112_v60, %v2116_v29  ;;  %v2356_v36 = vld [vmem:[#allocation12 + $0xbe8] sm:$0xff] }
 0x2f9   :  { %4475 = vmatpush2.bf16.msra.mxu1 %v7560_v38  ;;  %v2240_v38 = vld [vmem:[#allocation12 + $0x848] sm:$0xff] }
 0x2fa   :  { %4436 = vmatmul.mubr.bf16.vlgmr.msra.gmra.mxu0 %v9503_v53  ;;  %4526 = vmatprep.subr.bf16.mxu1 %v7809_v47  ;;  %v7768_v47 = vcombine.low %v2248_v20, %v2252_v43  ;;  %v7761_v52 = vcombine.high %v2240_v38, %v2244_v41  ;;  %v2220_v3 = vld [vmem:[#allocation12 + $0x7a8] sm:$0xff] }
 0x2fb   :  { %4486 = vmatpush1.bf16.msra.mxu0 %v7680_v50  ;;  %4517 = vmatprep.mubr.bf16.mxu0 %v9463_v45  ;;  %v2104_v50 = vld [vmem:[#allocation12 + $0x408] sm:$0xff] }
 0x2fc   :  { %4477 = vmatmul.mubr.bf16.vlgmr.msra.gmra.mxu1 %v9458_v40  ;;  %4487 = vmatprep.subr.bf16.mxu0 %v7673_v54  ;;  %v7632_v54 = vcombine.low %v2112_v60, %v2116_v29  ;;  %v7625_v59 = vcombine.high %v2104_v50, %v2108_v51  ;;  %v2348_v7 = vld [vmem:[#allocation12 + $0xba8] sm:$0xff] }
 0x2fd   :  { %4527 = vmatpush1.bf16.msra.mxu1 %v7808_v56  ;;  %4558 = vmatprep.mubr.bf16.mxu1 %v9498_v37  ;;  %v2232_v56 = vld [vmem:[#allocation12 + $0x808] sm:$0xff] }
 0x2fe   :  { %4528 = vmatprep.subr.bf16.mxu1 %v7801_v26  ;;  %v7760_v26 = vcombine.low %v2240_v38, %v2244_v41  ;;  %v7753_v63 = vcombine.high %v2232_v56, %v2236_v58  ;;  %v2212_v11 = vld [vmem:[#allocation12 + $0x768] sm:$0xff] }
 0x2ff   :  { %4488 = vmatpush1.bf16.msra.mxu0 %v7672_v32  ;;  %v2224_v32 = vld [vmem:[#allocation12 + $0x7c8] sm:$0xff] }
 0x300   :  { %4489 = vmatprep.subr.bf16.mxu0 %v7665_v0  ;;  %v7624_v0 = vcombine.low %v2104_v50, %v2108_v51  ;;  %v7745_v39 = vcombine.high %v2224_v32, %v2228_v62  ;;  %v2340_v15 = vld [vmem:[#allocation12 + $0xb68] sm:$0xff] }
 0x301   :  { %4529 = vmatpush1.bf16.msra.mxu1 %v7800_v34  ;;  %v2352_v34 = vld [vmem:[#allocation12 + $0xbc8] sm:$0xff] }
 0x302   :  { %4530 = vmatprep.subr.bf16.mxu1 %v7793_v1  ;;  %v7752_v1 = vcombine.low %v2232_v56, %v2236_v58  ;;  %v7873_v4 = vcombine.high %v2352_v34, %v2356_v36  ;;  %v2204_v20 = vld [vmem:[#allocation12 + $0x728] sm:$0xff] }
 0x303   :  { %4490 = vmatpush1.bf16.msra.mxu0 %v7664_v2  ;;  %v2216_v2 = vld [vmem:[#allocation12 + $0x788] sm:$0xff] }
 0x304   :  { %4491 = vmatprep.subr.bf16.mxu0 %v7657_v5  ;;  %v7744_v5 = vcombine.low %v2224_v32, %v2228_v62  ;;  %v7737_v8 = vcombine.high %v2216_v2, %v2220_v3  ;;  %v2332_v60 = vld [vmem:[#allocation12 + $0xb28] sm:$0xff] }
 0x305   :  { %4531 = vmatpush1.bf16.msra.mxu1 %v7792_v6  ;;  %v2344_v6 = vld [vmem:[#allocation12 + $0xb88] sm:$0xff] }
 0x306   :  { %4532 = vmatprep.subr.bf16.mxu1 %v7785_v9  ;;  %v7872_v9 = vcombine.low %v2352_v34, %v2356_v36  ;;  %v7865_v12 = vcombine.high %v2344_v6, %v2348_v7  ;;  %v2196_v38 = vld [vmem:[#allocation12 + $0x6e8] sm:$0xff] }
 0x307   :  { %4492 = vmatpush1.bf16.msra.mxu0 %v7656_v10  ;;  %v2208_v10 = vld [vmem:[#allocation12 + $0x748] sm:$0xff] }
 0x308   :  { %4493 = vmatprep.subr.bf16.mxu0 %v7649_v13  ;;  %v7736_v13 = vcombine.low %v2216_v2, %v2220_v3  ;;  %v7729_v16 = vcombine.high %v2208_v10, %v2212_v11  ;;  %v2324_v50 = vld [vmem:[#allocation12 + $0xae8] sm:$0xff] }
 0x309   :  { %4533 = vmatpush1.bf16.msra.mxu1 %v7784_v14  ;;  %v2336_v14 = vld [vmem:[#allocation12 + $0xb48] sm:$0xff] }
 0x30a   :  { %4534 = vmatprep.subr.bf16.mxu1 %v7777_v17  ;;  %v7864_v17 = vcombine.low %v2344_v6, %v2348_v7  ;;  %v7857_v43 = vcombine.high %v2336_v14, %v2340_v15  ;;  %v2188_v56 = vld [vmem:[#allocation12 + $0x6a8] sm:$0xff] }
 0x30b   :  { %4494 = vmatpush1.bf16.msra.mxu0 %v7648_v18  ;;  %v2200_v18 = vld [vmem:[#allocation12 + $0x708] sm:$0xff] }
 0x30c   :  { %4495 = vmatprep.subr.bf16.mxu0 %v7641_v21  ;;  %v7728_v21 = vcombine.low %v2208_v10, %v2212_v11  ;;  %v7721_v29 = vcombine.high %v2200_v18, %v2204_v20  ;;  %v2316_v32 = vld [vmem:[#allocation12 + $0xaa8] sm:$0xff] }
 0x30d   :  { %4535 = vmatpush1.bf16.msra.mxu1 %v7776_v24  ;;  %v2328_v24 = vld [vmem:[#allocation12 + $0xb08] sm:$0xff] }
 0x30e   :  { %4536 = vmatprep.subr.bf16.mxu1 %v7769_v30  ;;  %v7856_v30 = vcombine.low %v2336_v14, %v2340_v15  ;;  %v7849_v41 = vcombine.high %v2328_v24, %v2332_v60  ;;  %v2180_v34 = vld [vmem:[#allocation12 + $0x668] sm:$0xff]  ;;  %v2037_v14 = vld [vmem:[#allocation12 + $0x1f0] sm:$0xff] }
 0x30f   :  { %4496 = vmatpush1.bf16.msra.mxu0 %v7640_v57  ;;  %v2192_v57 = vld [vmem:[#allocation12 + $0x6c8] sm:$0xff] }
 0x310   :  { %4497 = vmatprep.subr.bf16.mxu0 %v7633_v46  ;;  %v7720_v46 = vcombine.low %v2200_v18, %v2204_v20  ;;  %v7713_v51 = vcombine.high %v2192_v57, %v2196_v38  ;;  %v2308_v2 = vld [vmem:[#allocation12 + $0xa68] sm:$0xff]  ;;  %v2165_v18 = vld [vmem:[#allocation12 + $0x5f0] sm:$0xff] }
 0x311   :  { %4537 = vmatpush1.bf16.msra.mxu1 %v7768_v47  ;;  %v2320_v47 = vld [vmem:[#allocation12 + $0xac8] sm:$0xff] }
 0x312   :  { %4538 = vmatprep.subr.bf16.mxu1 %v7761_v52  ;;  %v7848_v52 = vcombine.low %v2328_v24, %v2332_v60  ;;  %v7841_v58 = vcombine.high %v2320_v47, %v2324_v50  ;;  %v2172_v6 = vld [vmem:[#allocation12 + $0x628] sm:$0xff]  ;;  %v2029_v24 = vld [vmem:[#allocation12 + $0x1b0] sm:$0xff] }
 0x313   :  { %4498 = vmatpush1.bf16.msra.mxu0 %v7632_v54  ;;  %v2184_v54 = vld [vmem:[#allocation12 + $0x688] sm:$0xff] }
 0x314   :  { %4499 = vmatprep.subr.bf16.mxu0 %v7625_v59  ;;  %v7712_v59 = vcombine.low %v2192_v57, %v2196_v38  ;;  %v7705_v62 = vcombine.high %v2184_v54, %v2188_v56  ;;  %v2300_v10 = vld [vmem:[#allocation12 + $0xa28] sm:$0xff]  ;;  %v2157_v57 = vld [vmem:[#allocation12 + $0x5b0] sm:$0xff] }
 0x315   :  { %4539 = vmatpush1.bf16.msra.mxu1 %v7760_v26  ;;  %v2312_v26 = vld [vmem:[#allocation12 + $0xa88] sm:$0xff] }
 0x316   :  { %4540 = vmatprep.subr.bf16.mxu1 %v7753_v63  ;;  %v7840_v63 = vcombine.low %v2320_v47, %v2324_v50  ;;  %v7833_v36 = vcombine.high %v2312_v26, %v2316_v32  ;;  %v2021_v47 = vld [vmem:[#allocation12 + $0x170] sm:$0xff] }
 0x317   :  { %4500 = vmatpush1.bf16.msra.mxu0 %v7624_v0  ;;  %v2176_v0 = vld [vmem:[#allocation12 + $0x648] sm:$0xff] }
 0x318   :  { %4501 = vmatprep.subr.bf16.mxu0 %v7745_v39  ;;  %v7704_v39 = vcombine.low %v2184_v54, %v2188_v56  ;;  %v7697_v3 = vcombine.high %v2176_v0, %v2180_v34  ;;  %v2149_v54 = vld [vmem:[#allocation12 + $0x570] sm:$0xff] }
 0x319   :  { %4541 = vmatpush1.bf16.msra.mxu1 %v7752_v1  ;;  %v2304_v1 = vld [vmem:[#allocation12 + $0xa48] sm:$0xff] }
 0x31a   :  { %4542 = vmatprep.subr.bf16.mxu1 %v7873_v4  ;;  %v7832_v4 = vcombine.low %v2312_v26, %v2316_v32  ;;  %v7825_v7 = vcombine.high %v2304_v1, %v2308_v2  ;;  %v2013_v26 = vld [vmem:[#allocation12 + $0x130] sm:$0xff] }
 0x31b   :  { %4502 = vmatpush2.bf16.msra.mxu0 %v7744_v5  ;;  %v2168_v5 = vld [vmem:[#allocation12 + $0x608] sm:$0xff] }
 0x31c   :  { %4503 = vmatprep.subr.bf16.mxu0 %v7737_v8  ;;  %v7696_v8 = vcombine.low %v2176_v0, %v2180_v34  ;;  %v7689_v11 = vcombine.high %v2168_v5, %v2172_v6  ;;  %v2141_v0 = vld [vmem:[#allocation12 + $0x530] sm:$0xff] }
 0x31d   :  { %4543 = vmatpush2.bf16.msra.mxu1 %v7872_v9  ;;  %v2296_v9 = vld [vmem:[#allocation12 + $0xa08] sm:$0xff] }
 0x31e   :  { %4544 = vmatprep.subr.bf16.mxu1 %v7865_v12  ;;  %v7824_v12 = vcombine.low %v2304_v1, %v2308_v2  ;;  %v7817_v15 = vcombine.high %v2296_v9, %v2300_v10  ;;  %v2005_v1 = vld [vmem:[#allocation12 + $0xf0] sm:$0xff] }
 0x31f   :  { %4504 = vmatpush2.bf16.msra.mxu0 %v7736_v13  ;;  %v2033_v13 = vld [vmem:[#allocation12 + $0x1d0] sm:$0xff] }
 0x320   :  { %4505 = vmatprep.subr.bf16.mxu0 %v7729_v16  ;;  %v7688_v16 = vcombine.low %v2168_v5, %v2172_v6  ;;  %v7555_v20 = vcombine.high %v2033_v13, %v2037_v14  ;;  %v2133_v5 = vld [vmem:[#allocation12 + $0x4f0] sm:$0xff] }
 0x321   :  { %4545 = vmatpush2.bf16.msra.mxu1 %v7864_v17  ;;  %v2161_v17 = vld [vmem:[#allocation12 + $0x5d0] sm:$0xff] }
 0x322   :  { %4546 = vmatprep.subr.bf16.mxu1 %v7857_v43  ;;  %v7816_v43 = vcombine.low %v2296_v9, %v2300_v10  ;;  %v7683_v60 = vcombine.high %v2161_v17, %v2165_v18  ;;  %v1997_v9 = vld [vmem:[#allocation12 + $0xb0] sm:$0xff] }
 0x323   :  { %4506 = vmatpush2.bf16.msra.mxu0 %v7728_v21  ;;  %v2025_v21 = vld [vmem:[#allocation12 + $0x190] sm:$0xff] }
 0x324   :  { %4507 = vmatprep.subr.bf16.mxu0 %v7721_v29  ;;  %v7554_v29 = vcombine.low %v2033_v13, %v2037_v14  ;;  %v7547_v38 = vcombine.high %v2025_v21, %v2029_v24  ;;  %v2125_v13 = vld [vmem:[#allocation12 + $0x4b0] sm:$0xff] }
 0x325   :  { %4547 = vmatpush2.bf16.msra.mxu1 %v7856_v30  ;;  %v2153_v30 = vld [vmem:[#allocation12 + $0x590] sm:$0xff] }
 0x326   :  { %4548 = vmatprep.subr.bf16.mxu1 %v7849_v41  ;;  %v7682_v41 = vcombine.low %v2161_v17, %v2165_v18  ;;  %v7675_v50 = vcombine.high %v2153_v30, %v2157_v57  ;;  %v1989_v17 = vld [vmem:[#allocation12 + $0x70] sm:$0xff] }
 0x327   :  { %4508 = vmatpush2.bf16.msra.mxu0 %v7720_v46  ;;  %v2017_v46 = vld [vmem:[#allocation12 + $0x150] sm:$0xff] }
 0x328   :  { %4509 = vmatprep.subr.bf16.mxu0 %v7713_v51  ;;  %v7546_v51 = vcombine.low %v2025_v21, %v2029_v24  ;;  %v7539_v56 = vcombine.high %v2017_v46, %v2021_v47  ;;  %v2117_v21 = vld [vmem:[#allocation12 + $0x470] sm:$0xff] }
 0x329   :  { %4549 = vmatpush2.bf16.msra.mxu1 %v7848_v52  ;;  %v2145_v52 = vld [vmem:[#allocation12 + $0x550] sm:$0xff] }
 0x32a   :  { %4550 = vmatprep.subr.bf16.mxu1 %v7841_v58  ;;  %v7674_v58 = vcombine.low %v2153_v30, %v2157_v57  ;;  %v7667_v32 = vcombine.high %v2145_v52, %v2149_v54  ;;  %v1981_v30 = vld [vmem:[#allocation12 + $0x30] sm:$0xff] }
 0x32b   :  { %4510 = vmatpush2.bf16.msra.mxu0 %v7712_v59  ;;  %v2009_v59 = vld [vmem:[#allocation12 + $0x110] sm:$0xff] }
 0x32c   :  { %4511 = vmatprep.subr.bf16.mxu0 %v7705_v62  ;;  %v7538_v62 = vcombine.low %v2017_v46, %v2021_v47  ;;  %v7531_v34 = vcombine.high %v2009_v59, %v2013_v26  ;;  %v2109_v46 = vld [vmem:[#allocation12 + $0x430] sm:$0xff] }
 0x32d   :  { %4551 = vmatpush2.bf16.msra.mxu1 %v7840_v63  ;;  %v2137_v63 = vld [vmem:[#allocation12 + $0x510] sm:$0xff] }
 0x32e   :  { %4552 = vmatprep.subr.bf16.mxu1 %v7833_v36  ;;  %v7666_v36 = vcombine.low %v2145_v52, %v2149_v54  ;;  %v7659_v2 = vcombine.high %v2137_v63, %v2141_v0  ;;  %v2101_v52 = vld [vmem:[#allocation12 + $0x3f0] sm:$0xff] }
 0x32f   :  { %4512 = vmatpush2.bf16.msra.mxu0 %v7704_v39  ;;  %v2001_v39 = vld [vmem:[#allocation12 + $0xd0] sm:$0xff] }
 0x330   :  { %4513 = vmatprep.subr.bf16.mxu0 %v7697_v3  ;;  %v7530_v3 = vcombine.low %v2009_v59, %v2013_v26  ;;  %v7523_v6 = vcombine.high %v2001_v39, %v2005_v1  ;;  %v2229_v59 = vld [vmem:[#allocation12 + $0x7f0] sm:$0xff] }
 0x331   :  { %4553 = vmatpush2.bf16.msra.mxu1 %v7832_v4  ;;  %v2129_v4 = vld [vmem:[#allocation12 + $0x4d0] sm:$0xff] }
 0x332   :  { %4554 = vmatprep.subr.bf16.mxu1 %v7825_v7  ;;  %v7658_v7 = vcombine.low %v2137_v63, %v2141_v0  ;;  %v7651_v10 = vcombine.high %v2129_v4, %v2133_v5  ;;  %v2093_v63 = vld [vmem:[#allocation12 + $0x3b0] sm:$0xff] }
 0x333   :  { %4514 = vmatpush2.bf16.msra.mxu0 %v7696_v8  ;;  %v1993_v8 = vld [vmem:[#allocation12 + $0x90] sm:$0xff] }
 0x334   :  { %4515 = vmatprep.subr.bf16.mxu0 %v7689_v11  ;;  %v7522_v11 = vcombine.low %v2001_v39, %v2005_v1  ;;  %v7515_v14 = vcombine.high %v1993_v8, %v1997_v9  ;;  %v2221_v39 = vld [vmem:[#allocation12 + $0x7b0] sm:$0xff] }
 0x335   :  { %4555 = vmatpush2.bf16.msra.mxu1 %v7824_v12  ;;  %v2121_v12 = vld [vmem:[#allocation12 + $0x490] sm:$0xff] }
 0x336   :  { %4556 = vmatprep.subr.bf16.mxu1 %v7817_v15  ;;  %v7650_v15 = vcombine.low %v2129_v4, %v2133_v5  ;;  %v7643_v18 = vcombine.high %v2121_v12, %v2125_v13  ;;  %v2085_v4 = vld [vmem:[#allocation12 + $0x370] sm:$0xff] }
 0x337   :  { %4516 = vmatpush2.bf16.msra.mxu0 %v7688_v16  ;;  %v1985_v16 = vld [vmem:[#allocation12 + $0x50] sm:$0xff] }
 0x338   :  { %4567 = vmatprep.subr.bf16.mxu0 %v7555_v20  ;;  %v7514_v20 = vcombine.low %v1993_v8, %v1997_v9  ;;  %v7507_v24 = vcombine.high %v1985_v16, %v1989_v17  ;;  %v2213_v8 = vld [vmem:[#allocation12 + $0x770] sm:$0xff] }
 0x339   :  { %4557 = vmatpush2.bf16.msra.mxu1 %v7816_v43  ;;  %v2113_v43 = vld [vmem:[#allocation12 + $0x450] sm:$0xff] }
 0x33a   :  { %4518 = vmatmul.mubr.bf16.vlgmr.msra.gmra.mxu0 %v9468_v49  ;;  %4608 = vmatprep.subr.bf16.mxu1 %v7683_v60  ;;  %v7642_v60 = vcombine.low %v2121_v12, %v2125_v13  ;;  %v7635_v57 = vcombine.high %v2113_v43, %v2117_v21  ;;  %v2077_v12 = vld [vmem:[#allocation12 + $0x330] sm:$0xff] }
 0x33b   :  { %4568 = vmatpush1.bf16.msra.mxu0 %v7554_v29  ;;  %4599 = vmatprep.mubr.bf16.mxu0 %v9450_v31  ;;  %v1977_v29 = vld [vmem:[#allocation12 + $0x10] sm:$0xff] }
 0x33c   :  { %4559 = vmatmul.mubr.bf16.vlgmr.msra.gmra.mxu1 %v9503_v53  ;;  %4569 = vmatprep.subr.bf16.mxu0 %v7547_v38  ;;  %v7506_v38 = vcombine.low %v1985_v16, %v1989_v17  ;;  %v7499_v47 = vcombine.high %v1977_v29, %v1981_v30  ;;  %v2205_v16 = vld [vmem:[#allocation12 + $0x730] sm:$0xff] }
 0x33d   :  { %4609 = vmatpush1.bf16.msra.mxu1 %v7682_v41  ;;  %4640 = vmatprep.mubr.bf16.mxu1 %v9463_v45  ;;  %v2105_v41 = vld [vmem:[#allocation12 + $0x410] sm:$0xff] }
 0x33e   :  { %4610 = vmatprep.subr.bf16.mxu1 %v7675_v50  ;;  %v7634_v50 = vcombine.low %v2113_v43, %v2117_v21  ;;  %v7627_v54 = vcombine.high %v2105_v41, %v2109_v46  ;;  %v2069_v43 = vld [vmem:[#allocation12 + $0x2f0] sm:$0xff] }
 0x33f   :  { %4570 = vmatpush1.bf16.msra.mxu0 %v7546_v51  ;;  %v2097_v51 = vld [vmem:[#allocation12 + $0x3d0] sm:$0xff] }
 0x340   :  { %4571 = vmatprep.subr.bf16.mxu0 %v7539_v56  ;;  %v7498_v56 = vcombine.low %v1977_v29, %v1981_v30  ;;  %v7619_v26 = vcombine.high %v2097_v51, %v2101_v52  ;;  %v2197_v29 = vld [vmem:[#allocation12 + $0x6f0] sm:$0xff] }
 0x341   :  { %4611 = vmatpush1.bf16.msra.mxu1 %v7674_v58  ;;  %v2225_v58 = vld [vmem:[#allocation12 + $0x7d0] sm:$0xff] }
 0x342   :  { %4612 = vmatprep.subr.bf16.mxu1 %v7667_v32  ;;  %v7626_v32 = vcombine.low %v2105_v41, %v2109_v46  ;;  %v7747_v0 = vcombine.high %v2225_v58, %v2229_v59  ;;  %v2061_v41 = vld [vmem:[#allocation12 + $0x2b0] sm:$0xff] }
 0x343   :  { %4572 = vmatpush1.bf16.msra.mxu0 %v7538_v62  ;;  %v2089_v62 = vld [vmem:[#allocation12 + $0x390] sm:$0xff] }
 0x344   :  { %4573 = vmatprep.subr.bf16.mxu0 %v7531_v34  ;;  %v7618_v34 = vcombine.low %v2097_v51, %v2101_v52  ;;  %v7611_v1 = vcombine.high %v2089_v62, %v2093_v63  ;;  %v2189_v51 = vld [vmem:[#allocation12 + $0x6b0] sm:$0xff] }
 0x345   :  { %4613 = vmatpush1.bf16.msra.mxu1 %v7666_v36  ;;  %v2217_v36 = vld [vmem:[#allocation12 + $0x790] sm:$0xff] }
 0x346   :  { %4614 = vmatprep.subr.bf16.mxu1 %v7659_v2  ;;  %v7746_v2 = vcombine.low %v2225_v58, %v2229_v59  ;;  %v7739_v5 = vcombine.high %v2217_v36, %v2221_v39  ;;  %v2053_v58 = vld [vmem:[#allocation12 + $0x270] sm:$0xff] }
 0x347   :  { %4574 = vmatpush1.bf16.msra.mxu0 %v7530_v3  ;;  %v2081_v3 = vld [vmem:[#allocation12 + $0x350] sm:$0xff] }
 0x348   :  { %4575 = vmatprep.subr.bf16.mxu0 %v7523_v6  ;;  %v7610_v6 = vcombine.low %v2089_v62, %v2093_v63  ;;  %v7603_v9 = vcombine.high %v2081_v3, %v2085_v4  ;;  %v2181_v62 = vld [vmem:[#allocation12 + $0x670] sm:$0xff] }
 0x349   :  { %4615 = vmatpush1.bf16.msra.mxu1 %v7658_v7  ;;  %v2209_v7 = vld [vmem:[#allocation12 + $0x750] sm:$0xff] }
 0x34a   :  { %4616 = vmatprep.subr.bf16.mxu1 %v7651_v10  ;;  %v7738_v10 = vcombine.low %v2217_v36, %v2221_v39  ;;  %v7731_v13 = vcombine.high %v2209_v7, %v2213_v8  ;;  %v2045_v36 = vld [vmem:[#allocation12 + $0x230] sm:$0xff] }
 0x34b   :  { %4576 = vmatpush1.bf16.msra.mxu0 %v7522_v11  ;;  %v2073_v11 = vld [vmem:[#allocation12 + $0x310] sm:$0xff] }
 0x34c   :  { %4577 = vmatprep.subr.bf16.mxu0 %v7515_v14  ;;  %v7602_v14 = vcombine.low %v2081_v3, %v2085_v4  ;;  %v7595_v17 = vcombine.high %v2073_v11, %v2077_v12  ;;  %v2173_v3 = vld [vmem:[#allocation12 + $0x630] sm:$0xff] }
 0x34d   :  { %4617 = vmatpush1.bf16.msra.mxu1 %v7650_v15  ;;  %v2201_v15 = vld [vmem:[#allocation12 + $0x710] sm:$0xff] }
 0x34e   :  { %4618 = vmatprep.subr.bf16.mxu1 %v7643_v18  ;;  %v7730_v18 = vcombine.low %v2209_v7, %v2213_v8  ;;  %v7723_v21 = vcombine.high %v2201_v15, %v2205_v16  ;;  %v2293_v7 = vld [vmem:[#allocation12 + $0x9f0] sm:$0xff] }
 0x34f   :  { %4578 = vmatpush1.bf16.msra.mxu0 %v7514_v20  ;;  %v2065_v20 = vld [vmem:[#allocation12 + $0x2d0] sm:$0xff] }
 0x350   :  { %4579 = vmatprep.subr.bf16.mxu0 %v7507_v24  ;;  %v7594_v24 = vcombine.low %v2073_v11, %v2077_v12  ;;  %v7587_v30 = vcombine.high %v2065_v20, %v2069_v43  ;;  %v2038_v11 = vld [vmem:[#allocation12 + $0x1f8] sm:$0xff] }
 0x351   :  { %4619 = vmatpush1.bf16.msra.mxu1 %v7642_v60  ;;  %v2193_v60 = vld [vmem:[#allocation12 + $0x6d0] sm:$0xff] }
 0x352   :  { %4620 = vmatprep.subr.bf16.mxu1 %v7635_v57  ;;  %v7722_v57 = vcombine.low %v2201_v15, %v2205_v16  ;;  %v7715_v46 = vcombine.high %v2193_v60, %v2197_v29  ;;  %v2281_v15 = vld [vmem:[#allocation12 + $0x990] sm:$0xff] }
 0x353   :  { %4580 = vmatpush1.bf16.msra.mxu0 %v7506_v38  ;;  %v2057_v38 = vld [vmem:[#allocation12 + $0x290] sm:$0xff] }
 0x354   :  { %4581 = vmatprep.subr.bf16.mxu0 %v7499_v47  ;;  %v7586_v47 = vcombine.low %v2065_v20, %v2069_v43  ;;  %v7579_v52 = vcombine.high %v2057_v38, %v2061_v41  ;;  %v2285_v16 = vld [vmem:[#allocation12 + $0x9b0] sm:$0xff]  ;;  %v2026_v43 = vld [vmem:[#allocation12 + $0x198] sm:$0xff] }
 0x355   :  { %4621 = vmatpush1.bf16.msra.mxu1 %v7634_v50  ;;  %v2185_v50 = vld [vmem:[#allocation12 + $0x690] sm:$0xff] }
 0x356   :  { %4622 = vmatprep.subr.bf16.mxu1 %v7627_v54  ;;  %v7714_v54 = vcombine.low %v2193_v60, %v2197_v29  ;;  %v7707_v59 = vcombine.high %v2185_v50, %v2189_v51 }
 0x357   :  { %4582 = vmatpush1.bf16.msra.mxu0 %v7498_v56  ;;  %v2049_v56 = vld [vmem:[#allocation12 + $0x250] sm:$0xff] }
 0x358   :  { %4583 = vmatprep.subr.bf16.mxu0 %v7619_v26  ;;  %v7578_v26 = vcombine.low %v2057_v38, %v2061_v41  ;;  %v7571_v63 = vcombine.high %v2049_v56, %v2053_v58 }
 0x359   :  { %4623 = vmatpush1.bf16.msra.mxu1 %v7626_v32  ;;  %v2177_v32 = vld [vmem:[#allocation12 + $0x650] sm:$0xff] }
 0x35a   :  { %4624 = vmatprep.subr.bf16.mxu1 %v7747_v0  ;;  %v7706_v0 = vcombine.low %v2185_v50, %v2189_v51  ;;  %v7699_v39 = vcombine.high %v2177_v32, %v2181_v62  ;;  %v2018_v50 = vld [vmem:[#allocation12 + $0x158] sm:$0xff] }
 0x35b   :  { %4584 = vmatpush2.bf16.msra.mxu0 %v7618_v34  ;;  %v2041_v34 = vld [vmem:[#allocation12 + $0x210] sm:$0xff]  ;;  %v2022_v51 = vld [vmem:[#allocation12 + $0x178] sm:$0xff] }
 0x35c   :  { %4585 = vmatprep.subr.bf16.mxu0 %v7611_v1  ;;  %v7570_v1 = vcombine.low %v2049_v56, %v2053_v58  ;;  %v7563_v4 = vcombine.high %v2041_v34, %v2045_v36 }
 0x35d   :  { %4625 = vmatpush2.bf16.msra.mxu1 %v7746_v2  ;;  %v2169_v2 = vld [vmem:[#allocation12 + $0x610] sm:$0xff] }
 0x35e   :  { %4626 = vmatprep.subr.bf16.mxu1 %v7739_v5  ;;  %v7698_v5 = vcombine.low %v2177_v32, %v2181_v62  ;;  %v7691_v8 = vcombine.high %v2169_v2, %v2173_v3  ;;  %v2265_v32 = vld [vmem:[#allocation12 + $0x910] sm:$0xff] }
 0x35f   :  { %4586 = vmatpush2.bf16.msra.mxu0 %v7610_v6  ;;  %v2289_v6 = vld [vmem:[#allocation12 + $0x9d0] sm:$0xff] }
 0x360   :  { %4587 = vmatprep.subr.bf16.mxu0 %v7603_v9  ;;  %v7562_v9 = vcombine.low %v2041_v34, %v2045_v36  ;;  %v7811_v12 = vcombine.high %v2289_v6, %v2293_v7  ;;  %v2269_v62 = vld [vmem:[#allocation12 + $0x930] sm:$0xff]  ;;  %v7541_v34 = vcombine.high %v2018_v50, %v2022_v51 }
 0x361   :  { %4627 = vmatpush2.bf16.msra.mxu1 %v7738_v10  ;;  %v2034_v10 = vld [vmem:[#allocation12 + $0x1d8] sm:$0xff] }
 0x362   :  { %4628 = vmatprep.subr.bf16.mxu1 %v7731_v13  ;;  %v9513_v13 = vld [vmem:[#allocation14] sm:$0xff]  ;;  %v7556_v60 = vcombine.low %v2034_v10, %v2038_v11 }
 0x363   :  { %4588 = vmatpush2.bf16.msra.mxu0 %v7602_v14  ;;  %v7690_v14 = vcombine.low %v2169_v2, %v2173_v3  ;;  %v2364_v20 = vrot.slane %v9513_v13, %v9391_v33  ;;  %v2368_v29 = vrot.slane %v9513_v13, %v9394_v35  ;;  %v2014_v2 = vld [vmem:[#allocation12 + $0x138] sm:$0xff] }
 0x364   :  { %4589 = vmatprep.subr.bf16.mxu0 %v7595_v17  ;;  %v7557_v17 = vcombine.high %v2034_v10, %v2038_v11  ;;  %v7786_v10 = vcombine.low %v2265_v32, %v2269_v62  ;;  %v2002_v11 = vld [vmem:[#allocation12 + $0xd8] sm:$0xff] }
 0x365   :  { %4629 = vmatpush2.bf16.msra.mxu1 %v7730_v18  ;;  %v7810_v18 = vcombine.low %v2289_v6, %v2293_v7  ;;  %v7540_v6 = vcombine.low %v2018_v50, %v2022_v51  ;;  %v2261_v7 = vld [vmem:[#allocation12 + $0x8f0] sm:$0xff] }
 0x366   :  { %4630 = vmatprep.subr.bf16.mxu1 %v7723_v21  ;;  %v2030_v21 = vld [vmem:[#allocation12 + $0x1b8] sm:$0xff]  ;;  %v2233_v51 = vld [vmem:[#allocation12 + $0x810] sm:$0xff] }
 0x367   :  { %4590 = vmatpush2.bf16.msra.mxu0 %v7594_v24  ;;  %v7803_v24 = vcombine.high %v2281_v15, %v2285_v16  ;;  %v7549_v41 = vcombine.high %v2026_v43, %v2030_v21 }
 0x368   :  { %4591 = vmatprep.subr.bf16.mxu0 %v7587_v30  ;;  %v2273_v30 = vld [vmem:[#allocation12 + $0x950] sm:$0xff] }
 0x369   :  { %4631 = vmatpush2.bf16.msra.mxu1 %v7722_v57  ;;  %v2277_v57 = vld [vmem:[#allocation12 + $0x970] sm:$0xff] }
 0x36a   :  { %4632 = vmatprep.subr.bf16.mxu1 %v7715_v46  ;;  %v7795_v56 = vcombine.high %v2273_v30, %v2277_v57 }
 0x36b   :  { %4592 = vmatpush2.bf16.msra.mxu0 %v7586_v47  ;;  %v7802_v47 = vcombine.low %v2281_v15, %v2285_v16  ;;  %v2249_v16 = vld [vmem:[#allocation12 + $0x890] sm:$0xff] }
 0x36c   :  { %4593 = vmatprep.subr.bf16.mxu0 %v7579_v52 }
 0x36d   :  { %4633 = vmatpush2.bf16.msra.mxu1 %v7714_v54 }
 0x36e   :  { %4634 = vmatprep.subr.bf16.mxu1 %v7707_v59 }
 0x36f   :  { %4594 = vmatpush2.bf16.msra.mxu0 %v7578_v26  ;;  %v7548_v26 = vcombine.low %v2026_v43, %v2030_v21  ;;  %v1994_v43 = vld [vmem:[#allocation12 + $0x98] sm:$0xff] }
 0x370   :  { %4595 = vmatprep.subr.bf16.mxu0 %v7571_v63  ;;  %v1998_v21 = vld [vmem:[#allocation12 + $0xb8] sm:$0xff] }
 0x371   :  { %4635 = vmatpush2.bf16.msra.mxu1 %v7706_v0  ;;  %v7516_v50 = vcombine.low %v1994_v43, %v1998_v21 }
 0x372   :  { %4636 = vmatprep.subr.bf16.mxu1 %v7699_v39  ;;  %v7794_v39 = vcombine.low %v2273_v30, %v2277_v57  ;;  %v2245_v30 = vld [vmem:[#allocation12 + $0x870] sm:$0xff]  ;;  %v7517_v57 = vcombine.high %v1994_v43, %v1998_v21 }
 0x373   :  { %4596 = vmatpush2.bf16.msra.mxu0 %v7570_v1  ;;  %v2010_v1 = vld [vmem:[#allocation12 + $0x118] sm:$0xff]  ;;  %v2329_v21 = vld [vmem:[#allocation12 + $0xb10] sm:$0xff] }
 0x374   :  { %4597 = vmatprep.subr.bf16.mxu0 %v7563_v4  ;;  %v7532_v15 = vcombine.low %v2010_v1, %v2014_v2 }
 0x375   :  { %4637 = vmatpush2.bf16.msra.mxu1 %v7698_v5  ;;  %v7787_v5 = vcombine.high %v2265_v32, %v2269_v62 }
 0x376   :  { %4638 = vmatprep.subr.bf16.mxu1 %v7691_v8 }
 0x377   :  { %4598 = vmatpush2.bf16.msra.mxu0 %v7562_v9  ;;  %v7533_v9 = vcombine.high %v2010_v1, %v2014_v2  ;;  %v2098_v1 = vld [vmem:[#allocation12 + $0x3d8] sm:$0xff] }
 0x378   :  { %4649 = vmatprep.subr.bf16.mxu0 %v7811_v12  ;;  %v2006_v12 = vld [vmem:[#allocation12 + $0xf8] sm:$0xff] }
 0x379   :  { %4639 = vmatpush2.bf16.msra.mxu1 %v7690_v14  ;;  %v2102_v2 = vld [vmem:[#allocation12 + $0x3f8] sm:$0xff] }
 0x37a   :  { %4600 = vmatmul.mubr.bf16.vlgmr.msra.gmra.mxu0 %v9458_v40  ;;  %v4355_v38 = vpop.f32.mrf.mxu0  ;;  %4690 = vmatprep.subr.bf16.mxu1 %v7557_v17  ;;  %v2253_v17 = vld [vmem:[#allocation12 + $0x8b0] sm:$0xff] }
 0x37b   :  { %v4356_v46 = vadd.f32 %v4355_v38, %v2364_v20  ;;  %4650 = vmatpush1.bf16.msra.mxu0 %v7810_v18  ;;  %4681 = vmatprep.mubr.bf16.mxu0 %v9498_v37  ;;  %v7525_v18 = vcombine.high %v2002_v11, %v2006_v12  ;;  %v7770_v38 = vcombine.low %v2249_v16, %v2253_v17 }
 0x37c   :  { %4641 = vmatmul.mubr.bf16.vlgmr.msra.gmra.mxu1 %v9468_v49  ;;  %v4357_v52 = vpop.f32.mrf.mxu0  ;;  %v4396_v54 = vpop.f32.mrf.mxu1  ;;  %4651 = vmatprep.subr.bf16.mxu0 %v7803_v24  ;;  %v7771_v24 = vcombine.high %v2249_v16, %v2253_v17  ;;  %v2082_v17 = vld [vmem:[#allocation12 + $0x358] sm:$0xff] }
 0x37d   :  { %v4358_v58 = vadd.f32 %v4357_v52, %v2368_v29  ;;  %v9522_v59 = vadd.f32 %v4396_v54, %v4356_v46  ;;  %4691 = vmatpush1.bf16.msra.mxu1 %v7556_v60  ;;  %4722 = vmatprep.mubr.bf16.mxu1 %v9450_v31  ;;  %v2257_v31 = vld [vmem:[#allocation12 + $0x8d0] sm:$0xff]  ;;  %v7524_v60 = vcombine.low %v2002_v11, %v2006_v12  ;;  %v1990_v46 = vld [vmem:[#allocation12 + $0x78] sm:$0xff] }
 0x37e   :  { %v4359_v63 = vpop.f32.mrf.mxu0  ;;  %v4398_v0 = vpop.f32.mrf.mxu1  ;;  %4692 = vmatprep.subr.bf16.mxu1 %v7549_v41  ;;  %v7779_v14 = vcombine.high %v2257_v31, %v2261_v7  ;;  %v7778_v20 = vcombine.low %v2257_v31, %v2261_v7  ;;  %v2241_v29 = vld [vmem:[#allocation12 + $0x850] sm:$0xff]  ;;  %v1986_v41 = vld [vmem:[#allocation12 + $0x58] sm:$0xff]  ;;  %v7621_v31 = vcombine.high %v2098_v1, %v2102_v2  ;;  %v7620_v11 = vcombine.low %v2098_v1, %v2102_v2 }
 0x37f   :  { %v9525_v36 = vadd.f32 %v4398_v0, %v4358_v58  ;;  %4652 = vmatpush1.bf16.msra.mxu0 %v7802_v47  ;;  %v7763_v47 = vcombine.high %v2241_v29, %v2245_v30  ;;  %v2237_v52 = vld [vmem:[#allocation12 + $0x830] sm:$0xff]  ;;  %v7509_v54 = vcombine.high %v1986_v41, %v1990_v46  ;;  %v1978_v58 = vld [vmem:[#allocation12 + $0x18] sm:$0xff]  ;;  %v7508_v62 = vcombine.low %v1986_v41, %v1990_v46 }
 0x380   :  { %v4360_v3 = vpop.f32.mrf.mxu0  ;;  %v4400_v4 = vpop.f32.mrf.mxu1  ;;  %4653 = vmatprep.subr.bf16.mxu0 %v7795_v56  ;;  %v7762_v56 = vcombine.low %v2241_v29, %v2245_v30  ;;  %v7755_v32 = vcombine.high %v2233_v51, %v2237_v52  ;;  %v2353_v63 = vld [vmem:[#allocation12 + $0xbd0] sm:$0xff]  ;;  %v2074_v30 = vld [vmem:[#allocation12 + $0x318] sm:$0xff] }
 0x381   :  { %4693 = vmatpush1.bf16.msra.mxu1 %v7548_v26  ;;  %v1982_v26 = vld [vmem:[#allocation12 + $0x38] sm:$0xff]  ;;  %v2357_v0 = vld [vmem:[#allocation12 + $0xbf0] sm:$0xff] }
 0x382   :  { %v4401_v8 = vpop.f32.mrf.mxu1  ;;  %4694 = vmatprep.subr.bf16.mxu1 %v7541_v34  ;;  %v7501_v34 = vcombine.high %v1978_v58, %v1982_v26  ;;  %v7875_v3 = vcombine.high %v2353_v63, %v2357_v0  ;;  %v7500_v4 = vcombine.low %v1978_v58, %v1982_v26  ;;  %v7874_v7 = vcombine.low %v2353_v63, %v2357_v0  ;;  %v2337_v12 = vld [vmem:[#allocation12 + $0xb50] sm:$0xff]  ;;  %v2058_v0 = vld [vmem:[#allocation12 + $0x298] sm:$0xff] }
 0x383   :  { %4654 = vmatpush1.bf16.msra.mxu0 %v7794_v39  ;;  %v7754_v39 = vcombine.low %v2233_v51, %v2237_v52  ;;  %v2090_v8 = vld [vmem:[#allocation12 + $0x398] sm:$0xff]  ;;  %v2321_v46 = vld [vmem:[#allocation12 + $0xad0] sm:$0xff] }
 0x384   :  { %4655 = vmatprep.subr.bf16.mxu0 %v7787_v5  ;;  %v2345_v5 = vld [vmem:[#allocation12 + $0xb90] sm:$0xff]  ;;  %v2066_v52 = vld [vmem:[#allocation12 + $0x2d8] sm:$0xff] }
 0x385   :  { %4695 = vmatpush1.bf16.msra.mxu1 %v7540_v6  ;;  %v2349_v6 = vld [vmem:[#allocation12 + $0xbb0] sm:$0xff] }
 0x386   :  { %4696 = vmatprep.subr.bf16.mxu1 %v7533_v9  ;;  %v2094_v9 = vld [vmem:[#allocation12 + $0x3b8] sm:$0xff]  ;;  %v7866_v16 = vcombine.low %v2345_v5, %v2349_v6  ;;  %v2313_v26 = vld [vmem:[#allocation12 + $0xa90] sm:$0xff] }
 0x387   :  { %4656 = vmatpush1.bf16.msra.mxu0 %v7786_v10  ;;  %v7867_v10 = vcombine.high %v2345_v5, %v2349_v6  ;;  %v7612_v43 = vcombine.low %v2090_v8, %v2094_v9  ;;  %v2305_v2 = vld [vmem:[#allocation12 + $0xa50] sm:$0xff]  ;;  %v2050_v6 = vld [vmem:[#allocation12 + $0x258] sm:$0xff] }
 0x388   :  { %4657 = vmatprep.subr.bf16.mxu0 %v7779_v14  ;;  %v2341_v14 = vld [vmem:[#allocation12 + $0xb70] sm:$0xff] }
 0x389   :  { %4697 = vmatpush1.bf16.msra.mxu1 %v7532_v15  ;;  %v7613_v15 = vcombine.high %v2090_v8, %v2094_v9  ;;  %v7858_v29 = vcombine.low %v2337_v12, %v2341_v14  ;;  %v2297_v9 = vld [vmem:[#allocation12 + $0xa10] sm:$0xff] }
 0x38a   :  { %4698 = vmatprep.subr.bf16.mxu1 %v7525_v18  ;;  %v2086_v18 = vld [vmem:[#allocation12 + $0x378] sm:$0xff] }
 0x38b   :  { %4658 = vmatpush1.bf16.msra.mxu0 %v7778_v20  ;;  %v7859_v20 = vcombine.high %v2337_v12, %v2341_v14  ;;  %v7604_v41 = vcombine.low %v2082_v17, %v2086_v18  ;;  %v2042_v14 = vld [vmem:[#allocation12 + $0x218] sm:$0xff] }
 0x38c   :  { %4659 = vmatprep.subr.bf16.mxu0 %v7771_v24  ;;  %v2333_v24 = vld [vmem:[#allocation12 + $0xb30] sm:$0xff] }
 0x38d   :  { %4699 = vmatpush1.bf16.msra.mxu1 %v7524_v60  ;;  %v7605_v60 = vcombine.high %v2082_v17, %v2086_v18  ;;  %v7850_v51 = vcombine.low %v2329_v21, %v2333_v24  ;;  %v2162_v18 = vld [vmem:[#allocation12 + $0x5d8] sm:$0xff] }
 0x38e   :  { %4700 = vmatprep.subr.bf16.mxu1 %v7517_v57  ;;  %v2078_v57 = vld [vmem:[#allocation12 + $0x338] sm:$0xff] }
 0x38f   :  { %4660 = vmatpush1.bf16.msra.mxu0 %v7770_v38  ;;  %v7851_v38 = vcombine.high %v2329_v21, %v2333_v24  ;;  %v7596_v58 = vcombine.low %v2074_v30, %v2078_v57  ;;  %v2290_v24 = vld [vmem:[#allocation12 + $0x9d8] sm:$0xff] }
 0x390   :  { %4661 = vmatprep.subr.bf16.mxu0 %v7763_v47  ;;  %v2325_v47 = vld [vmem:[#allocation12 + $0xaf0] sm:$0xff] }
 0x391   :  { %4701 = vmatpush1.bf16.msra.mxu1 %v7516_v50  ;;  %v7597_v50 = vcombine.high %v2074_v30, %v2078_v57  ;;  %v7842_v63 = vcombine.low %v2321_v46, %v2325_v47  ;;  %v2154_v57 = vld [vmem:[#allocation12 + $0x598] sm:$0xff] }
 0x392   :  { %4702 = vmatprep.subr.bf16.mxu1 %v7509_v54  ;;  %v2070_v54 = vld [vmem:[#allocation12 + $0x2f8] sm:$0xff] }
 0x393   :  { %4662 = vmatpush1.bf16.msra.mxu0 %v7762_v56  ;;  %v7843_v56 = vcombine.high %v2321_v46, %v2325_v47  ;;  %v7588_v1 = vcombine.low %v2066_v52, %v2070_v54  ;;  %v2282_v47 = vld [vmem:[#allocation12 + $0x998] sm:$0xff] }
 0x394   :  { %4663 = vmatprep.subr.bf16.mxu0 %v7755_v32  ;;  %v2317_v32 = vld [vmem:[#allocation12 + $0xab0] sm:$0xff] }
 0x395   :  { %4703 = vmatpush1.bf16.msra.mxu1 %v7508_v62  ;;  %v7589_v62 = vcombine.high %v2066_v52, %v2070_v54  ;;  %v7834_v5 = vcombine.low %v2313_v26, %v2317_v32  ;;  %v2146_v54 = vld [vmem:[#allocation12 + $0x558] sm:$0xff] }
 0x396   :  { %4704 = vmatprep.subr.bf16.mxu1 %v7501_v34  ;;  %v2062_v34 = vld [vmem:[#allocation12 + $0x2b8] sm:$0xff] }
 0x397   :  { %4664 = vmatpush1.bf16.msra.mxu0 %v7754_v39  ;;  %v7835_v39 = vcombine.high %v2313_v26, %v2317_v32  ;;  %v7580_v8 = vcombine.low %v2058_v0, %v2062_v34 }
 0x398   :  { %4665 = vmatprep.subr.bf16.mxu0 %v7875_v3  ;;  %v2309_v3 = vld [vmem:[#allocation12 + $0xa70] sm:$0xff] }
 0x399   :  { %4705 = vmatpush1.bf16.msra.mxu1 %v7500_v4  ;;  %v7581_v4 = vcombine.high %v2058_v0, %v2062_v34  ;;  %v7826_v12 = vcombine.low %v2305_v2, %v2309_v3  ;;  %v2278_v0 = vld [vmem:[#allocation12 + $0x978] sm:$0xff] }
 0x39a   :  { %4706 = vmatprep.subr.bf16.mxu1 %v7621_v31  ;;  %v2054_v31 = vld [vmem:[#allocation12 + $0x278] sm:$0xff] }
 0x39b   :  { %4666 = vmatpush2.bf16.msra.mxu0 %v7874_v7  ;;  %v7827_v7 = vcombine.high %v2305_v2, %v2309_v3  ;;  %v7572_v17 = vcombine.low %v2050_v6, %v2054_v31  ;;  %v2142_v3 = vld [vmem:[#allocation12 + $0x538] sm:$0xff] }
 0x39c   :  { %4667 = vmatprep.subr.bf16.mxu0 %v7867_v10  ;;  %v2301_v10 = vld [vmem:[#allocation12 + $0xa30] sm:$0xff] }
 0x39d   :  { %4707 = vmatpush2.bf16.msra.mxu1 %v7620_v11  ;;  %v7573_v11 = vcombine.high %v2050_v6, %v2054_v31  ;;  %v7818_v21 = vcombine.low %v2297_v9, %v2301_v10  ;;  %v2266_v31 = vld [vmem:[#allocation12 + $0x918] sm:$0xff] }
 0x39e   :  { %4708 = vmatprep.subr.bf16.mxu1 %v7613_v15  ;;  %v2046_v15 = vld [vmem:[#allocation12 + $0x238] sm:$0xff] }
 0x39f   :  { %4668 = vmatpush2.bf16.msra.mxu0 %v7866_v16  ;;  %v7819_v16 = vcombine.high %v2297_v9, %v2301_v10  ;;  %v7564_v30 = vcombine.low %v2042_v14, %v2046_v15 }
 0x3a0   :  { %4669 = vmatprep.subr.bf16.mxu0 %v7859_v20  ;;  %v2166_v20 = vld [vmem:[#allocation12 + $0x5f8] sm:$0xff] }
 0x3a1   :  { %4709 = vmatpush2.bf16.msra.mxu1 %v7612_v43  ;;  %v7565_v43 = vcombine.high %v2042_v14, %v2046_v15  ;;  %v7684_v46 = vcombine.low %v2162_v18, %v2166_v20 }
 0x3a2   :  { %4710 = vmatprep.subr.bf16.mxu1 %v7605_v60  ;;  %v2294_v60 = vld [vmem:[#allocation12 + $0x9f8] sm:$0xff] }
 0x3a3   :  { %4670 = vmatpush2.bf16.msra.mxu0 %v7858_v29  ;;  %v7685_v29 = vcombine.high %v2162_v18, %v2166_v20  ;;  %v7812_v52 = vcombine.low %v2290_v24, %v2294_v60 }
 0x3a4   :  { %4671 = vmatprep.subr.bf16.mxu0 %v7851_v38  ;;  %v2158_v38 = vld [vmem:[#allocation12 + $0x5b8] sm:$0xff] }
 0x3a5   :  { %4711 = vmatpush2.bf16.msra.mxu1 %v7604_v41  ;;  %v7813_v41 = vcombine.high %v2290_v24, %v2294_v60 }
 0x3a6   :  { %4712 = vmatprep.subr.bf16.mxu1 %v7597_v50  ;;  %v2286_v50 = vld [vmem:[#allocation12 + $0x9b8] sm:$0xff] }
 0x3a7   :  { %4672 = vmatpush2.bf16.msra.mxu0 %v7850_v51  ;;  %v7677_v51 = vcombine.high %v2154_v57, %v2158_v38  ;;  %v7805_v26 = vcombine.high %v2282_v47, %v2286_v50  ;;  %v7804_v2 = vcombine.low %v2282_v47, %v2286_v50 }
 0x3a8   :  { %4673 = vmatprep.subr.bf16.mxu0 %v7843_v56  ;;  %v2150_v56 = vld [vmem:[#allocation12 + $0x578] sm:$0xff] }
 0x3a9   :  { %4713 = vmatpush2.bf16.msra.mxu1 %v7596_v58  ;;  %v7668_v6 = vcombine.low %v2146_v54, %v2150_v56 }
 0x3aa   :  { %4714 = vmatprep.subr.bf16.mxu1 %v7589_v62  ;;  %v7676_v62 = vcombine.low %v2154_v57, %v2158_v38 }
 0x3ab   :  { %4674 = vmatpush2.bf16.msra.mxu0 %v7842_v63  ;;  %v2274_v63 = vld [vmem:[#allocation12 + $0x958] sm:$0xff] }
 0x3ac   :  { %4675 = vmatprep.subr.bf16.mxu0 %v7835_v39  ;;  %v7796_v10 = vcombine.low %v2274_v63, %v2278_v0 }
 0x3ad   :  { %4715 = vmatpush2.bf16.msra.mxu1 %v7588_v1  ;;  %v7669_v1 = vcombine.high %v2146_v54, %v2150_v56 }
 0x3ae   :  { %4716 = vmatprep.subr.bf16.mxu1 %v7581_v4 }
 0x3af   :  { %4676 = vmatpush2.bf16.msra.mxu0 %v7834_v5 }
 0x3b0   :  { %4677 = vmatprep.subr.bf16.mxu0 %v7827_v7  ;;  %v2270_v7 = vld [vmem:[#allocation12 + $0x938] sm:$0xff] }
 0x3b1   :  { %4717 = vmatpush2.bf16.msra.mxu1 %v7580_v8  ;;  %v7789_v14 = vcombine.high %v2266_v31, %v2270_v7  ;;  %v7788_v20 = vcombine.low %v2266_v31, %v2270_v7  ;;  %v2354_v31 = vld [vmem:[#allocation12 + $0xbd8] sm:$0xff] }
 0x3b2   :  { %4718 = vmatprep.subr.bf16.mxu1 %v7573_v11  ;;  %v2130_v11 = vld [vmem:[#allocation12 + $0x4d8] sm:$0xff] }
 0x3b3   :  { %4678 = vmatpush2.bf16.msra.mxu0 %v7826_v12  ;;  %v2358_v7 = vld [vmem:[#allocation12 + $0xbf8] sm:$0xff] }
 0x3b4   :  { %4679 = vmatprep.subr.bf16.mxu0 %v7819_v16  ;;  %v2258_v16 = vld [vmem:[#allocation12 + $0x8d8] sm:$0xff] }
 0x3b5   :  { %4719 = vmatpush2.bf16.msra.mxu1 %v7572_v17  ;;  %v2262_v17 = vld [vmem:[#allocation12 + $0x8f8] sm:$0xff] }
 0x3b6   :  { %4720 = vmatprep.subr.bf16.mxu1 %v7565_v43  ;;  %v2122_v43 = vld [vmem:[#allocation12 + $0x498] sm:$0xff]  ;;  %v7781_v24 = vcombine.high %v2258_v16, %v2262_v17  ;;  %v7780_v38 = vcombine.low %v2258_v16, %v2262_v17  ;;  %v7876_v17 = vcombine.low %v2354_v31, %v2358_v7 }
 0x3b7   :  { %4680 = vmatpush2.bf16.msra.mxu0 %v7818_v21  ;;  %v2126_v21 = vld [vmem:[#allocation12 + $0x4b8] sm:$0xff] }
 0x3b8   :  { %4731 = vmatprep.subr.bf16.mxu0 %v7685_v29  ;;  %v2250_v29 = vld [vmem:[#allocation12 + $0x898] sm:$0xff]  ;;  %v7645_v57 = vcombine.high %v2122_v43, %v2126_v21  ;;  %v7644_v50 = vcombine.low %v2122_v43, %v2126_v21 }
 0x3b9   :  { %4721 = vmatpush2.bf16.msra.mxu1 %v7564_v30  ;;  %v2254_v30 = vld [vmem:[#allocation12 + $0x8b8] sm:$0xff] }
 0x3ba   :  { %v4437_v58 = vpop.f32.mrf.mxu0  ;;  %4682 = vmatmul.mubr.bf16.vlgmr.msra.gmra.mxu0 %v9503_v53  ;;  %4772 = vmatprep.subr.bf16.mxu1 %v7813_v41  ;;  %v2114_v41 = vld [vmem:[#allocation12 + $0x458] sm:$0xff]  ;;  %v7773_v47 = vcombine.high %v2250_v29, %v2254_v30  ;;  %v7772_v56 = vcombine.low %v2250_v29, %v2254_v30 }
 0x3bb   :  { %v9529_v32 = vadd.f32 %v4437_v58, %v9522_v59  ;;  %4732 = vmatpush1.bf16.msra.mxu0 %v7684_v46  ;;  %4763 = vmatprep.mubr.bf16.mxu0 %v9463_v45  ;;  %v2138_v59 = vld [vmem:[#allocation12 + $0x518] sm:$0xff]  ;;  %v7797_v45 = vcombine.high %v2274_v63, %v2278_v0 }
 0x3bc   :  { %v9532_v34 = vpop.f32.mrf.mxu0  ;;  %v9534_v39 = vpop.f32.mrf.mxu1  ;;  %4723 = vmatmul.mubr.bf16.vlgmr.msra.gmra.mxu1 %v9458_v40  ;;  %4733 = vmatprep.subr.bf16.mxu0 %v7677_v51  ;;  %v7661_v40 = vcombine.high %v2138_v59, %v2142_v3  ;;  %v7660_v15 = vcombine.low %v2138_v59, %v2142_v3  ;;  %v2118_v46 = vld [vmem:[#allocation12 + $0x478] sm:$0xff] }
 0x3bd   :  { %4773 = vmatpush1.bf16.msra.mxu1 %v7812_v52  ;;  %4804 = vmatprep.mubr.bf16.mxu1 %v9498_v37  ;;  %v2134_v37 = vld [vmem:[#allocation12 + $0x4f8] sm:$0xff]  ;;  %v7637_v54 = vcombine.high %v2114_v41, %v2118_v46  ;;  %v7636_v63 = vcombine.low %v2114_v41, %v2118_v46  ;;  %v9542_v16 = vadd.f32 %v9532_v34, %v9525_v36 }
 0x3be   :  { %v4441_v4 = vpop.f32.mrf.mxu0  ;;  %v9538_v5 = vpop.f32.mrf.mxu1  ;;  %4774 = vmatprep.subr.bf16.mxu1 %v7805_v26  ;;  %v7653_v18 = vcombine.high %v2130_v11, %v2134_v37  ;;  %v7652_v60 = vcombine.low %v2130_v11, %v2134_v37  ;;  %v2242_v51 = vld [vmem:[#allocation12 + $0x858] sm:$0xff]  ;;  %v7877_v11 = vcombine.high %v2354_v31, %v2358_v7 }
 0x3bf   :  { %4734 = vmatpush1.bf16.msra.mxu0 %v7676_v62  ;;  %v2246_v52 = vld [vmem:[#allocation12 + $0x878] sm:$0xff]  ;;  %v4822_v30 = vmul.f32 0.70710677, %v9542_v16 }
 0x3c0   :  { %v4442_v8 = vpop.f32.mrf.mxu0  ;;  %v4482_v9 = vpop.f32.mrf.mxu1  ;;  %4735 = vmatprep.subr.bf16.mxu0 %v7669_v1  ;;  %v2106_v58 = vld [vmem:[#allocation12 + $0x418] sm:$0xff]  ;;  %v7765_v62 = vcombine.high %v2242_v51, %v2246_v52  ;;  %v7764_v59 = vcombine.low %v2242_v51, %v2246_v52 }
 0x3c1   :  { %4775 = vmatpush1.bf16.msra.mxu1 %v7804_v2  ;;  %v2110_v26 = vld [vmem:[#allocation12 + $0x438] sm:$0xff]  ;;  %9025 = verf.f32 %v4822_v30 }
 0x3c2   :  { %v4483_v12 = vpop.f32.mrf.mxu1  ;;  %4776 = vmatprep.subr.bf16.mxu1 %v7797_v45  ;;  %v2234_v0 = vld [vmem:[#allocation12 + $0x818] sm:$0xff]  ;;  %v7629_v2 = vcombine.high %v2106_v58, %v2110_v26 }
 0x3c3   :  { %4736 = vmatpush1.bf16.msra.mxu0 %v7668_v6  ;;  %v2238_v1 = vld [vmem:[#allocation12 + $0x838] sm:$0xff]  ;;  %v7628_v6 = vcombine.low %v2106_v58, %v2110_v26 }
 0x3c4   :  { %4737 = vmatprep.subr.bf16.mxu0 %v7661_v40  ;;  %v2226_v3 = vld [vmem:[#allocation12 + $0x7d8] sm:$0xff]  ;;  %v7757_v45 = vcombine.high %v2234_v0, %v2238_v1  ;;  %v7756_v9 = vcombine.low %v2234_v0, %v2238_v1 }
 0x3c5   :  { %4777 = vmatpush1.bf16.msra.mxu1 %v7796_v10  ;;  %v2230_v4 = vld [vmem:[#allocation12 + $0x7f8] sm:$0xff] }
 0x3c6   :  { %4778 = vmatprep.subr.bf16.mxu1 %v7789_v14  ;;  %v7749_v8 = vcombine.high %v2226_v3, %v2230_v4  ;;  %v2218_v40 = vld [vmem:[#allocation12 + $0x798] sm:$0xff]  ;;  %v7748_v37 = vcombine.low %v2226_v3, %v2230_v4 }
 0x3c7   :  { %4738 = vmatpush1.bf16.msra.mxu0 %v7660_v15  ;;  %v2222_v10 = vld [vmem:[#allocation12 + $0x7b8] sm:$0xff] }
 0x3c8   :  { %4739 = vmatprep.subr.bf16.mxu0 %v7653_v18  ;;  %v2346_v12 = vld [vmem:[#allocation12 + $0xb98] sm:$0xff]  ;;  %v7741_v15 = vcombine.high %v2218_v40, %v2222_v10  ;;  %v7740_v21 = vcombine.low %v2218_v40, %v2222_v10 }
 0x3c9   :  { %4779 = vmatpush1.bf16.msra.mxu1 %v7788_v20  ;;  %v2350_v14 = vld [vmem:[#allocation12 + $0xbb8] sm:$0xff] }
 0x3ca   :  { %4780 = vmatprep.subr.bf16.mxu1 %v7781_v24  ;;  %v2210_v18 = vld [vmem:[#allocation12 + $0x758] sm:$0xff]  ;;  %v7869_v43 = vcombine.high %v2346_v12, %v2350_v14 }
 0x3cb   :  { %4740 = vmatpush1.bf16.msra.mxu0 %v7652_v60  ;;  %v2214_v20 = vld [vmem:[#allocation12 + $0x778] sm:$0xff] }
 0x3cc   :  { %4741 = vmatprep.subr.bf16.mxu0 %v7645_v57  ;;  %v2338_v24 = vld [vmem:[#allocation12 + $0xb58] sm:$0xff]  ;;  %v7733_v29 = vcombine.high %v2210_v18, %v2214_v20  ;;  %v7868_v57 = vcombine.low %v2346_v12, %v2350_v14  ;;  %v7732_v34 = vcombine.low %v2210_v18, %v2214_v20 }
 0x3cd   :  { %4781 = vmatpush1.bf16.msra.mxu1 %v7780_v38  ;;  %v2342_v60 = vld [vmem:[#allocation12 + $0xb78] sm:$0xff] }
 0x3ce   :  { %4782 = vmatprep.subr.bf16.mxu1 %v7773_v47  ;;  %v2202_v38 = vld [vmem:[#allocation12 + $0x718] sm:$0xff]  ;;  %v7861_v36 = vcombine.high %v2338_v24, %v2342_v60  ;;  %v7860_v51 = vcombine.low %v2338_v24, %v2342_v60 }
 0x3cf   :  { %4742 = vmatpush1.bf16.msra.mxu0 %v7644_v50  ;;  %v2206_v41 = vld [vmem:[#allocation12 + $0x738] sm:$0xff] }
 0x3d0   :  { %4743 = vmatprep.subr.bf16.mxu0 %v7637_v54  ;;  %v2330_v46 = vld [vmem:[#allocation12 + $0xb18] sm:$0xff]  ;;  %v7725_v50 = vcombine.high %v2202_v38, %v2206_v41  ;;  %v7724_v58 = vcombine.low %v2202_v38, %v2206_v41 }
 0x3d1   :  { %4783 = vmatpush1.bf16.msra.mxu1 %v7772_v56  ;;  %v2334_v47 = vld [vmem:[#allocation12 + $0xb38] sm:$0xff] }
 0x3d2   :  { %4784 = vmatprep.subr.bf16.mxu1 %v7765_v62  ;;  %v2194_v52 = vld [vmem:[#allocation12 + $0x6d8] sm:$0xff]  ;;  %v7853_v56 = vcombine.high %v2330_v46, %v2334_v47  ;;  %v7852_v0 = vcombine.low %v2330_v46, %v2334_v47  ;;  %v2376_v47 = vrot.slane %v9513_v13, %v9425_v44 }
 0x3d3   :  { %4744 = vmatpush1.bf16.msra.mxu0 %v7636_v63  ;;  %v2198_v54 = vld [vmem:[#allocation12 + $0x6f8] sm:$0xff] }
 0x3d4   :  { %4745 = vmatprep.subr.bf16.mxu0 %v7629_v2  ;;  %v2322_v26 = vld [vmem:[#allocation12 + $0xad8] sm:$0xff]  ;;  %v7717_v63 = vcombine.high %v2194_v52, %v2198_v54  ;;  %v7716_v3 = vcombine.low %v2194_v52, %v2198_v54 }
 0x3d5   :  { %4785 = vmatpush1.bf16.msra.mxu1 %v7764_v59  ;;  %v2326_v62 = vld [vmem:[#allocation12 + $0xaf8] sm:$0xff] }
 0x3d6   :  { %4786 = vmatprep.subr.bf16.mxu1 %v7757_v45  ;;  %v2186_v1 = vld [vmem:[#allocation12 + $0x698] sm:$0xff]  ;;  %v7845_v59 = vcombine.high %v2322_v26, %v2326_v62  ;;  %v7844_v31 = vcombine.low %v2322_v26, %v2326_v62 }
 0x3d7   :  { %4746 = vmatpush1.bf16.msra.mxu0 %v7628_v6  ;;  %v2190_v2 = vld [vmem:[#allocation12 + $0x6b8] sm:$0xff] }
 0x3d8   :  { %4747 = vmatprep.subr.bf16.mxu0 %v7749_v8  ;;  %v2314_v4 = vld [vmem:[#allocation12 + $0xa98] sm:$0xff]  ;;  %v7709_v6 = vcombine.high %v2186_v1, %v2190_v2  ;;  %v7708_v40 = vcombine.low %v2186_v1, %v2190_v2 }
 0x3d9   :  { %4787 = vmatpush1.bf16.msra.mxu1 %v7756_v9  ;;  %v2318_v45 = vld [vmem:[#allocation12 + $0xab8] sm:$0xff] }
 0x3da   :  { %4788 = vmatprep.subr.bf16.mxu1 %v7877_v11  ;;  %v2178_v7 = vld [vmem:[#allocation12 + $0x658] sm:$0xff]  ;;  %v7837_v9 = vcombine.high %v2314_v4, %v2318_v45  ;;  %v7836_v12 = vcombine.low %v2314_v4, %v2318_v45 }
 0x3db   :  { %4748 = vmatpush2.bf16.msra.mxu0 %v7748_v37  ;;  %v2182_v8 = vld [vmem:[#allocation12 + $0x678] sm:$0xff] }
 0x3dc   :  { %4749 = vmatprep.subr.bf16.mxu0 %v7741_v15  ;;  %v2306_v10 = vld [vmem:[#allocation12 + $0xa58] sm:$0xff]  ;;  %v7701_v37 = vcombine.high %v2178_v7, %v2182_v8  ;;  %v7700_v20 = vcombine.low %v2178_v7, %v2182_v8 }
 0x3dd   :  { %4789 = vmatpush2.bf16.msra.mxu1 %v7876_v17  ;;  %v2310_v11 = vld [vmem:[#allocation12 + $0xa78] sm:$0xff]  ;;  %v9026_v17 = vpop.eup %9025 }
 0x3de   :  { %4790 = vmatprep.subr.bf16.mxu1 %v7869_v43  ;;  %v2170_v14 = vld [vmem:[#allocation12 + $0x618] sm:$0xff]  ;;  %v7829_v18 = vcombine.high %v2306_v10, %v2310_v11  ;;  %v7828_v60 = vcombine.low %v2306_v10, %v2310_v11 }
 0x3df   :  { %4750 = vmatpush2.bf16.msra.mxu0 %v7740_v21  ;;  %v2174_v15 = vld [vmem:[#allocation12 + $0x638] sm:$0xff] }
 0x3e0   :  { %4751 = vmatprep.subr.bf16.mxu0 %v7733_v29  ;;  %v2298_v43 = vld [vmem:[#allocation12 + $0xa18] sm:$0xff]  ;;  %v7693_v24 = vcombine.high %v2170_v14, %v2174_v15  ;;  %v4838_v29 = vadd.f32 1.0, %v9026_v17  ;;  %v7692_v38 = vcombine.low %v2170_v14, %v2174_v15 }
 0x3e1   :  { %4791 = vmatpush2.bf16.msra.mxu1 %v7868_v57  ;;  %v2302_v21 = vld [vmem:[#allocation12 + $0xa38] sm:$0xff]  ;;  %v4814_v57 = vmul.f32 0.5, %v9542_v16 }
 0x3e2   :  { %4792 = vmatprep.subr.bf16.mxu1 %v7861_v36  ;;  %v7821_v30 = vcombine.high %v2298_v43, %v2302_v21  ;;  %v8619_v41 = vld [vmem:[#allocation15 + $0xe4] ss:$16 sps:$4 sm:$0xff]   ;;  %v7820_v36 = vcombine.low %v2298_v43, %v2302_v21  ;;  %v8620_v16 = vld [vmem:[#allocation15 + $0x2e0] ss:$16 sps:$4 sm:$0xff]  }
 0x3e3   :  { %4752 = vmatpush2.bf16.msra.mxu0 %v7732_v34  ;;  %v4846_v34 = vmul.f32 %v4838_v29, %v4814_v57  ;;  %v8622_v46 = vld [vmem:[#allocation15 + $0x2e4] ss:$16 sps:$4 sm:$0xff]   ;;  %v8623_v26 = vld [vmem:[#allocation15 + $0xc0] ss:$16 sps:$4 sm:$0xff]   ;;  %v2372_v29 = vrot.slane %v9513_v13, %v9420_v42 }
 0x3e4   :  { %4753 = vmatprep.subr.bf16.mxu0 %v7725_v50  ;;  %v8617_v50 = vld [vmem:[#allocation15 + $0xe0] ss:$16 sps:$4 sm:$0xff]   ;;  %v8643_v10 = vld [vmem:[#allocation15 + $0x64] ss:$16 sps:$4 sm:$0xff]  }
 0x3e5   :  { %4793 = vmatpush2.bf16.msra.mxu1 %v7860_v51  ;;  %v8625_v51 = vld [vmem:[#allocation15 + $0xc4] ss:$16 sps:$4 sm:$0xff]   ;;  %v9548_v52 = vpack.c.bf16 %v4846_v34, %v4846_v34  ;;  %v8626_v2 = vld [vmem:[#allocation15 + $0x2c0] ss:$16 sps:$4 sm:$0xff]  }
 0x3e6   :  { %4794 = vmatprep.subr.bf16.mxu1 %v7853_v56  ;;  %v8628_v56 = vld [vmem:[#allocation15 + $0x2c4] ss:$16 sps:$4 sm:$0xff]   ;;  %v8632_v8 = vld [vmem:[#allocation15 + $0x2a0] ss:$16 sps:$4 sm:$0xff]  }
 0x3e7   :  { %4754 = vmatpush2.bf16.msra.mxu0 %v7724_v58  ;;  %v4481_v58 = vadd.f32 %v9538_v5, %v2376_v47  ;;  %v8629_v5 = vld [vmem:[#allocation15 + $0xa0] ss:$16 sps:$4 sm:$0xff]   ;;  %v8649_v14 = vld [vmem:[#allocation15 + $0x44] ss:$16 sps:$4 sm:$0xff]   ;;  %v4479_v47 = vadd.f32 %v9534_v39, %v2372_v29 }
 0x3e8   :  { %4755 = vmatprep.subr.bf16.mxu0 %v7717_v63  ;;  %v8638_v11 = vld [vmem:[#allocation15 + $0x280] ss:$16 sps:$4 sm:$0xff]   ;;  %v8652_v17 = vld [vmem:[#allocation15 + $0x244] ss:$16 sps:$4 sm:$0xff]  }
 0x3e9   :  { %4795 = vmatpush2.bf16.msra.mxu1 %v7852_v0  ;;  %v8631_v0 = vld [vmem:[#allocation15 + $0xa4] ss:$16 sps:$4 sm:$0xff]   ;;  %v8644_v15 = vld [vmem:[#allocation15 + $0x260] ss:$16 sps:$4 sm:$0xff]  }
 0x3ea   :  { %4796 = vmatprep.subr.bf16.mxu1 %v7845_v59  ;;  %v8650_v43 = vld [vmem:[#allocation15 + $0x240] ss:$16 sps:$4 sm:$0xff]   ;;  %v8658_v21 = vld [vmem:[#allocation15 + $0x224] ss:$16 sps:$4 sm:$0xff]  }
 0x3eb   :  { %4756 = vmatpush2.bf16.msra.mxu0 %v7716_v3  ;;  %v8634_v3 = vld [vmem:[#allocation15 + $0x2a4] ss:$16 sps:$4 sm:$0xff]   ;;  %v8659_v34 = vld [vmem:[#allocation15] ss:$16 sps:$4 sm:$0xff]  }
 0x3ec   :  { %4757 = vmatprep.subr.bf16.mxu0 %v7709_v6  ;;  %v8712_v29 = vld [vmem:[#allocation15 + $0x304] ss:$16 sps:$4 sm:$0xff]  }
 0x3ed   :  { %4797 = vmatpush2.bf16.msra.mxu1 %v7844_v31  ;;  %v8637_v31 = vld [vmem:[#allocation15 + $0x84] ss:$16 sps:$4 sm:$0xff]  }
 0x3ee   :  { %4798 = vmatprep.subr.bf16.mxu1 %v7837_v9  ;;  %v8640_v9 = vld [vmem:[#allocation15 + $0x284] ss:$16 sps:$4 sm:$0xff]  }
 0x3ef   :  { %4758 = vmatpush2.bf16.msra.mxu0 %v7708_v40  ;;  %v8635_v40 = vld [vmem:[#allocation15 + $0x80] ss:$16 sps:$4 sm:$0xff]  }
 0x3f0   :  { %4759 = vmatprep.subr.bf16.mxu0 %v7701_v37  ;;  %v8646_v37 = vld [vmem:[#allocation15 + $0x264] ss:$16 sps:$4 sm:$0xff]  }
 0x3f1   :  { %4799 = vmatpush2.bf16.msra.mxu1 %v7836_v12  ;;  %v8641_v12 = vld [vmem:[#allocation15 + $0x60] ss:$16 sps:$4 sm:$0xff]  }
 0x3f2   :  { %4800 = vmatprep.subr.bf16.mxu1 %v7829_v18  ;;  %v8647_v18 = vld [vmem:[#allocation15 + $0x40] ss:$16 sps:$4 sm:$0xff]  }
 0x3f3   :  { %4760 = vmatpush2.bf16.msra.mxu0 %v7700_v20  ;;  %v8655_v20 = vld [vmem:[#allocation15 + $0x24] ss:$16 sps:$4 sm:$0xff]  }
 0x3f4   :  { %4761 = vmatprep.subr.bf16.mxu0 %v7693_v24  ;;  %v8653_v24 = vld [vmem:[#allocation15 + $0x20] ss:$16 sps:$4 sm:$0xff]  }
 0x3f5   :  { %4801 = vmatpush2.bf16.msra.mxu1 %v7828_v60 }
 0x3f6   :  { %4802 = vmatprep.subr.bf16.mxu1 %v7821_v30  ;;  %v8661_v30 = vld [vmem:[#allocation15 + $0x4] ss:$16 sps:$4 sm:$0xff]  }
 0x3f7   :  { %4762 = vmatpush2.bf16.msra.mxu0 %v7692_v38  ;;  %v8656_v38 = vld [vmem:[#allocation15 + $0x220] ss:$16 sps:$4 sm:$0xff]  }
 0x3f8   :  { %6419 = vmatprep.subr.bf16.mxu0 %v8619_v41 }
 0x3f9   :  { %4803 = vmatpush2.bf16.msra.mxu1 %v7820_v36  ;;  %v8664_v36 = vld [vmem:[#allocation15 + $0x204] ss:$16 sps:$4 sm:$0xff]  }
 0x3fa   :  { %v9550_v54 = vpop.f32.mrf.mxu0  ;;  %4764 = vmatmul.mubr.bf16.vlgmr.msra.gmra.mxu0 %v9468_v49  ;;  %6460 = vmatprep.subr.bf16.mxu1 %v8622_v46 }
 0x3fb   :  { %6420 = vmatpush1.bf16.msra.mxu0 %v8617_v50  ;;  %6451 = vmatprep.mubr.bf16.mxu0 %v9548_v52  ;;  %v8667_v50 = vld [vmem:[#allocation15 + $0x1e4] ss:$16 sps:$4 sm:$0xff]   ;;  %v4520_v13 = vadd.f32 %v9550_v54, %v4479_v47  ;;  %v8713_v47 = vld [vmem:[#allocation15 + $0x4e0] ss:$16 sps:$4 sm:$0xff]  }
 0x3fc   :  { %v4521_v62 = vpop.f32.mrf.mxu0  ;;  %v9555_v63 = vpop.f32.mrf.mxu1  ;;  %4805 = vmatmul.mubr.bf16.vlgmr.msra.gmra.mxu1 %v9503_v53  ;;  %6421 = vmatprep.subr.bf16.mxu0 %v8625_v51  ;;  %v8679_v54 = vld [vmem:[#allocation15 + $0x1a4] ss:$16 sps:$4 sm:$0xff]  }
 0x3fd   :  { %v4522_v1 = vadd.f32 %v4521_v62, %v4481_v58  ;;  %6461 = vmatpush1.bf16.msra.mxu1 %v8620_v16  ;;  %v8662_v16 = vld [vmem:[#allocation15 + $0x200] ss:$16 sps:$4 sm:$0xff]   ;;  %v9566_v39 = vadd.f32 %v9555_v63, %v4520_v13  ;;  %v8685_v63 = vld [vmem:[#allocation15 + $0x184] ss:$16 sps:$4 sm:$0xff]  }
 0x3fe   :  { %v4523_v59 = vpop.f32.mrf.mxu0  ;;  %v4562_v49 = vpop.f32.mrf.mxu1  ;;  %6462 = vmatprep.subr.bf16.mxu1 %v8628_v56  ;;  %v8670_v56 = vld [vmem:[#allocation15 + $0x3e4] ss:$16 sps:$4 sm:$0xff]   ;;  %v8665_v58 = vld [vmem:[#allocation15 + $0x1e0] ss:$16 sps:$4 sm:$0xff]  }
 0x3ff   :  { %v4563_v4 = vadd.f32 %v4562_v49, %v4522_v1  ;;  %6422 = vmatpush1.bf16.msra.mxu0 %v8623_v26  ;;  %v8673_v26 = vld [vmem:[#allocation15 + $0x1c4] ss:$16 sps:$4 sm:$0xff]   ;;  %v8668_v62 = vld [vmem:[#allocation15 + $0x3e0] ss:$16 sps:$4 sm:$0xff]   ;;  %v4823_v49 = vmul.f32 0.70710677, %v9566_v39 }
 0x400   :  { %v4524_v45 = vpop.f32.mrf.mxu0  ;;  %v4564_v6 = vpop.f32.mrf.mxu1  ;;  %6423 = vmatprep.subr.bf16.mxu0 %v8631_v0  ;;  %v8676_v0 = vld [vmem:[#allocation15 + $0x3c4] ss:$16 sps:$4 sm:$0xff]   ;;  %v8671_v1 = vld [vmem:[#allocation15 + $0x1c0] ss:$16 sps:$4 sm:$0xff]  }
 0x401   :  { %v4824_v7 = vmul.f32 0.70710677, %v4563_v4  ;;  %6463 = vmatpush1.bf16.msra.mxu1 %v8626_v2  ;;  %v4816_v57 = vmul.f32 0.5, %v4563_v4  ;;  %v4821_v2 = vmul.f32 0.70710677, %v9529_v32 }
 0x402   :  { %v4565_v53 = vpop.f32.mrf.mxu1  ;;  %6464 = vmatprep.subr.bf16.mxu1 %v8634_v3  ;;  %v8674_v59 = vld [vmem:[#allocation15 + $0x3c0] ss:$16 sps:$4 sm:$0xff]   ;;  %v8682_v3 = vld [vmem:[#allocation15 + $0x3a4] ss:$16 sps:$4 sm:$0xff]  }
 0x403   :  { %9027 = verf.f32 %v4824_v7  ;;  %6424 = vmatpush1.bf16.msra.mxu0 %v8629_v5  ;;  %v8677_v4 = vld [vmem:[#allocation15 + $0x1a0] ss:$16 sps:$4 sm:$0xff]   ;;  %v8688_v45 = vld [vmem:[#allocation15 + $0x384] ss:$16 sps:$4 sm:$0xff]  }
 0x404   :  { %6425 = vmatprep.subr.bf16.mxu0 %v8637_v31  ;;  %9029 = verf.f32 %v4821_v2  ;;  %v8680_v5 = vld [vmem:[#allocation15 + $0x3a0] ss:$16 sps:$4 sm:$0xff]   ;;  %v8691_v31 = vld [vmem:[#allocation15 + $0x164] ss:$16 sps:$4 sm:$0xff]  }
 0x405   :  { %6465 = vmatpush1.bf16.msra.mxu1 %v8632_v8  ;;  %9031 = verf.f32 %v4823_v49  ;;  %v8683_v6 = vld [vmem:[#allocation15 + $0x180] ss:$16 sps:$4 sm:$0xff]   ;;  %v8694_v8 = vld [vmem:[#allocation15 + $0x364] ss:$16 sps:$4 sm:$0xff]  }
 0x406   :  { %6466 = vmatprep.subr.bf16.mxu1 %v8640_v9  ;;  %v8686_v7 = vld [vmem:[#allocation15 + $0x380] ss:$16 sps:$4 sm:$0xff]   ;;  %v8697_v9 = vld [vmem:[#allocation15 + $0x144] ss:$16 sps:$4 sm:$0xff]  }
 0x407   :  { %6426 = vmatpush1.bf16.msra.mxu0 %v8635_v40  ;;  %v8689_v53 = vld [vmem:[#allocation15 + $0x160] ss:$16 sps:$4 sm:$0xff]  }
 0x408   :  { %6427 = vmatprep.subr.bf16.mxu0 %v8643_v10  ;;  %v8692_v40 = vld [vmem:[#allocation15 + $0x360] ss:$16 sps:$4 sm:$0xff]   ;;  %v8700_v10 = vld [vmem:[#allocation15 + $0x344] ss:$16 sps:$4 sm:$0xff]  }
 0x409   :  { %6467 = vmatpush1.bf16.msra.mxu1 %v8638_v11  ;;  %v8695_v11 = vld [vmem:[#allocation15 + $0x140] ss:$16 sps:$4 sm:$0xff]  }
 0x40a   :  { %6468 = vmatprep.subr.bf16.mxu1 %v8646_v37  ;;  %v8703_v37 = vld [vmem:[#allocation15 + $0x124] ss:$16 sps:$4 sm:$0xff]   ;;  %v8719_v49 = vld [vmem:[#allocation15 + $0x4a0] ss:$16 sps:$4 sm:$0xff]  }
 0x40b   :  { %6428 = vmatpush1.bf16.msra.mxu0 %v8641_v12 }
 0x40c   :  { %6429 = vmatprep.subr.bf16.mxu0 %v8649_v14  ;;  %v8698_v14 = vld [vmem:[#allocation15 + $0x340] ss:$16 sps:$4 sm:$0xff]  }
 0x40d   :  { %6469 = vmatpush1.bf16.msra.mxu1 %v8644_v15  ;;  %v8706_v15 = vld [vmem:[#allocation15 + $0x324] ss:$16 sps:$4 sm:$0xff]  }
 0x40e   :  { %6470 = vmatprep.subr.bf16.mxu1 %v8652_v17 }
 0x40f   :  { %6430 = vmatpush1.bf16.msra.mxu0 %v8647_v18  ;;  %v8701_v18 = vld [vmem:[#allocation15 + $0x120] ss:$16 sps:$4 sm:$0xff]  }
 0x410   :  { %v9028_v60 = vpop.eup %9027  ;;  %6431 = vmatprep.subr.bf16.mxu0 %v8655_v20 }
 0x411   :  { %6471 = vmatpush1.bf16.msra.mxu1 %v8650_v43  ;;  %v4840_v41 = vadd.f32 1.0, %v9028_v60  ;;  %v9030_v12 = vpop.eup %9029  ;;  %v8709_v43 = vld [vmem:[#allocation15 + $0x104] ss:$16 sps:$4 sm:$0xff]  }
 0x412   :  { %6472 = vmatprep.subr.bf16.mxu1 %v8658_v21  ;;  %v9032_v17 = vpop.eup %9031  ;;  %v4837_v20 = vadd.f32 1.0, %v9030_v12  ;;  %v8704_v21 = vld [vmem:[#allocation15 + $0x320] ss:$16 sps:$4 sm:$0xff]   ;;  %v8733_v12 = vld [vmem:[#allocation15 + $0x424] ss:$16 sps:$4 sm:$0xff]  }
 0x413   :  { %6432 = vmatpush1.bf16.msra.mxu0 %v8653_v24  ;;  %v4848_v46 = vmul.f32 %v4840_v41, %v4816_v57  ;;  %v4813_v24 = vmul.f32 0.5, %v9529_v32  ;;  %v4839_v60 = vadd.f32 1.0, %v9032_v17  ;;  %v8715_v41 = vld [vmem:[#allocation15 + $0x4e4] ss:$16 sps:$4 sm:$0xff]   ;;  %v8731_v17 = vld [vmem:[#allocation15 + $0x420] ss:$16 sps:$4 sm:$0xff]  }
 0x414   :  { %6433 = vmatprep.subr.bf16.mxu0 %v8661_v30  ;;  %v8707_v30 = vld [vmem:[#allocation15 + $0x100] ss:$16 sps:$4 sm:$0xff]   ;;  %v8718_v32 = vld [vmem:[#allocation15 + $0x4c4] ss:$16 sps:$4 sm:$0xff]  }
 0x415   :  { %6473 = vmatpush1.bf16.msra.mxu1 %v8656_v38  ;;  %v9561_v51 = vpack.c.bf16 %v4848_v46, %v4848_v46  ;;  %v4845_v57 = vmul.f32 %v4837_v20, %v4813_v24  ;;  %v4815_v38 = vmul.f32 0.5, %v9566_v39  ;;  %v8766_v46 = vld [vmem:[#allocation15 + $0x6e4] ss:$16 sps:$4 sm:$0xff]   ;;  %v8800_v20 = vld [vmem:[#allocation15 + $0x620] ss:$16 sps:$4 sm:$0xff]  }
 0x416   :  { %6474 = vmatprep.subr.bf16.mxu1 %v8664_v36  ;;  %v8710_v36 = vld [vmem:[#allocation15 + $0x300] ss:$16 sps:$4 sm:$0xff]   ;;  %v8739_v24 = vld [vmem:[#allocation15 + $0x5e4] ss:$16 sps:$4 sm:$0xff]  }
 0x417   :  { %6434 = vmatpush1.bf16.msra.mxu0 %v8659_v34  ;;  %6492 = vmatprep.mubr.bf16.mxu1 %v9561_v51  ;;  %v4847_v34 = vmul.f32 %v4839_v60, %v4815_v38  ;;  %v8806_v60 = vld [vmem:[#allocation15 + $0x600] ss:$16 sps:$4 sm:$0xff]  }
 0x418   :  { %6435 = vmatprep.subr.bf16.mxu0 %v8667_v50  ;;  %v9572_v50 = vpack.c.bf16 %v4845_v57, %v4845_v57  ;;  %v8742_v57 = vld [vmem:[#allocation15 + $0x5c4] ss:$16 sps:$4 sm:$0xff]   ;;  %v8812_v38 = vld [vmem:[#allocation15 + $0x7e0] ss:$16 sps:$4 sm:$0xff]  }
 0x419   :  { %6475 = vmatpush1.bf16.msra.mxu1 %v8662_v16  ;;  %v8764_v16 = vld [vmem:[#allocation15 + $0x6e0] ss:$16 sps:$4 sm:$0xff]   ;;  %v9574_v13 = vpack.c.bf16 %v4847_v34, %v4847_v34  ;;  %v8745_v34 = vld [vmem:[#allocation15 + $0x5a4] ss:$16 sps:$4 sm:$0xff]  }
 0x41a   :  { %6476 = vmatprep.subr.bf16.mxu1 %v8670_v56 }
 0x41b   :  { %6436 = vmatpush2.bf16.msra.mxu0 %v8665_v58  ;;  %v8772_v58 = vld [vmem:[#allocation15 + $0x6c4] ss:$16 sps:$4 sm:$0xff]  }
 0x41c   :  { %6437 = vmatprep.subr.bf16.mxu0 %v8673_v26  ;;  %v8716_v26 = vld [vmem:[#allocation15 + $0x4c0] ss:$16 sps:$4 sm:$0xff]  }
 0x41d   :  { %6477 = vmatpush2.bf16.msra.mxu1 %v8668_v62 }
 0x41e   :  { %6478 = vmatprep.subr.bf16.mxu1 %v8676_v0  ;;  %v8721_v0 = vld [vmem:[#allocation15 + $0x4a4] ss:$16 sps:$4 sm:$0xff]  }
 0x41f   :  { %6438 = vmatpush2.bf16.msra.mxu0 %v8671_v1  ;;  %v8770_v1 = vld [vmem:[#allocation15 + $0x6c0] ss:$16 sps:$4 sm:$0xff]  }
 0x420   :  { %6439 = vmatprep.subr.bf16.mxu0 %v8679_v54 }
 0x421   :  { %6479 = vmatpush2.bf16.msra.mxu1 %v8674_v59  ;;  %v8778_v59 = vld [vmem:[#allocation15 + $0x6a4] ss:$16 sps:$4 sm:$0xff]  }
 0x422   :  { %6480 = vmatprep.subr.bf16.mxu1 %v8682_v3 }
 0x423   :  { %6440 = vmatpush2.bf16.msra.mxu0 %v8677_v4 }
 0x424   :  { %6441 = vmatprep.subr.bf16.mxu0 %v8685_v63  ;;  %v8724_v63 = vld [vmem:[#allocation15 + $0x484] ss:$16 sps:$4 sm:$0xff]  }
 0x425   :  { %6481 = vmatpush2.bf16.msra.mxu1 %v8680_v5  ;;  %v8776_v5 = vld [vmem:[#allocation15 + $0x6a0] ss:$16 sps:$4 sm:$0xff]  }
 0x426   :  { %6482 = vmatprep.subr.bf16.mxu1 %v8688_v45 }
 0x427   :  { %6442 = vmatpush2.bf16.msra.mxu0 %v8683_v6  ;;  %v8784_v6 = vld [vmem:[#allocation15 + $0x684] ss:$16 sps:$4 sm:$0xff]  }
 0x428   :  { %6443 = vmatprep.subr.bf16.mxu0 %v8691_v31  ;;  %v8722_v31 = vld [vmem:[#allocation15 + $0x480] ss:$16 sps:$4 sm:$0xff]  }
 0x429   :  { %6483 = vmatpush2.bf16.msra.mxu1 %v8686_v7  ;;  %v8727_v7 = vld [vmem:[#allocation15 + $0x464] ss:$16 sps:$4 sm:$0xff]  }
 0x42a   :  { %6484 = vmatprep.subr.bf16.mxu1 %v8694_v8  ;;  %v8782_v8 = vld [vmem:[#allocation15 + $0x680] ss:$16 sps:$4 sm:$0xff]  }
 0x42b   :  { %6444 = vmatpush2.bf16.msra.mxu0 %v8689_v53  ;;  %v8790_v53 = vld [vmem:[#allocation15 + $0x664] ss:$16 sps:$4 sm:$0xff]  }
 0x42c   :  { %6445 = vmatprep.subr.bf16.mxu0 %v8697_v9  ;;  %v8725_v9 = vld [vmem:[#allocation15 + $0x460] ss:$16 sps:$4 sm:$0xff]  }
 0x42d   :  { %6485 = vmatpush2.bf16.msra.mxu1 %v8692_v40  ;;  %v8730_v40 = vld [vmem:[#allocation15 + $0x444] ss:$16 sps:$4 sm:$0xff]  }
 0x42e   :  { %6486 = vmatprep.subr.bf16.mxu1 %v8700_v10  ;;  %v8788_v10 = vld [vmem:[#allocation15 + $0x660] ss:$16 sps:$4 sm:$0xff]  }
 0x42f   :  { %6446 = vmatpush2.bf16.msra.mxu0 %v8695_v11  ;;  %v8796_v11 = vld [vmem:[#allocation15 + $0x644] ss:$16 sps:$4 sm:$0xff]  }
 0x430   :  { %6447 = vmatprep.subr.bf16.mxu0 %v8703_v37  ;;  %v8728_v37 = vld [vmem:[#allocation15 + $0x440] ss:$16 sps:$4 sm:$0xff]  }
 0x431   :  { %6487 = vmatpush2.bf16.msra.mxu1 %v8698_v14  ;;  %v8794_v14 = vld [vmem:[#allocation15 + $0x640] ss:$16 sps:$4 sm:$0xff]  }
 0x432   :  { %6488 = vmatprep.subr.bf16.mxu1 %v8706_v15  ;;  %v8802_v15 = vld [vmem:[#allocation15 + $0x624] ss:$16 sps:$4 sm:$0xff]  }
 0x433   :  { %6448 = vmatpush2.bf16.msra.mxu0 %v8701_v18  ;;  %v8736_v18 = vld [vmem:[#allocation15 + $0x404] ss:$16 sps:$4 sm:$0xff]  }
 0x434   :  { %6449 = vmatprep.subr.bf16.mxu0 %v8709_v43  ;;  %v8808_v43 = vld [vmem:[#allocation15 + $0x604] ss:$16 sps:$4 sm:$0xff]  }
 0x435   :  { %6489 = vmatpush2.bf16.msra.mxu1 %v8704_v21  ;;  %v8734_v21 = vld [vmem:[#allocation15 + $0x400] ss:$16 sps:$4 sm:$0xff]  }
 0x436   :  { %6490 = vmatprep.subr.bf16.mxu1 %v8712_v29  ;;  %v8814_v29 = vld [vmem:[#allocation15 + $0x7e4] ss:$16 sps:$4 sm:$0xff]  }
 0x437   :  { %6450 = vmatpush2.bf16.msra.mxu0 %v8707_v30  ;;  %v8737_v30 = vld [vmem:[#allocation15 + $0x5e0] ss:$16 sps:$4 sm:$0xff]  }
 0x438   :  { %6501 = vmatprep.subr.bf16.mxu0 %v8715_v41  ;;  %v8820_v41 = vld [vmem:[#allocation15 + $0x7c4] ss:$16 sps:$4 sm:$0xff]  }
 0x439   :  { %6491 = vmatpush2.bf16.msra.mxu1 %v8710_v36  ;;  %v8740_v36 = vld [vmem:[#allocation15 + $0x5c0] ss:$16 sps:$4 sm:$0xff]  }
 0x43a   :  { %v9576_v56 = vpop.f32.mrf.mxu0  ;;  %6452 = vmatmul.mubr.bf16.vlgmr.msra.gmra.mxu0 %v9572_v50  ;;  %6542 = vmatprep.subr.bf16.mxu1 %v8766_v46  ;;  %v8818_v46 = vld [vmem:[#allocation15 + $0x7c0] ss:$16 sps:$4 sm:$0xff]  }
 0x43b   :  { %6502 = vmatpush1.bf16.msra.mxu0 %v8713_v47  ;;  %v8826_v47 = vld [vmem:[#allocation15 + $0x7a4] ss:$16 sps:$4 sm:$0xff]  }
 0x43c   :  { %v9579_v62 = vpop.f32.mrf.mxu0  ;;  %v9581_v39 = vpop.f32.mrf.mxu1  ;;  %6493 = vmatmul.mubr.bf16.vlgmr.msra.gmra.mxu1 %v9574_v13  ;;  %6503 = vmatprep.subr.bf16.mxu0 %v8718_v32  ;;  %v8743_v32 = vld [vmem:[#allocation15 + $0x5a0] ss:$16 sps:$4 sm:$0xff]  }
 0x43d   :  { %6543 = vmatpush1.bf16.msra.mxu1 %v8764_v16  ;;  %v8748_v16 = vld [vmem:[#allocation15 + $0x584] ss:$16 sps:$4 sm:$0xff]  }
 0x43e   :  { %v4605_v2 = vpop.f32.mrf.mxu0  ;;  %v9584_v54 = vpop.f32.mrf.mxu1  ;;  %6544 = vmatprep.subr.bf16.mxu1 %v8772_v58  ;;  %v8824_v58 = vld [vmem:[#allocation15 + $0x7a0] ss:$16 sps:$4 sm:$0xff]  }
 0x43f   :  { %6504 = vmatpush1.bf16.msra.mxu0 %v8716_v26  ;;  %v8832_v26 = vld [vmem:[#allocation15 + $0x784] ss:$16 sps:$4 sm:$0xff]   ;;  %v8830_v2 = vld [vmem:[#allocation15 + $0x780] ss:$16 sps:$4 sm:$0xff]  }
 0x440   :  { %v4606_v3 = vpop.f32.mrf.mxu0  ;;  %v4646_v4 = vpop.f32.mrf.mxu1  ;;  %6505 = vmatprep.subr.bf16.mxu0 %v8721_v0  ;;  %v8746_v0 = vld [vmem:[#allocation15 + $0x580] ss:$16 sps:$4 sm:$0xff]  }
 0x441   :  { %6545 = vmatpush1.bf16.msra.mxu1 %v8770_v1  ;;  %v8751_v1 = vld [vmem:[#allocation15 + $0x564] ss:$16 sps:$4 sm:$0xff]   ;;  %v8836_v4 = vld [vmem:[#allocation15 + $0x760] ss:$16 sps:$4 sm:$0xff]  }
 0x442   :  { %v4647_v45 = vpop.f32.mrf.mxu1  ;;  %6546 = vmatprep.subr.bf16.mxu1 %v8778_v59  ;;  %v8838_v59 = vld [vmem:[#allocation15 + $0x764] ss:$16 sps:$4 sm:$0xff]  }
 0x443   :  { %6506 = vmatpush1.bf16.msra.mxu0 %v8719_v49  ;;  %v8749_v49 = vld [vmem:[#allocation15 + $0x560] ss:$16 sps:$4 sm:$0xff]   ;;  %v8754_v3 = vld [vmem:[#allocation15 + $0x544] ss:$16 sps:$4 sm:$0xff]  }
 0x444   :  { %6507 = vmatprep.subr.bf16.mxu0 %v8724_v63  ;;  %v8844_v63 = vld [vmem:[#allocation15 + $0x744] ss:$16 sps:$4 sm:$0xff]  }
 0x445   :  { %6547 = vmatpush1.bf16.msra.mxu1 %v8776_v5  ;;  %v8752_v5 = vld [vmem:[#allocation15 + $0x540] ss:$16 sps:$4 sm:$0xff]   ;;  %v8757_v45 = vld [vmem:[#allocation15 + $0x524] ss:$16 sps:$4 sm:$0xff]  }
 0x446   :  { %6548 = vmatprep.subr.bf16.mxu1 %v8784_v6  ;;  %v8842_v6 = vld [vmem:[#allocation15 + $0x740] ss:$16 sps:$4 sm:$0xff]  }
 0x447   :  { %6508 = vmatpush1.bf16.msra.mxu0 %v8722_v31  ;;  %v8850_v31 = vld [vmem:[#allocation15 + $0x724] ss:$16 sps:$4 sm:$0xff]  }
 0x448   :  { %6509 = vmatprep.subr.bf16.mxu0 %v8727_v7  ;;  %v8755_v7 = vld [vmem:[#allocation15 + $0x520] ss:$16 sps:$4 sm:$0xff]  }
 0x449   :  { %6549 = vmatpush1.bf16.msra.mxu1 %v8782_v8  ;;  %v8760_v8 = vld [vmem:[#allocation15 + $0x504] ss:$16 sps:$4 sm:$0xff]  }
 0x44a   :  { %6550 = vmatprep.subr.bf16.mxu1 %v8790_v53  ;;  %v9586_v53 = vld [vmem:[#allocation14] sm:$0xff] }
 0x44b   :  { %6510 = vmatpush1.bf16.msra.mxu0 %v8725_v9  ;;  %v2380_v9 = vrot.slane %v9586_v53, %v1250_v27 }
 0x44c   :  { %6511 = vmatprep.subr.bf16.mxu0 %v8730_v40  ;;  %v8848_v40 = vld [vmem:[#allocation15 + $0x720] ss:$16 sps:$4 sm:$0xff]  }
 0x44d   :  { %6551 = vmatpush1.bf16.msra.mxu1 %v8788_v10  ;;  %v8856_v10 = vld [vmem:[#allocation15 + $0x704] ss:$16 sps:$4 sm:$0xff]  }
 0x44e   :  { %6552 = vmatprep.subr.bf16.mxu1 %v8796_v11  ;;  %v2384_v11 = vrot.slane %v9586_v53, %v1254_v55 }
 0x44f   :  { %6512 = vmatpush1.bf16.msra.mxu0 %v8728_v37  ;;  %v8758_v37 = vld [vmem:[#allocation15 + $0x500] ss:$16 sps:$4 sm:$0xff]  }
 0x450   :  { %6513 = vmatprep.subr.bf16.mxu0 %v8733_v12  ;;  %v8763_v12 = vld [vmem:[#allocation15 + $0xec] ss:$16 sps:$4 sm:$0xff]   ;;  %v4604_v27 = vadd.f32 %v9579_v62, %v2384_v11  ;;  %v8809_v11 = vld [vmem:[#allocation15 + $0x1e8] ss:$16 sps:$4 sm:$0xff]  }
 0x451   :  { %6553 = vmatpush1.bf16.msra.mxu1 %v8794_v14  ;;  %v4602_v14 = vadd.f32 %v9576_v56, %v2380_v9  ;;  %v8811_v9 = vld [vmem:[#allocation15 + $0x1ec] ss:$16 sps:$4 sm:$0xff]  }
 0x452   :  { %6554 = vmatprep.subr.bf16.mxu1 %v8802_v15  ;;  %v8854_v15 = vld [vmem:[#allocation15 + $0x700] ss:$16 sps:$4 sm:$0xff]   ;;  %v4645_v55 = vadd.f32 %v9584_v54, %v4604_v27 }
 0x453   :  { %6514 = vmatpush1.bf16.msra.mxu0 %v8731_v17  ;;  %v8862_v17 = vld [vmem:[#allocation15 + $0x2ec] ss:$16 sps:$4 sm:$0xff]  }
 0x454   :  { %6515 = vmatprep.subr.bf16.mxu0 %v8736_v18  ;;  %v4643_v18 = vadd.f32 %v9581_v39, %v4602_v14 }
 0x455   :  { %6555 = vmatpush1.bf16.msra.mxu1 %v8800_v20 }
 0x456   :  { %6556 = vmatprep.subr.bf16.mxu1 %v8808_v43 }
 0x457   :  { %6516 = vmatpush1.bf16.msra.mxu0 %v8734_v21 }
 0x458   :  { %6517 = vmatprep.subr.bf16.mxu0 %v8739_v24 }
 0x459   :  { %6557 = vmatpush1.bf16.msra.mxu1 %v8806_v60 }
 0x45a   :  { %6558 = vmatprep.subr.bf16.mxu1 %v8814_v29 }
 0x45b   :  { %6518 = vmatpush2.bf16.msra.mxu0 %v8737_v30 }
 0x45c   :  { %6519 = vmatprep.subr.bf16.mxu0 %v8742_v57 }
 0x45d   :  { %6559 = vmatpush2.bf16.msra.mxu1 %v8812_v38 }
 0x45e   :  { %6560 = vmatprep.subr.bf16.mxu1 %v8820_v41 }
 0x45f   :  { %6520 = vmatpush2.bf16.msra.mxu0 %v8740_v36 }
 0x460   :  { %6521 = vmatprep.subr.bf16.mxu0 %v8745_v34 }
 0x461   :  { %6561 = vmatpush2.bf16.msra.mxu1 %v8818_v46 }
 0x462   :  { %6562 = vmatprep.subr.bf16.mxu1 %v8826_v47 }
 0x463   :  { %6522 = vmatpush2.bf16.msra.mxu0 %v8743_v32 }
 0x464   :  { %6523 = vmatprep.subr.bf16.mxu0 %v8748_v16 }
 0x465   :  { %6563 = vmatpush2.bf16.msra.mxu1 %v8824_v58 }
 0x466   :  { %6564 = vmatprep.subr.bf16.mxu1 %v8832_v26  ;;  %v8761_v26 = vld [vmem:[#allocation15 + $0xe8] ss:$16 sps:$4 sm:$0xff]  }
 0x467   :  { %6524 = vmatpush2.bf16.msra.mxu0 %v8746_v0 }
 0x468   :  { %6525 = vmatprep.subr.bf16.mxu0 %v8751_v1  ;;  %v8769_v1 = vld [vmem:[#allocation15 + $0xcc] ss:$16 sps:$4 sm:$0xff]  }
 0x469   :  { %6565 = vmatpush2.bf16.msra.mxu1 %v8830_v2  ;;  %v8767_v2 = vld [vmem:[#allocation15 + $0xc8] ss:$16 sps:$4 sm:$0xff]  }
 0x46a   :  { %6566 = vmatprep.subr.bf16.mxu1 %v8838_v59  ;;  %v8775_v59 = vld [vmem:[#allocation15 + $0xac] ss:$16 sps:$4 sm:$0xff]  }
 0x46b   :  { %6526 = vmatpush2.bf16.msra.mxu0 %v8749_v49  ;;  %v8773_v49 = vld [vmem:[#allocation15 + $0xa8] ss:$16 sps:$4 sm:$0xff]  }
 0x46c   :  { %6527 = vmatprep.subr.bf16.mxu0 %v8754_v3  ;;  %v8781_v3 = vld [vmem:[#allocation15 + $0x8c] ss:$16 sps:$4 sm:$0xff]  }
 0x46d   :  { %6567 = vmatpush2.bf16.msra.mxu1 %v8836_v4  ;;  %v8779_v4 = vld [vmem:[#allocation15 + $0x88] ss:$16 sps:$4 sm:$0xff]  }
 0x46e   :  { %6568 = vmatprep.subr.bf16.mxu1 %v8844_v63  ;;  %v8787_v63 = vld [vmem:[#allocation15 + $0x6c] ss:$16 sps:$4 sm:$0xff]  }
 0x46f   :  { %6528 = vmatpush2.bf16.msra.mxu0 %v8752_v5  ;;  %v8785_v5 = vld [vmem:[#allocation15 + $0x68] ss:$16 sps:$4 sm:$0xff]  }
 0x470   :  { %6529 = vmatprep.subr.bf16.mxu0 %v8757_v45  ;;  %v8793_v45 = vld [vmem:[#allocation15 + $0x4c] ss:$16 sps:$4 sm:$0xff]  }
 0x471   :  { %6569 = vmatpush2.bf16.msra.mxu1 %v8842_v6  ;;  %v8791_v6 = vld [vmem:[#allocation15 + $0x48] ss:$16 sps:$4 sm:$0xff]  }
 0x472   :  { %6570 = vmatprep.subr.bf16.mxu1 %v8850_v31  ;;  %v8799_v31 = vld [vmem:[#allocation15 + $0x2c] ss:$16 sps:$4 sm:$0xff]  }
 0x473   :  { %6530 = vmatpush2.bf16.msra.mxu0 %v8755_v7  ;;  %v8805_v7 = vld [vmem:[#allocation15 + $0xc] ss:$16 sps:$4 sm:$0xff]  }
 0x474   :  { %6531 = vmatprep.subr.bf16.mxu0 %v8760_v8  ;;  %v8803_v8 = vld [vmem:[#allocation15 + $0x8] ss:$16 sps:$4 sm:$0xff]  }
 0x475   :  { %6571 = vmatpush2.bf16.msra.mxu1 %v8848_v40  ;;  %v2387_v40 = vsub.s32 6, %v9360_v48 }
 0x476   :  { %6572 = vmatprep.subr.bf16.mxu1 %v8856_v10  ;;  %v2391_v10 = vsub.s32 7, %v9360_v48  ;;  %v8821_v48 = vld [vmem:[#allocation15 + $0x1a8] ss:$16 sps:$4 sm:$0xff]  }
 0x477   :  { %6532 = vmatpush2.bf16.msra.mxu0 %v8758_v37  ;;  %v8817_v37 = vld [vmem:[#allocation15 + $0x1cc] ss:$16 sps:$4 sm:$0xff]  }
 0x478   :  { %6583 = vmatprep.subr.bf16.mxu0 %v8763_v12  ;;  %v2388_v12 = vrot.slane %v9586_v53, %v2387_v40  ;;  %v2392_v14 = vrot.slane %v9586_v53, %v2391_v10  ;;  %v8863_v40 = vld [vmem:[#allocation15 + $0x4c8] ss:$16 sps:$4 sm:$0xff]   ;;  %v8868_v10 = vld [vmem:[#allocation15 + $0x2cc] ss:$16 sps:$4 sm:$0xff]  }
 0x479   :  { %6573 = vmatpush2.bf16.msra.mxu1 %v8854_v15  ;;  %v8815_v15 = vld [vmem:[#allocation15 + $0x1c8] ss:$16 sps:$4 sm:$0xff]  }
 0x47a   :  { %v4683_v20 = vpop.f32.mrf.mxu0  ;;  %6624 = vmatprep.subr.bf16.mxu1 %v8862_v17  ;;  %v8823_v17 = vld [vmem:[#allocation15 + $0x1ac] ss:$16 sps:$4 sm:$0xff]  }
 0x47b   :  { %v4684_v43 = vadd.f32 %v4683_v20, %v4643_v18 }
 0x47c   :  { %v4685_v21 = vpop.f32.mrf.mxu0  ;;  %v9598_v24 = vpop.f32.mrf.mxu1 }
 0x47d   :  { %v4825_v56 = vmul.f32 0.70710677, %v4684_v43  ;;  %v4686_v60 = vadd.f32 %v4685_v21, %v4645_v55  ;;  %v4817_v46 = vmul.f32 0.5, %v4684_v43  ;;  %v4725_v27 = vadd.f32 %v9598_v24, %v2388_v12  ;;  %v8874_v12 = vld [vmem:[#allocation15 + $0x2ac] ss:$16 sps:$4 sm:$0xff]  }
 0x47e   :  { %v4687_v29 = vpop.f32.mrf.mxu0  ;;  %v9600_v30 = vpop.f32.mrf.mxu1 }
 0x47f   :  { %9033 = verf.f32 %v4825_v56  ;;  %v4826_v62 = vmul.f32 0.70710677, %v4686_v60  ;;  %v4818_v54 = vmul.f32 0.5, %v4686_v60  ;;  %v4727_v20 = vadd.f32 %v9600_v30, %v2392_v14  ;;  %v8829_v56 = vld [vmem:[#allocation15 + $0x18c] ss:$16 sps:$4 sm:$0xff]  }
 0x480   :  { %v4688_v57 = vpop.f32.mrf.mxu0  ;;  %v4728_v38 = vpop.f32.mrf.mxu1  ;;  %v8877_v14 = vld [vmem:[#allocation15 + $0x48c] ss:$16 sps:$4 sm:$0xff]  }
 0x481   :  { %9035 = verf.f32 %v4826_v62 }
 0x482   :  { %v4729_v39 = vpop.f32.mrf.mxu1 }
 0x483   :  { %v8827_v39 = vld [vmem:[#allocation15 + $0x188] ss:$16 sps:$4 sm:$0xff]  }
 0x48c   :  { %v9034_v41 = vpop.eup %9033 }
 0x48d   :  { %v4841_v36 = vadd.f32 1.0, %v9034_v41 }
 0x48e   :  { %v9036_v34 = vpop.eup %9035 }
 0x48f   :  { %v4842_v47 = vadd.f32 1.0, %v9036_v34  ;;  %v4849_v32 = vmul.f32 %v4841_v36, %v4817_v46  ;;  %v8835_v36 = vld [vmem:[#allocation15 + $0x16c] ss:$16 sps:$4 sm:$0xff]   ;;  %v8833_v46 = vld [vmem:[#allocation15 + $0x168] ss:$16 sps:$4 sm:$0xff]  }
 0x491   :  { %v4850_v16 = vmul.f32 %v4842_v47, %v4818_v54  ;;  %v9604_v0 = vpack.c.bf16 %v4849_v32, %v4849_v32  ;;  %v8841_v54 = vld [vmem:[#allocation15 + $0x14c] ss:$16 sps:$4 sm:$0xff]   ;;  %v8839_v47 = vld [vmem:[#allocation15 + $0x148] ss:$16 sps:$4 sm:$0xff]  }
 0x492   :  { %v8847_v32 = vld [vmem:[#allocation15 + $0x12c] ss:$16 sps:$4 sm:$0xff]  }
 0x493   :  { %v9602_v58 = vpack.c.bf16 %v4850_v16, %v4850_v16  ;;  %v8845_v16 = vld [vmem:[#allocation15 + $0x128] ss:$16 sps:$4 sm:$0xff]  }
 0x495   :  { %6533 = vmatprep.mubr.bf16.mxu0 %v9602_v58 }
 0x496   :  { %6534 = vmatmul.mubr.bf16.vlgmr.msra.gmra.mxu0 %v9604_v0 }
 0x497   :  { %6584 = vmatpush1.bf16.msra.mxu0 %v8761_v26  ;;  %6615 = vmatprep.mubr.bf16.mxu0 %v9548_v52  ;;  %v8797_v52 = vld [vmem:[#allocation15 + $0x28] ss:$16 sps:$4 sm:$0xff]   ;;  %v8853_v26 = vld [vmem:[#allocation15 + $0x10c] ss:$16 sps:$4 sm:$0xff]  }
 0x498   :  { %6585 = vmatprep.subr.bf16.mxu0 %v8769_v1 }
 0x49b   :  { %6586 = vmatpush1.bf16.msra.mxu0 %v8767_v2 }
 0x49c   :  { %6587 = vmatprep.subr.bf16.mxu0 %v8775_v59  ;;  %v8851_v59 = vld [vmem:[#allocation15 + $0x108] ss:$16 sps:$4 sm:$0xff]  }
 0x49f   :  { %6588 = vmatpush1.bf16.msra.mxu0 %v8773_v49 }
 0x4a0   :  { %6589 = vmatprep.subr.bf16.mxu0 %v8781_v3  ;;  %v8859_v3 = vld [vmem:[#allocation15 + $0x4ec] ss:$16 sps:$4 sm:$0xff]  }
 0x4a3   :  { %6590 = vmatpush1.bf16.msra.mxu0 %v8779_v4 }
 0x4a4   :  { %6591 = vmatprep.subr.bf16.mxu0 %v8787_v63 }
 0x4a7   :  { %6592 = vmatpush1.bf16.msra.mxu0 %v8785_v5 }
 0x4a8   :  { %6593 = vmatprep.subr.bf16.mxu0 %v8793_v45 }
 0x4ab   :  { %6594 = vmatpush1.bf16.msra.mxu0 %v8791_v6  ;;  %v8857_v6 = vld [vmem:[#allocation15 + $0x4e8] ss:$16 sps:$4 sm:$0xff]  }
 0x4ac   :  { %6595 = vmatprep.subr.bf16.mxu0 %v8799_v31 }
 0x4af   :  { %6596 = vmatpush1.bf16.msra.mxu0 %v8797_v52  ;;  %v8865_v52 = vld [vmem:[#allocation15 + $0x4cc] ss:$16 sps:$4 sm:$0xff]  }
 0x4b0   :  { %6597 = vmatprep.subr.bf16.mxu0 %v8805_v7 }
 0x4b3   :  { %6598 = vmatpush1.bf16.msra.mxu0 %v8803_v8  ;;  %v8860_v8 = vld [vmem:[#allocation15 + $0x2e8] ss:$16 sps:$4 sm:$0xff]  }
 0x4b4   :  { %6599 = vmatprep.subr.bf16.mxu0 %v8811_v9 }
 0x4b7   :  { %6600 = vmatpush2.bf16.msra.mxu0 %v8809_v11  ;;  %v8871_v11 = vld [vmem:[#allocation15 + $0x4ac] ss:$16 sps:$4 sm:$0xff]  }
 0x4b8   :  { %6601 = vmatprep.subr.bf16.mxu0 %v8817_v37  ;;  %v8866_v37 = vld [vmem:[#allocation15 + $0x2c8] ss:$16 sps:$4 sm:$0xff]  }
 0x4ba   :  { %v4765_v18 = vpop.f32.mrf.mxu0 }
 0x4bb   :  { %v4766_v55 = vadd.f32 %v4765_v18, %v4725_v27  ;;  %6602 = vmatpush2.bf16.msra.mxu0 %v8815_v15  ;;  %v8875_v15 = vld [vmem:[#allocation15 + $0x488] ss:$16 sps:$4 sm:$0xff]   ;;  %v8883_v27 = vld [vmem:[#allocation15 + $0x46c] ss:$16 sps:$4 sm:$0xff]  }
 0x4bc   :  { %v4767_v43 = vpop.f32.mrf.mxu0  ;;  %v4806_v21 = vpop.f32.mrf.mxu1  ;;  %6603 = vmatprep.subr.bf16.mxu0 %v8823_v17  ;;  %v8880_v17 = vld [vmem:[#allocation15 + $0x28c] ss:$16 sps:$4 sm:$0xff]   ;;  %v8878_v18 = vld [vmem:[#allocation15 + $0x288] ss:$16 sps:$4 sm:$0xff]  }
 0x4bd   :  { %v4768_v60 = vadd.f32 %v4767_v43, %v4727_v20  ;;  %v4807_v29 = vadd.f32 %v4806_v21, %v4766_v55  ;;  %v8886_v20 = vld [vmem:[#allocation15 + $0x26c] ss:$16 sps:$4 sm:$0xff]   ;;  %v8887_v43 = vld [vmem:[#allocation15 + $0x448] ss:$16 sps:$4 sm:$0xff]  }
 0x4be   :  { %v4769_v62 = vpop.f32.mrf.mxu0  ;;  %v4808_v53 = vpop.f32.mrf.mxu1  ;;  %v8889_v55 = vld [vmem:[#allocation15 + $0x44c] ss:$16 sps:$4 sm:$0xff]  }
 0x4bf   :  { %v4827_v57 = vmul.f32 0.70710677, %v4807_v29  ;;  %v4809_v38 = vadd.f32 %v4808_v53, %v4768_v60  ;;  %6604 = vmatpush2.bf16.msra.mxu0 %v8821_v48  ;;  %v4819_v4 = vmul.f32 0.5, %v4807_v29  ;;  %v8884_v48 = vld [vmem:[#allocation15 + $0x268] ss:$16 sps:$4 sm:$0xff]  }
 0x4c0   :  { %v4770_v41 = vpop.f32.mrf.mxu0  ;;  %v4810_v24 = vpop.f32.mrf.mxu1  ;;  %6605 = vmatprep.subr.bf16.mxu0 %v8829_v56  ;;  %v8892_v21 = vld [vmem:[#allocation15 + $0x24c] ss:$16 sps:$4 sm:$0xff]   ;;  %v8890_v60 = vld [vmem:[#allocation15 + $0x248] ss:$16 sps:$4 sm:$0xff]  }
 0x4c1   :  { %9037 = verf.f32 %v4827_v57  ;;  %v4828_v30 = vmul.f32 0.70710677, %v4809_v38  ;;  %v4820_v63 = vmul.f32 0.5, %v4809_v38  ;;  %v8895_v56 = vld [vmem:[#allocation15 + $0x42c] ss:$16 sps:$4 sm:$0xff]  }
 0x4c2   :  { %v4811_v34 = vpop.f32.mrf.mxu1  ;;  %v8893_v29 = vld [vmem:[#allocation15 + $0x428] ss:$16 sps:$4 sm:$0xff]   ;;  %v8898_v62 = vld [vmem:[#allocation15 + $0x22c] ss:$16 sps:$4 sm:$0xff]  }
 0x4c3   :  { %9039 = verf.f32 %v4828_v30  ;;  %6606 = vmatpush2.bf16.msra.mxu0 %v8827_v39  ;;  %v8901_v53 = vld [vmem:[#allocation15 + $0x40c] ss:$16 sps:$4 sm:$0xff]   ;;  %v8896_v57 = vld [vmem:[#allocation15 + $0x228] ss:$16 sps:$4 sm:$0xff]  }
 0x4c4   :  { %6607 = vmatprep.subr.bf16.mxu0 %v8835_v36  ;;  %v8899_v38 = vld [vmem:[#allocation15 + $0x408] ss:$16 sps:$4 sm:$0xff]   ;;  %v8904_v39 = vld [vmem:[#allocation15 + $0x20c] ss:$16 sps:$4 sm:$0xff]  }
 0x4c5   :  { %v8907_v41 = vld [vmem:[#allocation15 + $0x5ec] ss:$16 sps:$4 sm:$0xff]   ;;  %v8902_v24 = vld [vmem:[#allocation15 + $0x208] ss:$16 sps:$4 sm:$0xff]  }
 0x4c6   :  { %v8905_v36 = vld [vmem:[#allocation15 + $0x5e8] ss:$16 sps:$4 sm:$0xff]   ;;  %v8910_v30 = vld [vmem:[#allocation15 + $0x3ec] ss:$16 sps:$4 sm:$0xff]  }
 0x4c7   :  { %6608 = vmatpush2.bf16.msra.mxu0 %v8833_v46  ;;  %v8913_v34 = vld [vmem:[#allocation15 + $0x5cc] ss:$16 sps:$4 sm:$0xff]   ;;  %v9624_v46 = vld [vmem:[#allocation17] sm:$0xf] }
 0x4c8   :  { %6609 = vmatprep.subr.bf16.mxu0 %v8841_v54  ;;  %v8908_v54 = vld [vmem:[#allocation15 + $0x3e8] ss:$16 sps:$4 sm:$0xff]  }
 0x4cb   :  { %6610 = vmatpush2.bf16.msra.mxu0 %v8839_v47  ;;  %v8911_v47 = vld [vmem:[#allocation15 + $0x5c8] ss:$16 sps:$4 sm:$0xff]  }
 0x4cc   :  { %6611 = vmatprep.subr.bf16.mxu0 %v8847_v32  ;;  %v5122_v32 = vrot.slane %v9624_v46, %v9391_v33 }
 0x4ce   :  { %v9038_v1 = vpop.eup %9037 }
 0x4cf   :  { %v4843_v2 = vadd.f32 1.0, %v9038_v1  ;;  %6612 = vmatpush2.bf16.msra.mxu0 %v8845_v16  ;;  %v8916_v16 = vld [vmem:[#allocation15 + $0x3cc] ss:$16 sps:$4 sm:$0xff]   ;;  %v5126_v1 = vrot.slane %v9624_v46, %v9394_v35 }
 0x4d0   :  { %v9040_v49 = vpop.eup %9039  ;;  %6613 = vmatprep.subr.bf16.mxu0 %v8853_v26  ;;  %v8919_v26 = vld [vmem:[#allocation15 + $0x5ac] ss:$16 sps:$4 sm:$0xff]  }
 0x4d1   :  { %v4844_v5 = vadd.f32 1.0, %v9040_v49  ;;  %v4851_v45 = vmul.f32 %v4843_v2, %v4819_v4  ;;  %v8922_v4 = vld [vmem:[#allocation15 + $0x3ac] ss:$16 sps:$4 sm:$0xff]  }
 0x4d3   :  { %6614 = vmatpush2.bf16.msra.mxu0 %v8851_v59  ;;  %v4852_v31 = vmul.f32 %v4844_v5, %v4820_v63  ;;  %v9618_v9 = vpack.c.bf16 %v4851_v45, %v4851_v45  ;;  %v8914_v59 = vld [vmem:[#allocation15 + $0x3c8] ss:$16 sps:$4 sm:$0xff]   ;;  %v8925_v45 = vld [vmem:[#allocation15 + $0x58c] ss:$16 sps:$4 sm:$0xff]  }
 0x4d4   :  { %6665 = vmatprep.subr.bf16.mxu0 %v8859_v3  ;;  %v8917_v3 = vld [vmem:[#allocation15 + $0x5a8] ss:$16 sps:$4 sm:$0xff]  }
 0x4d5   :  { %v9615_v7 = vpack.c.bf16 %v4852_v31, %v4852_v31 }
 0x4d6   :  { %6616 = vmatmul.mubr.bf16.vlgmr.msra.gmra.mxu0 %v9572_v50  ;;  %v8869_v50 = vld [vmem:[#allocation15 + $0x4a8] ss:$16 sps:$4 sm:$0xff]  }
 0x4d7   :  { %6666 = vmatpush1.bf16.msra.mxu0 %v8857_v6  ;;  %6697 = vmatprep.mubr.bf16.mxu0 %v9602_v58  ;;  %v8872_v58 = vld [vmem:[#allocation15 + $0x2a8] ss:$16 sps:$4 sm:$0xff]  }
 0x4d8   :  { %6574 = vmatprep.mubr.bf16.mxu1 %v9615_v7  ;;  %6667 = vmatprep.subr.bf16.mxu0 %v8865_v52 }
 0x4d9   :  { %6575 = vmatmul.mubr.bf16.vlgmr.msra.gmra.mxu1 %v9618_v9 }
 0x4da   :  { %6625 = vmatpush1.bf16.msra.mxu1 %v8860_v8  ;;  %6656 = vmatprep.mubr.bf16.mxu1 %v9561_v51  ;;  %v8881_v51 = vld [vmem:[#allocation15 + $0x468] ss:$16 sps:$4 sm:$0xff]  }
 0x4db   :  { %6668 = vmatpush1.bf16.msra.mxu0 %v8863_v40  ;;  %6626 = vmatprep.subr.bf16.mxu1 %v8868_v10  ;;  %v8920_v8 = vld [vmem:[#allocation15 + $0x3a8] ss:$16 sps:$4 sm:$0xff]   ;;  %v8928_v10 = vld [vmem:[#allocation15 + $0x38c] ss:$16 sps:$4 sm:$0xff]  }
 0x4dc   :  { %6669 = vmatprep.subr.bf16.mxu0 %v8871_v11  ;;  %v8923_v40 = vld [vmem:[#allocation15 + $0x588] ss:$16 sps:$4 sm:$0xff]  }
 0x4de   :  { %6627 = vmatpush1.bf16.msra.mxu1 %v8866_v37 }
 0x4df   :  { %6670 = vmatpush1.bf16.msra.mxu0 %v8869_v50  ;;  %6628 = vmatprep.subr.bf16.mxu1 %v8874_v12  ;;  %v8931_v50 = vld [vmem:[#allocation15 + $0x56c] ss:$16 sps:$4 sm:$0xff]  }
 0x4e0   :  { %6671 = vmatprep.subr.bf16.mxu0 %v8877_v14  ;;  %v8926_v14 = vld [vmem:[#allocation15 + $0x388] ss:$16 sps:$4 sm:$0xff]  }
 0x4e2   :  { %6629 = vmatpush1.bf16.msra.mxu1 %v8872_v58  ;;  %v8929_v58 = vld [vmem:[#allocation15 + $0x568] ss:$16 sps:$4 sm:$0xff]  }
 0x4e3   :  { %6672 = vmatpush1.bf16.msra.mxu0 %v8875_v15  ;;  %6630 = vmatprep.subr.bf16.mxu1 %v8880_v17  ;;  %v8934_v15 = vld [vmem:[#allocation15 + $0x36c] ss:$16 sps:$4 sm:$0xff]  }
 0x4e4   :  { %6673 = vmatprep.subr.bf16.mxu0 %v8883_v27  ;;  %v8937_v17 = vld [vmem:[#allocation15 + $0x54c] ss:$16 sps:$4 sm:$0xff]   ;;  %v8932_v27 = vld [vmem:[#allocation15 + $0x368] ss:$16 sps:$4 sm:$0xff]  }
 0x4e6   :  { %6631 = vmatpush1.bf16.msra.mxu1 %v8878_v18  ;;  %v8935_v18 = vld [vmem:[#allocation15 + $0x548] ss:$16 sps:$4 sm:$0xff]  }
 0x4e7   :  { %6674 = vmatpush1.bf16.msra.mxu0 %v8881_v51  ;;  %6632 = vmatprep.subr.bf16.mxu1 %v8886_v20  ;;  %v8940_v51 = vld [vmem:[#allocation15 + $0x34c] ss:$16 sps:$4 sm:$0xff]  }
 0x4e8   :  { %6675 = vmatprep.subr.bf16.mxu0 %v8889_v55  ;;  %v8943_v20 = vld [vmem:[#allocation15 + $0x52c] ss:$16 sps:$4 sm:$0xff]   ;;  %v8938_v55 = vld [vmem:[#allocation15 + $0x348] ss:$16 sps:$4 sm:$0xff]  }
 0x4ea   :  { %6633 = vmatpush1.bf16.msra.mxu1 %v8884_v48  ;;  %v8941_v48 = vld [vmem:[#allocation15 + $0x528] ss:$16 sps:$4 sm:$0xff]  }
 0x4eb   :  { %6676 = vmatpush1.bf16.msra.mxu0 %v8887_v43  ;;  %6634 = vmatprep.subr.bf16.mxu1 %v8892_v21  ;;  %v8946_v43 = vld [vmem:[#allocation15 + $0x32c] ss:$16 sps:$4 sm:$0xff]  }
 0x4ec   :  { %6677 = vmatprep.subr.bf16.mxu0 %v8895_v56  ;;  %v8949_v21 = vld [vmem:[#allocation15 + $0x50c] ss:$16 sps:$4 sm:$0xff]   ;;  %v8944_v56 = vld [vmem:[#allocation15 + $0x328] ss:$16 sps:$4 sm:$0xff]  }
 0x4ee   :  { %6635 = vmatpush1.bf16.msra.mxu1 %v8890_v60  ;;  %v8947_v60 = vld [vmem:[#allocation15 + $0x508] ss:$16 sps:$4 sm:$0xff]  }
 0x4ef   :  { %6678 = vmatpush1.bf16.msra.mxu0 %v8893_v29  ;;  %6636 = vmatprep.subr.bf16.mxu1 %v8898_v62  ;;  %v8952_v29 = vld [vmem:[#allocation15 + $0x30c] ss:$16 sps:$4 sm:$0xff]  }
 0x4f0   :  { %6679 = vmatprep.subr.bf16.mxu0 %v8901_v53  ;;  %v6862_v62 = vld [vmem:[%s10155_s10 + $0xf8] sm:$0xff] }
 0x4f1   :  { %v8950_v53 = vld [vmem:[#allocation15 + $0x308] ss:$16 sps:$4 sm:$0xff]  }
 0x4f2   :  { %6637 = vmatpush1.bf16.msra.mxu1 %v8896_v57  ;;  %v6846_v57 = vld [vmem:[%s10155_s10 + $0x78] sm:$0xff] }
 0x4f3   :  { %6680 = vmatpush1.bf16.msra.mxu0 %v8899_v38  ;;  %6638 = vmatprep.subr.bf16.mxu1 %v8904_v39  ;;  %v8955_v38 = vld [vmem:[#allocation15 + $0x6ec] ss:$16 sps:$4 sm:$0xff]   ;;  %v6861_v39 = vld [vmem:[%s10155_s10 + $0xf0] sm:$0xff] }
 0x4f4   :  { %6681 = vmatprep.subr.bf16.mxu0 %v8907_v41  ;;  %v8953_v41 = vld [vmem:[#allocation15 + $0x6e8] ss:$16 sps:$4 sm:$0xff]  }
 0x4f6   :  { %6639 = vmatpush1.bf16.msra.mxu1 %v8902_v24  ;;  %v6845_v24 = vld [vmem:[%s10155_s10 + $0x70] sm:$0xff] }
 0x4f7   :  { %6682 = vmatpush2.bf16.msra.mxu0 %v8905_v36  ;;  %6640 = vmatprep.subr.bf16.mxu1 %v8910_v30  ;;  %v8958_v36 = vld [vmem:[#allocation15 + $0x6cc] ss:$16 sps:$4 sm:$0xff]  }
 0x4f8   :  { %6683 = vmatprep.subr.bf16.mxu0 %v8913_v34  ;;  %v6860_v30 = vld [vmem:[%s10155_s10 + $0xe8] sm:$0xff] }
 0x4f9   :  { %v8956_v34 = vld [vmem:[#allocation15 + $0x6c8] ss:$16 sps:$4 sm:$0xff]  }
 0x4fa   :  { %6641 = vmatpush2.bf16.msra.mxu1 %v8908_v54  ;;  %v6453_v2 = vpop.f32.mrf.mxu0  ;;  %v6843_v54 = vld [vmem:[%s10155_s10 + $0x60] sm:$0xff] }
 0x4fb   :  { %v6454_v49 = vadd.f32 %v6453_v2, %v5122_v32  ;;  %6684 = vmatpush2.bf16.msra.mxu0 %v8911_v47  ;;  %6642 = vmatprep.subr.bf16.mxu1 %v8916_v16  ;;  %v6858_v47 = vld [vmem:[%s10155_s10 + $0xd8] sm:$0xff]  ;;  %v6857_v16 = vld [vmem:[%s10155_s10 + $0xd0] sm:$0xff]  ;;  %v6856_v2 = vld [vmem:[%s10155_s10 + $0xc8] sm:$0xff] }
 0x4fc   :  { %v6455_v63 = vpop.f32.mrf.mxu0  ;;  %v6494_v5 = vpop.f32.mrf.mxu1  ;;  %6685 = vmatprep.subr.bf16.mxu0 %v8919_v26  ;;  %v8959_v32 = vld [vmem:[#allocation15 + $0x6a8] ss:$16 sps:$4 sm:$0xff]  }
 0x4fd   :  { %v6456_v6 = vadd.f32 %v6455_v63, %v5126_v1  ;;  %v9630_v33 = vadd.f32 %v6494_v5, %v6454_v49  ;;  %v6841_v26 = vld [vmem:[%s10155_s10 + $0x50] sm:$0xff]  ;;  %v8964_v1 = vld [vmem:[#allocation15 + $0x68c] ss:$16 sps:$4 sm:$0xff]  }
 0x4fe   :  { %6643 = vmatpush2.bf16.msra.mxu1 %v8914_v59  ;;  %v6457_v31 = vpop.f32.mrf.mxu0  ;;  %v6496_v52 = vpop.f32.mrf.mxu1  ;;  %v6840_v59 = vld [vmem:[%s10155_s10 + $0x48] sm:$0xff]  ;;  %v6854_v5 = vld [vmem:[%s10155_s10 + $0xb8] sm:$0xff] }
 0x4ff   :  { %v9632_v35 = vadd.f32 %v6496_v52, %v6456_v6  ;;  %6686 = vmatpush2.bf16.msra.mxu0 %v8917_v3  ;;  %6644 = vmatprep.subr.bf16.mxu1 %v8922_v4  ;;  %v8962_v49 = vld [vmem:[#allocation15 + $0x688] ss:$16 sps:$4 sm:$0xff]   ;;  %v8967_v63 = vld [vmem:[#allocation15 + $0x66c] ss:$16 sps:$4 sm:$0xff]  }
 0x500   :  { %v6458_v11 = vpop.f32.mrf.mxu0  ;;  %v6498_v37 = vpop.f32.mrf.mxu1  ;;  %6687 = vmatprep.subr.bf16.mxu0 %v8925_v45  ;;  %v6855_v3 = vld [vmem:[%s10155_s10 + $0xc0] sm:$0xff]  ;;  %v6838_v45 = vld [vmem:[%s10155_s10 + $0x38] sm:$0xff]  ;;  %v6853_v31 = vld [vmem:[%s10155_s10 + $0xb0] sm:$0xff] }
 0x501   :  { %v6839_v4 = vld [vmem:[%s10155_s10 + $0x40] sm:$0xff]  ;;  %v6837_v52 = vld [vmem:[%s10155_s10 + $0x30] sm:$0xff] }
 0x502   :  { %6645 = vmatpush2.bf16.msra.mxu1 %v8920_v8  ;;  %v6499_v12 = vpop.f32.mrf.mxu1  ;;  %v8965_v6 = vld [vmem:[#allocation15 + $0x668] ss:$16 sps:$4 sm:$0xff]   ;;  %v8970_v8 = vld [vmem:[#allocation15 + $0x64c] ss:$16 sps:$4 sm:$0xff]  }
 0x503   :  { %6688 = vmatpush2.bf16.msra.mxu0 %v8923_v40  ;;  %6646 = vmatprep.subr.bf16.mxu1 %v8928_v10  ;;  %v6852_v40 = vld [vmem:[%s10155_s10 + $0xa8] sm:$0xff]  ;;  %v6851_v37 = vld [vmem:[%s10155_s10 + $0xa0] sm:$0xff] }
 0x504   :  { %6689 = vmatprep.subr.bf16.mxu0 %v8931_v50  ;;  %v6836_v10 = vld [vmem:[%s10155_s10 + $0x28] sm:$0xff]  ;;  %v6835_v50 = vld [vmem:[%s10155_s10 + $0x20] sm:$0xff] }
 0x505   :  { %v8968_v11 = vld [vmem:[#allocation15 + $0x648] ss:$16 sps:$4 sm:$0xff]   ;;  %v8973_v12 = vld [vmem:[#allocation15 + $0x62c] ss:$16 sps:$4 sm:$0xff]  }
 0x506   :  { %6647 = vmatpush2.bf16.msra.mxu1 %v8926_v14  ;;  %v6850_v14 = vld [vmem:[%s10155_s10 + $0x98] sm:$0xff] }
 0x507   :  { %6690 = vmatpush2.bf16.msra.mxu0 %v8929_v58  ;;  %6648 = vmatprep.subr.bf16.mxu1 %v8934_v15  ;;  %v6834_v58 = vld [vmem:[%s10155_s10 + $0x18] sm:$0xff] }
 0x508   :  { %6691 = vmatprep.subr.bf16.mxu0 %v8937_v17  ;;  %v8971_v15 = vld [vmem:[#allocation15 + $0x628] ss:$16 sps:$4 sm:$0xff]  }
 0x509   :  { %v6849_v17 = vld [vmem:[%s10155_s10 + $0x90] sm:$0xff] }
 0x50a   :  { %6649 = vmatpush2.bf16.msra.mxu1 %v8932_v27  ;;  %v6833_v27 = vld [vmem:[%s10155_s10 + $0x10] sm:$0xff] }
 0x50b   :  { %6692 = vmatpush2.bf16.msra.mxu0 %v8935_v18  ;;  %6650 = vmatprep.subr.bf16.mxu1 %v8940_v51  ;;  %v8976_v18 = vld [vmem:[#allocation15 + $0x60c] ss:$16 sps:$4 sm:$0xff]  }
 0x50c   :  { %6693 = vmatprep.subr.bf16.mxu0 %v8943_v20  ;;  %v6848_v51 = vld [vmem:[%s10155_s10 + $0x88] sm:$0xff] }
 0x50d   :  { %v6832_v20 = vld [vmem:[%s10155_s10 + $0x8] sm:$0xff] }
 0x50e   :  { %6651 = vmatpush2.bf16.msra.mxu1 %v8938_v55  ;;  %v8974_v55 = vld [vmem:[#allocation15 + $0x608] ss:$16 sps:$4 sm:$0xff]  }
 0x50f   :  { %6694 = vmatpush2.bf16.msra.mxu0 %v8941_v48  ;;  %6652 = vmatprep.subr.bf16.mxu1 %v8946_v43  ;;  %v6847_v48 = vld [vmem:[%s10155_s10 + $0x80] sm:$0xff] }
 0x510   :  { %6695 = vmatprep.subr.bf16.mxu0 %v8949_v21  ;;  %v6831_v43 = vld [vmem:[%s10155_s10] sm:$0xff]  ;;  %v6926_v21 = vld [vmem:[%s10155_s10 + $0x2f8] sm:$0xff] }
 0x512   :  { %6653 = vmatpush2.bf16.msra.mxu1 %v8944_v56  ;;  %v6910_v56 = vld [vmem:[%s10155_s10 + $0x278] sm:$0xff] }
 0x513   :  { %6696 = vmatpush2.bf16.msra.mxu0 %v8947_v60  ;;  %6654 = vmatprep.subr.bf16.mxu1 %v8952_v29  ;;  %v8979_v60 = vld [vmem:[#allocation15 + $0x7ec] ss:$16 sps:$4 sm:$0xff]   ;;  %v8977_v29 = vld [vmem:[#allocation15 + $0x7e8] ss:$16 sps:$4 sm:$0xff]  }
 0x514   :  { %8135 = vmatprep.subr.mxu0 %v6862_v62  ;;  %v6925_v62 = vld [vmem:[%s10155_s10 + $0x2f0] sm:$0xff] }
 0x516   :  { %6655 = vmatpush2.bf16.msra.mxu1 %v8950_v53  ;;  %6698 = vmatmul.mubr.bf16.vlgmr.msra.gmra.mxu0 %v9604_v0  ;;  %v6844_v0 = vld [vmem:[%s10155_s10 + $0x68] sm:$0xff]  ;;  %v6909_v53 = vld [vmem:[%s10155_s10 + $0x270] sm:$0xff] }
 0x517   :  { %8136 = vmatpush3.msra.mxu0 %v6846_v57  ;;  %6991 = vmatprep.mubr.f32.mxu0 %v9443_v25  ;;  %v6859_v25 = vld [vmem:[%s10155_s10 + $0xe0] sm:$0xff]  ;;  %v8982_v57 = vld [vmem:[#allocation15 + $0x7cc] ss:$16 sps:$4 sm:$0xff]  }
 0x518   :  { %6706 = vmatprep.subr.bf16.mxu1 %v8955_v38  ;;  %8137 = vmatprep.subr.mxu0 %v6861_v39  ;;  %v6924_v38 = vld [vmem:[%s10155_s10 + $0x2e8] sm:$0xff] }
 0x519   :  { %6657 = vmatmul.mubr.bf16.vlgmr.msra.gmra.mxu1 %v9574_v13  ;;  %8138 = vmatpush3.msra.mxu0 %v6845_v24  ;;  %v8961_v13 = vld [vmem:[#allocation15 + $0x6ac] ss:$16 sps:$4 sm:$0xff]  }
 0x51a   :  { %6707 = vmatpush1.bf16.msra.mxu1 %v8953_v41  ;;  %6738 = vmatprep.mubr.bf16.mxu1 %v9615_v7  ;;  %v6842_v7 = vld [vmem:[%s10155_s10 + $0x58] sm:$0xff]  ;;  %v6908_v39 = vld [vmem:[%s10155_s10 + $0x268] sm:$0xff]  ;;  %v6923_v41 = vld [vmem:[%s10155_s10 + $0x2e0] sm:$0xff] }
 0x51b   :  { %8139 = vmatprep.subr.mxu0 %v6860_v30  ;;  %6708 = vmatprep.subr.bf16.mxu1 %v8958_v36  ;;  %v8985_v24 = vld [vmem:[#allocation15 + $0x7ac] ss:$16 sps:$4 sm:$0xff]  }
 0x51c   :  { %8140 = vmatpush3.msra.mxu0 %v6844_v0  ;;  %v6922_v36 = vld [vmem:[%s10155_s10 + $0x2d8] sm:$0xff] }
 0x51d   :  { %8141 = vmatprep.subr.mxu0 %v6859_v25  ;;  %v6906_v30 = vld [vmem:[%s10155_s10 + $0x258] sm:$0xff]  ;;  %v6905_v25 = vld [vmem:[%s10155_s10 + $0x250] sm:$0xff] }
 0x51e   :  { %6709 = vmatpush1.bf16.msra.mxu1 %v8956_v34  ;;  %8142 = vmatpush3.msra.mxu0 %v6843_v54  ;;  %v8983_v0 = vld [vmem:[#allocation15 + $0x7a8] ss:$16 sps:$4 sm:$0xff]   ;;  %v8988_v54 = vld [vmem:[#allocation15 + $0x78c] ss:$16 sps:$4 sm:$0xff]  }
 0x51f   :  { %8143 = vmatprep.subr.mxu0 %v6858_v47  ;;  %6710 = vmatprep.subr.bf16.mxu1 %v8961_v13  ;;  %v6921_v34 = vld [vmem:[%s10155_s10 + $0x2d0] sm:$0xff]  ;;  %v6920_v13 = vld [vmem:[%s10155_s10 + $0x2c8] sm:$0xff] }
 0x520   :  { %8144 = vmatpush3.msra.mxu0 %v6842_v7  ;;  %v6904_v47 = vld [vmem:[%s10155_s10 + $0x248] sm:$0xff] }
 0x521   :  { %8145 = vmatprep.subr.mxu0 %v6857_v16  ;;  %v8986_v7 = vld [vmem:[#allocation15 + $0x788] ss:$16 sps:$4 sm:$0xff]  }
 0x522   :  { %6711 = vmatpush1.bf16.msra.mxu1 %v8959_v32  ;;  %8146 = vmatpush3.msra.mxu0 %v6841_v26  ;;  %v6919_v32 = vld [vmem:[%s10155_s10 + $0x2c0] sm:$0xff]  ;;  %v8991_v26 = vld [vmem:[#allocation15 + $0x76c] ss:$16 sps:$4 sm:$0xff]  }
 0x523   :  { %8147 = vmatprep.subr.mxu0 %v6856_v2  ;;  %6712 = vmatprep.subr.bf16.mxu1 %v8964_v1  ;;  %v6903_v16 = vld [vmem:[%s10155_s10 + $0x240] sm:$0xff]  ;;  %v6918_v1 = vld [vmem:[%s10155_s10 + $0x2b8] sm:$0xff] }
 0x524   :  { %8148 = vmatpush3.msra.mxu0 %v6840_v59  ;;  %v6902_v2 = vld [vmem:[%s10155_s10 + $0x238] sm:$0xff] }
 0x525   :  { %8149 = vmatprep.subr.mxu0 %v6855_v3  ;;  %v8989_v59 = vld [vmem:[#allocation15 + $0x768] ss:$16 sps:$4 sm:$0xff]  }
 0x526   :  { %6713 = vmatpush1.bf16.msra.mxu1 %v8962_v49  ;;  %8150 = vmatpush3.msra.mxu0 %v6839_v4  ;;  %v6917_v49 = vld [vmem:[%s10155_s10 + $0x2b0] sm:$0xff]  ;;  %v8994_v4 = vld [vmem:[#allocation15 + $0x74c] ss:$16 sps:$4 sm:$0xff]  }
 0x527   :  { %8151 = vmatprep.subr.mxu0 %v6854_v5  ;;  %6714 = vmatprep.subr.bf16.mxu1 %v8967_v63  ;;  %v6901_v3 = vld [vmem:[%s10155_s10 + $0x230] sm:$0xff]  ;;  %v6916_v63 = vld [vmem:[%s10155_s10 + $0x2a8] sm:$0xff] }
 0x528   :  { %8152 = vmatpush3.msra.mxu0 %v6838_v45  ;;  %v6900_v5 = vld [vmem:[%s10155_s10 + $0x228] sm:$0xff] }
 0x529   :  { %8153 = vmatprep.subr.mxu0 %v6853_v31  ;;  %v8992_v45 = vld [vmem:[#allocation15 + $0x748] ss:$16 sps:$4 sm:$0xff]  }
 0x52a   :  { %6715 = vmatpush1.bf16.msra.mxu1 %v8965_v6  ;;  %8154 = vmatpush3.msra.mxu0 %v6837_v52  ;;  %v6915_v6 = vld [vmem:[%s10155_s10 + $0x2a0] sm:$0xff]  ;;  %v8997_v52 = vld [vmem:[#allocation15 + $0x72c] ss:$16 sps:$4 sm:$0xff]  }
 0x52b   :  { %8155 = vmatprep.subr.mxu0 %v6852_v40  ;;  %6716 = vmatprep.subr.bf16.mxu1 %v8970_v8  ;;  %v6899_v31 = vld [vmem:[%s10155_s10 + $0x220] sm:$0xff]  ;;  %v6914_v8 = vld [vmem:[%s10155_s10 + $0x298] sm:$0xff] }
 0x52c   :  { %8156 = vmatpush3.msra.mxu0 %v6836_v10  ;;  %v6898_v40 = vld [vmem:[%s10155_s10 + $0x218] sm:$0xff] }
 0x52d   :  { %8157 = vmatprep.subr.mxu0 %v6851_v37  ;;  %v8995_v10 = vld [vmem:[#allocation15 + $0x728] ss:$16 sps:$4 sm:$0xff]  }
 0x52e   :  { %6717 = vmatpush1.bf16.msra.mxu1 %v8968_v11  ;;  %8158 = vmatpush3.msra.mxu0 %v6835_v50  ;;  %v6913_v11 = vld [vmem:[%s10155_s10 + $0x290] sm:$0xff]  ;;  %v9000_v50 = vld [vmem:[#allocation15 + $0x70c] ss:$16 sps:$4 sm:$0xff]  }
 0x52f   :  { %8159 = vmatprep.subr.mxu0 %v6850_v14  ;;  %6718 = vmatprep.subr.bf16.mxu1 %v8973_v12  ;;  %v6897_v37 = vld [vmem:[%s10155_s10 + $0x210] sm:$0xff]  ;;  %v6912_v12 = vld [vmem:[%s10155_s10 + $0x288] sm:$0xff] }
 0x530   :  { %8160 = vmatpush3.msra.mxu0 %v6834_v58  ;;  %v6896_v14 = vld [vmem:[%s10155_s10 + $0x208] sm:$0xff] }
 0x531   :  { %8161 = vmatprep.subr.mxu0 %v6849_v17  ;;  %v8998_v58 = vld [vmem:[#allocation15 + $0x708] ss:$16 sps:$4 sm:$0xff]  }
 0x532   :  { %6719 = vmatpush1.bf16.msra.mxu1 %v8971_v15  ;;  %8162 = vmatpush3.msra.mxu0 %v6833_v27  ;;  %v6911_v15 = vld [vmem:[%s10155_s10 + $0x280] sm:$0xff]  ;;  %v6894_v27 = vld [vmem:[%s10155_s10 + $0x1f8] sm:$0xff] }
 0x533   :  { %8163 = vmatprep.subr.mxu0 %v6848_v51  ;;  %6720 = vmatprep.subr.bf16.mxu1 %v8976_v18  ;;  %v6895_v17 = vld [vmem:[%s10155_s10 + $0x200] sm:$0xff] }
 0x534   :  { %8164 = vmatpush3.msra.mxu0 %v6832_v20  ;;  %v6878_v20 = vld [vmem:[%s10155_s10 + $0x178] sm:$0xff] }
 0x535   :  { %8165 = vmatprep.subr.mxu0 %v6847_v48  ;;  %v6893_v48 = vld [vmem:[%s10155_s10 + $0x1f0] sm:$0xff] }
 0x536   :  { %6721 = vmatpush1.bf16.msra.mxu1 %v8974_v55  ;;  %8166 = vmatpush3.msra.mxu0 %v6831_v43 }
 0x537   :  { %6992 = vmatmul.mubr.f32.vlgmr.msra.gmra.mxu0 %v9439_v23  ;;  %8205 = vmatprep.subr.mxu0 %v6926_v21  ;;  %v8980_v23 = vld [vmem:[#allocation15 + $0x7c8] ss:$16 sps:$4 sm:$0xff]  }
 0x538   :  { %8206 = vmatpush3.msra.mxu0 %v6910_v56  ;;  %7131 = vmatprep.mubr.f32.mxu0 %v9494_v22  ;;  %v6907_v22 = vld [vmem:[%s10155_s10 + $0x260] sm:$0xff]  ;;  %v6892_v21 = vld [vmem:[%s10155_s10 + $0x1e8] sm:$0xff] }
 0x539   :  { %6722 = vmatprep.subr.bf16.mxu1 %v8979_v60  ;;  %8207 = vmatprep.subr.mxu0 %v6925_v62  ;;  %v6891_v56 = vld [vmem:[%s10155_s10 + $0x1e0] sm:$0xff]  ;;  %v6890_v60 = vld [vmem:[%s10155_s10 + $0x1d8] sm:$0xff]  ;;  %v6889_v62 = vld [vmem:[%s10155_s10 + $0x1d0] sm:$0xff] }
 0x53a   :  { %6723 = vmatpush2.bf16.msra.mxu1 %v8977_v29  ;;  %8208 = vmatpush3.msra.mxu0 %v6909_v53  ;;  %v6874_v29 = vld [vmem:[%s10155_s10 + $0x158] sm:$0xff]  ;;  %v6873_v53 = vld [vmem:[%s10155_s10 + $0x150] sm:$0xff] }
 0x53b   :  { %8209 = vmatprep.subr.mxu0 %v6924_v38  ;;  %6724 = vmatprep.subr.bf16.mxu1 %v8982_v57  ;;  %v6888_v57 = vld [vmem:[%s10155_s10 + $0x1c8] sm:$0xff] }
 0x53c   :  { %8210 = vmatpush3.msra.mxu0 %v6908_v39  ;;  %v6872_v38 = vld [vmem:[%s10155_s10 + $0x148] sm:$0xff]  ;;  %v6887_v39 = vld [vmem:[%s10155_s10 + $0x1c0] sm:$0xff] }
 0x53d   :  { %8211 = vmatprep.subr.mxu0 %v6923_v41  ;;  %v6886_v41 = vld [vmem:[%s10155_s10 + $0x1b8] sm:$0xff] }
 0x53e   :  { %6725 = vmatpush2.bf16.msra.mxu1 %v8980_v23  ;;  %8212 = vmatpush3.msra.mxu0 %v6907_v22  ;;  %v6871_v23 = vld [vmem:[%s10155_s10 + $0x140] sm:$0xff]  ;;  %v6870_v22 = vld [vmem:[%s10155_s10 + $0x138] sm:$0xff] }
 0x53f   :  { %8213 = vmatprep.subr.mxu0 %v6922_v36  ;;  %6726 = vmatprep.subr.bf16.mxu1 %v8985_v24  ;;  %v6885_v24 = vld [vmem:[%s10155_s10 + $0x1b0] sm:$0xff] }
 0x540   :  { %8214 = vmatpush3.msra.mxu0 %v6906_v30  ;;  %v6869_v36 = vld [vmem:[%s10155_s10 + $0x130] sm:$0xff]  ;;  %v6884_v30 = vld [vmem:[%s10155_s10 + $0x1a8] sm:$0xff] }
 0x541   :  { %8215 = vmatprep.subr.mxu0 %v6921_v34  ;;  %v6883_v34 = vld [vmem:[%s10155_s10 + $0x1a0] sm:$0xff] }
 0x542   :  { %6727 = vmatpush2.bf16.msra.mxu1 %v8983_v0  ;;  %8216 = vmatpush3.msra.mxu0 %v6905_v25  ;;  %v6868_v0 = vld [vmem:[%s10155_s10 + $0x128] sm:$0xff]  ;;  %v6867_v25 = vld [vmem:[%s10155_s10 + $0x120] sm:$0xff] }
 0x543   :  { %8217 = vmatprep.subr.mxu0 %v6920_v13  ;;  %6728 = vmatprep.subr.bf16.mxu1 %v8988_v54  ;;  %v6882_v54 = vld [vmem:[%s10155_s10 + $0x198] sm:$0xff] }
 0x544   :  { %8218 = vmatpush3.msra.mxu0 %v6904_v47  ;;  %v6866_v13 = vld [vmem:[%s10155_s10 + $0x118] sm:$0xff]  ;;  %v6881_v47 = vld [vmem:[%s10155_s10 + $0x190] sm:$0xff] }
 0x545   :  { %8219 = vmatprep.subr.mxu0 %v6919_v32  ;;  %v6880_v32 = vld [vmem:[%s10155_s10 + $0x188] sm:$0xff] }
 0x546   :  { %6729 = vmatpush2.bf16.msra.mxu1 %v8986_v7  ;;  %8220 = vmatpush3.msra.mxu0 %v6903_v16  ;;  %v6865_v7 = vld [vmem:[%s10155_s10 + $0x110] sm:$0xff]  ;;  %v6864_v16 = vld [vmem:[%s10155_s10 + $0x108] sm:$0xff] }
 0x547   :  { %8221 = vmatprep.subr.mxu0 %v6918_v1  ;;  %6730 = vmatprep.subr.bf16.mxu1 %v8991_v26  ;;  %v6879_v26 = vld [vmem:[%s10155_s10 + $0x180] sm:$0xff] }
 0x548   :  { %8222 = vmatpush3.msra.mxu0 %v6902_v2  ;;  %v6863_v1 = vld [vmem:[%s10155_s10 + $0x100] sm:$0xff]  ;;  %v6798_v2 = vld [vmem:[%s10154_s9 + $0xf8] sm:$0xff] }
 0x549   :  { %8223 = vmatprep.subr.mxu0 %v6917_v49  ;;  %v6797_v49 = vld [vmem:[%s10154_s9 + $0xf0] sm:$0xff] }
 0x54a   :  { %6731 = vmatpush2.bf16.msra.mxu1 %v8989_v59  ;;  %8224 = vmatpush3.msra.mxu0 %v6901_v3  ;;  %v6782_v59 = vld [vmem:[%s10154_s9 + $0x78] sm:$0xff]  ;;  %v6781_v3 = vld [vmem:[%s10154_s9 + $0x70] sm:$0xff] }
 0x54b   :  { %8225 = vmatprep.subr.mxu0 %v6916_v63  ;;  %6732 = vmatprep.subr.bf16.mxu1 %v8994_v4  ;;  %v6796_v4 = vld [vmem:[%s10154_s9 + $0xe8] sm:$0xff]  ;;  %v6830_v63 = vld [vmem:[%s10154_s9 + $0x1f8] sm:$0xff] }
 0x54c   :  { %8226 = vmatpush3.msra.mxu0 %v6900_v5  ;;  %v6814_v5 = vld [vmem:[%s10154_s9 + $0x178] sm:$0xff] }
 0x54d   :  { %8227 = vmatprep.subr.mxu0 %v6915_v6  ;;  %v6813_v6 = vld [vmem:[%s10154_s9 + $0x170] sm:$0xff] }
 0x54e   :  { %6733 = vmatpush2.bf16.msra.mxu1 %v8992_v45  ;;  %8228 = vmatpush3.msra.mxu0 %v6899_v31  ;;  %v6780_v45 = vld [vmem:[%s10154_s9 + $0x68] sm:$0xff]  ;;  %v6795_v31 = vld [vmem:[%s10154_s9 + $0xe0] sm:$0xff] }
 0x54f   :  { %8229 = vmatprep.subr.mxu0 %v6914_v8  ;;  %6734 = vmatprep.subr.bf16.mxu1 %v8997_v52  ;;  %v6779_v52 = vld [vmem:[%s10154_s9 + $0x60] sm:$0xff]  ;;  %v6794_v8 = vld [vmem:[%s10154_s9 + $0xd8] sm:$0xff] }
 0x550   :  { %8230 = vmatpush3.msra.mxu0 %v6898_v40  ;;  %v6778_v40 = vld [vmem:[%s10154_s9 + $0x58] sm:$0xff] }
 0x551   :  { %8231 = vmatprep.subr.mxu0 %v6913_v11  ;;  %v6777_v11 = vld [vmem:[%s10154_s9 + $0x50] sm:$0xff] }
 0x552   :  { %6735 = vmatpush2.bf16.msra.mxu1 %v8995_v10  ;;  %8232 = vmatpush3.msra.mxu0 %v6897_v37  ;;  %v6793_v10 = vld [vmem:[%s10154_s9 + $0xd0] sm:$0xff]  ;;  %v6792_v37 = vld [vmem:[%s10154_s9 + $0xc8] sm:$0xff] }
 0x553   :  { %8233 = vmatprep.subr.mxu0 %v6912_v12  ;;  %6736 = vmatprep.subr.bf16.mxu1 %v9000_v50  ;;  %v6776_v50 = vld [vmem:[%s10154_s9 + $0x48] sm:$0xff]  ;;  %v6791_v12 = vld [vmem:[%s10154_s9 + $0xc0] sm:$0xff] }
 0x554   :  { %8234 = vmatpush3.msra.mxu0 %v6896_v14  ;;  %v6775_v14 = vld [vmem:[%s10154_s9 + $0x40] sm:$0xff] }
 0x555   :  { %8235 = vmatprep.subr.mxu0 %v6911_v15  ;;  %v6774_v15 = vld [vmem:[%s10154_s9 + $0x38] sm:$0xff] }
 0x556   :  { %6737 = vmatpush2.bf16.msra.mxu1 %v8998_v58  ;;  %8236 = vmatpush3.msra.mxu0 %v6895_v17  ;;  %v6535_v18 = vpop.f32.mrf.mxu0  ;;  %v6790_v58 = vld [vmem:[%s10154_s9 + $0xb8] sm:$0xff]  ;;  %v6789_v17 = vld [vmem:[%s10154_s9 + $0xb0] sm:$0xff] }
 0x557   :  { %7132 = vmatmul.mubr.f32.vlgmr.msra.gmra.mxu0 %v9490_v19  ;;  %v9837_v51 = vadd.f32 %v6535_v18, %v9630_v33  ;;  %8170 = vmatprep.subr.mxu1 %v6894_v27  ;;  %v6877_v19 = vld [vmem:[%s10155_s10 + $0x170] sm:$0xff]  ;;  %v6788_v18 = vld [vmem:[%s10154_s9 + $0xa8] sm:$0xff] }
 0x558   :  { %v6537_v55 = vpop.f32.mrf.mxu0  ;;  %8275 = vmatprep.subr.mxu0 %v6830_v63  ;;  %v6773_v27 = vld [vmem:[%s10154_s9 + $0x30] sm:$0xff]  ;;  %v6819_v63 = vld [vmem:[%s10154_s9 + $0x1a0] sm:$0xff] }
 0x559   :  { %6739 = vmatmul.mubr.bf16.vlgmr.msra.gmra.mxu1 %v9618_v9  ;;  %v9847_v43 = vadd.f32 %v6537_v55, %v9632_v35  ;;  %v6876_v9 = vld [vmem:[%s10155_s10 + $0x168] sm:$0xff]  ;;  %8276 = vmatpush3.msra.mxu0 %v6814_v5  ;;  %v6787_v55 = vld [vmem:[%s10154_s9 + $0xa0] sm:$0xff] }
 0x55a   :  { %8171 = vmatpush3.msra.mxu1 %v6878_v20  ;;  %7061 = vmatprep.mubr.f32.mxu1 %v9454_v61  ;;  %v6539_v33 = vpop.f32.mrf.mxu0  ;;  %v6875_v61 = vld [vmem:[%s10155_s10 + $0x160] sm:$0xff]  ;;  %v6772_v20 = vld [vmem:[%s10154_s9 + $0x28] sm:$0xff] }
 0x55b   :  { %8172 = vmatprep.subr.mxu1 %v6893_v48  ;;  %v6771_v48 = vld [vmem:[%s10154_s9 + $0x20] sm:$0xff]  ;;  %v6770_v33 = vld [vmem:[%s10154_s9 + $0x18] sm:$0xff] }
 0x55c   :  { %8173 = vmatpush3.msra.mxu1 %v6877_v19  ;;  %v6540_v35 = vpop.f32.mrf.mxu0  ;;  %v6786_v19 = vld [vmem:[%s10154_s9 + $0x98] sm:$0xff]  ;;  %v6803_v5 = vld [vmem:[%s10154_s9 + $0x120] sm:$0xff] }
 0x55d   :  { %8174 = vmatprep.subr.mxu1 %v6892_v21  ;;  %v6785_v21 = vld [vmem:[%s10154_s9 + $0x90] sm:$0xff]  ;;  %v6784_v35 = vld [vmem:[%s10154_s9 + $0x88] sm:$0xff] }
 0x55e   :  { %8175 = vmatpush3.msra.mxu1 %v6876_v9  ;;  %v6769_v9 = vld [vmem:[%s10154_s9 + $0x10] sm:$0xff] }
 0x55f   :  { %8176 = vmatprep.subr.mxu1 %v6891_v56  ;;  %v6768_v56 = vld [vmem:[%s10154_s9 + $0x8] sm:$0xff] }
 0x560   :  { %8177 = vmatpush3.msra.mxu1 %v6875_v61  ;;  %v6783_v61 = vld [vmem:[%s10154_s9 + $0x80] sm:$0xff] }
 0x561   :  { %8178 = vmatprep.subr.mxu1 %v6890_v60  ;;  %v6767_v60 = vld [vmem:[%s10154_s9] sm:$0xff] }
 0x562   :  { %8179 = vmatpush3.msra.mxu1 %v6874_v29 }
 0x563   :  { %8180 = vmatprep.subr.mxu1 %v6889_v62  ;;  %v6828_v62 = vld [vmem:[%s10154_s9 + $0x1e8] sm:$0xff] }
 0x564   :  { %8181 = vmatpush3.msra.mxu1 %v6873_v53  ;;  %v6812_v53 = vld [vmem:[%s10154_s9 + $0x168] sm:$0xff] }
 0x565   :  { %8182 = vmatprep.subr.mxu1 %v6888_v57 }
 0x566   :  { %8183 = vmatpush3.msra.mxu1 %v6872_v38  ;;  %v6827_v38 = vld [vmem:[%s10154_s9 + $0x1e0] sm:$0xff] }
 0x567   :  { %8184 = vmatprep.subr.mxu1 %v6887_v39 }
 0x568   :  { %8185 = vmatpush3.msra.mxu1 %v6871_v23  ;;  %v6811_v23 = vld [vmem:[%s10154_s9 + $0x160] sm:$0xff] }
 0x569   :  { %8186 = vmatprep.subr.mxu1 %v6886_v41 }
 0x56a   :  { %8187 = vmatpush3.msra.mxu1 %v6870_v22 }
 0x56b   :  { %8188 = vmatprep.subr.mxu1 %v6885_v24  ;;  %v6826_v24 = vld [vmem:[%s10154_s9 + $0x1d8] sm:$0xff] }
 0x56c   :  { %8189 = vmatpush3.msra.mxu1 %v6869_v36 }
 0x56d   :  { %8190 = vmatprep.subr.mxu1 %v6884_v30  ;;  %v6810_v30 = vld [vmem:[%s10154_s9 + $0x158] sm:$0xff] }
 0x56e   :  { %8191 = vmatpush3.msra.mxu1 %v6868_v0 }
 0x56f   :  { %8192 = vmatprep.subr.mxu1 %v6883_v34 }
 0x570   :  { %8193 = vmatpush3.msra.mxu1 %v6867_v25 }
 0x571   :  { %8194 = vmatprep.subr.mxu1 %v6882_v54 }
 0x572   :  { %8195 = vmatpush3.msra.mxu1 %v6866_v13  ;;  %v6809_v13 = vld [vmem:[%s10154_s9 + $0x150] sm:$0xff] }
 0x573   :  { %8196 = vmatprep.subr.mxu1 %v6881_v47 }
 0x574   :  { %8197 = vmatpush3.msra.mxu1 %v6865_v7  ;;  %v6824_v7 = vld [vmem:[%s10154_s9 + $0x1c8] sm:$0xff] }
 0x575   :  { %8198 = vmatprep.subr.mxu1 %v6880_v32  ;;  %v6808_v32 = vld [vmem:[%s10154_s9 + $0x148] sm:$0xff] }
 0x576   :  { %8199 = vmatpush3.msra.mxu1 %v6864_v16  ;;  %v6823_v16 = vld [vmem:[%s10154_s9 + $0x1c0] sm:$0xff] }
 0x577   :  { %8200 = vmatprep.subr.mxu1 %v6879_v26  ;;  %v6807_v26 = vld [vmem:[%s10154_s9 + $0x140] sm:$0xff] }
 0x578   :  { %8201 = vmatpush3.msra.mxu1 %v6863_v1  ;;  %v6822_v1 = vld [vmem:[%s10154_s9 + $0x1b8] sm:$0xff] }
 0x579   :  { %7062 = vmatmul.mubr.f32.vlgmr.msra.gmra.mxu1 %v9446_v28  ;;  %8240 = vmatprep.subr.mxu1 %v6798_v2  ;;  %v6829_v28 = vld [vmem:[%s10154_s9 + $0x1f0] sm:$0xff]  ;;  %v6806_v2 = vld [vmem:[%s10154_s9 + $0x138] sm:$0xff] }
 0x57a   :  { %8241 = vmatpush3.msra.mxu1 %v6782_v59  ;;  %8277 = vmatprep.subr.mxu0 %v6829_v28  ;;  %v6821_v59 = vld [vmem:[%s10154_s9 + $0x1b0] sm:$0xff]  ;;  %v6818_v28 = vld [vmem:[%s10154_s9 + $0x198] sm:$0xff] }
 0x57b   :  { %8242 = vmatprep.subr.mxu1 %v6797_v49  ;;  %8278 = vmatpush3.msra.mxu0 %v6813_v6  ;;  %v6805_v49 = vld [vmem:[%s10154_s9 + $0x130] sm:$0xff]  ;;  %v6802_v6 = vld [vmem:[%s10154_s9 + $0x118] sm:$0xff] }
 0x57c   :  { %8243 = vmatpush3.msra.mxu1 %v6781_v3  ;;  %8279 = vmatprep.subr.mxu0 %v6828_v62  ;;  %v6820_v3 = vld [vmem:[%s10154_s9 + $0x1a8] sm:$0xff] }
 0x57d   :  { %8244 = vmatprep.subr.mxu1 %v6796_v4  ;;  %8280 = vmatpush3.msra.mxu0 %v6812_v53  ;;  %v6804_v4 = vld [vmem:[%s10154_s9 + $0x128] sm:$0xff] }
 0x57e   :  { %8245 = vmatpush3.msra.mxu1 %v6780_v45  ;;  %8281 = vmatprep.subr.mxu0 %v6827_v38 }
 0x57f   :  { %8246 = vmatprep.subr.mxu1 %v6795_v31  ;;  %8282 = vmatpush3.msra.mxu0 %v6811_v23  ;;  %v6817_v31 = vld [vmem:[%s10154_s9 + $0x190] sm:$0xff] }
 0x580   :  { %8247 = vmatpush3.msra.mxu1 %v6779_v52  ;;  %8283 = vmatprep.subr.mxu0 %v6826_v24 }
 0x581   :  { %8248 = vmatprep.subr.mxu1 %v6794_v8  ;;  %8284 = vmatpush3.msra.mxu0 %v6810_v30 }
 0x582   :  { %8249 = vmatpush3.msra.mxu1 %v6778_v40  ;;  %v6801_v40 = vld [vmem:[%s10154_s9 + $0x110] sm:$0xff] }
 0x583   :  { %8250 = vmatprep.subr.mxu1 %v6793_v10 }
 0x584   :  { %8251 = vmatpush3.msra.mxu1 %v6777_v11 }
 0x585   :  { %8252 = vmatprep.subr.mxu1 %v6792_v37  ;;  %v6816_v37 = vld [vmem:[%s10154_s9 + $0x188] sm:$0xff] }
 0x586   :  { %8253 = vmatpush3.msra.mxu1 %v6776_v50  ;;  %v6800_v50 = vld [vmem:[%s10154_s9 + $0x108] sm:$0xff] }
 0x587   :  { %8254 = vmatprep.subr.mxu1 %v6791_v12  ;;  %v6815_v12 = vld [vmem:[%s10154_s9 + $0x180] sm:$0xff] }
 0x588   :  { %8255 = vmatpush3.msra.mxu1 %v6775_v14 }
 0x589   :  { %8256 = vmatprep.subr.mxu1 %v6790_v58  ;;  %v6799_v58 = vld [vmem:[%s10154_s9 + $0x100] sm:$0xff] }
 0x58a   :  { %8257 = vmatpush3.msra.mxu1 %v6774_v15 }
 0x58b   :  { %8258 = vmatprep.subr.mxu1 %v6789_v17 }
 0x58c   :  { %8259 = vmatpush3.msra.mxu1 %v6773_v27  ;;  %v5130_v27 = vrot.slane %v9624_v46, %v9420_v42 }
 0x58d   :  { %8260 = vmatprep.subr.mxu1 %v6788_v18  ;;  %v5134_v18 = vrot.slane %v9624_v46, %v9425_v44 }
 0x58e   :  { %8261 = vmatpush3.msra.mxu1 %v6772_v20 }
 0x58f   :  { %8262 = vmatprep.subr.mxu1 %v6787_v55 }
 0x590   :  { %8263 = vmatpush3.msra.mxu1 %v6771_v48 }
 0x591   :  { %8264 = vmatprep.subr.mxu1 %v6786_v19 }
 0x592   :  { %8265 = vmatpush3.msra.mxu1 %v6770_v33 }
 0x593   :  { %8266 = vmatprep.subr.mxu1 %v6785_v21 }
 0x594   :  { %8267 = vmatpush3.msra.mxu1 %v6769_v9 }
 0x595   :  { %8268 = vmatprep.subr.mxu1 %v6784_v35 }
 0x596   :  { %v10046_v29 = vpop.f32.mrf.mxu0  ;;  %8269 = vmatpush3.msra.mxu1 %v6768_v56 }
 0x597   :  { %8270 = vmatprep.subr.mxu1 %v6783_v61  ;;  %v6618_v55 = vadd.f32 %v10046_v29, %v5130_v27 }
 0x598   :  { %v10054_v57 = vpop.f32.mrf.mxu0  ;;  %8271 = vmatpush3.msra.mxu1 %v6767_v60 }
 0x599   :  { %v6576_v39 = vpop.f32.mrf.mxu1  ;;  %v6620_v33 = vadd.f32 %v10054_v57, %v5134_v18 }
 0x59a   :  { %v6577_v41 = vadd.f32 %v6576_v39, %v9837_v51  ;;  %v6621_v22 = vpop.f32.mrf.mxu0  ;;  %v6825_v51 = vld [vmem:[%s10154_s9 + $0x1d0] sm:$0xff] }
 0x59b   :  { %v6578_v36 = vpop.f32.mrf.mxu1  ;;  %8285 = vmatprep.subr.mxu0 %v6825_v51 }
 0x59c   :  { %v6751_v0 = vmul.f32 0.70710677, %v6577_v41  ;;  %v6579_v34 = vadd.f32 %v6578_v36, %v9847_v43  ;;  %v6622_v25 = vpop.f32.mrf.mxu0  ;;  %8286 = vmatpush3.msra.mxu0 %v6809_v13  ;;  %v6747_v14 = vmul.f32 0.5, %v6577_v41 }
 0x59d   :  { %v6580_v54 = vpop.f32.mrf.mxu1  ;;  %8287 = vmatprep.subr.mxu0 %v6824_v7 }
 0x59e   :  { %9041 = verf.f32 %v6751_v0  ;;  %v6752_v47 = vmul.f32 0.70710677, %v6579_v34  ;;  %8288 = vmatpush3.msra.mxu0 %v6808_v32  ;;  %v6748_v10 = vmul.f32 0.5, %v6579_v34 }
 0x59f   :  { %v6581_v43 = vpop.f32.mrf.mxu1  ;;  %8289 = vmatprep.subr.mxu0 %v6823_v16 }
 0x5a0   :  { %9043 = verf.f32 %v6752_v47  ;;  %8290 = vmatpush3.msra.mxu0 %v6807_v26 }
 0x5a1   :  { %8291 = vmatprep.subr.mxu0 %v6822_v1 }
 0x5a2   :  { %8292 = vmatpush3.msra.mxu0 %v6806_v2 }
 0x5a3   :  { %8293 = vmatprep.subr.mxu0 %v6821_v59 }
 0x5a4   :  { %8294 = vmatpush3.msra.mxu0 %v6805_v49 }
 0x5a5   :  { %8295 = vmatprep.subr.mxu0 %v6820_v3 }
 0x5a6   :  { %8296 = vmatpush3.msra.mxu0 %v6804_v4 }
 0x5a7   :  { %8297 = vmatprep.subr.mxu0 %v6819_v63 }
 0x5a8   :  { %8298 = vmatpush3.msra.mxu0 %v6803_v5 }
 0x5a9   :  { %8299 = vmatprep.subr.mxu0 %v6818_v28 }
 0x5aa   :  { %8300 = vmatpush3.msra.mxu0 %v6802_v6  ;;  %v8134_v6 = vld [vmem:[#allocation3] ss:$0 sm:$0xff] }
 0x5ab   :  { %v9042_v45 = vpop.eup %9041  ;;  %8301 = vmatprep.subr.mxu0 %v6817_v31 }
 0x5ac   :  { %v6759_v8 = vadd.f32 1.0, %v9042_v45  ;;  %8302 = vmatpush3.msra.mxu0 %v6801_v40 }
 0x5ad   :  { %v9044_v52 = vpop.eup %9043  ;;  %8303 = vmatprep.subr.mxu0 %v6816_v37 }
 0x5ae   :  { %v6760_v11 = vadd.f32 1.0, %v9044_v52  ;;  %8304 = vmatpush3.msra.mxu0 %v6800_v50  ;;  %v6763_v17 = vmul.f32 %v6759_v8, %v6747_v14 }
 0x5af   :  { %8305 = vmatprep.subr.mxu0 %v6815_v12 }
 0x5b0   :  { %v6764_v15 = vmul.f32 %v6760_v11, %v6748_v10  ;;  %8306 = vmatpush3.msra.mxu0 %v6799_v58 }
 0x5b2   :  { %7201 = vmatprep.mubr.f32.mxu1 %v6764_v15 }
 0x5b3   :  { %7202 = vmatmul.mubr.f32.vlgmr.msra.gmra.mxu1 %v6763_v17 }
 0x5d6   :  { %v6699_v20 = vpop.f32.mrf.mxu0 }
 0x5d8   :  { %v6701_v48 = vpop.f32.mrf.mxu0 }
 0x5d9   :  { %v6658_v19 = vpop.f32.mrf.mxu1 }
 0x5da   :  { %v6659_v21 = vadd.f32 %v6658_v19, %v6618_v55  ;;  %v6703_v9 = vpop.f32.mrf.mxu0 }
 0x5db   :  { %v6660_v35 = vpop.f32.mrf.mxu1 }
 0x5dc   :  { %v6661_v56 = vadd.f32 %v6660_v35, %v6620_v33  ;;  %v6704_v61 = vpop.f32.mrf.mxu0  ;;  %v6700_v60 = vadd.f32 %v6699_v20, %v6659_v21 }
 0x5dd   :  { %v6662_v62 = vpop.f32.mrf.mxu1 }
 0x5de   :  { %v6702_v53 = vadd.f32 %v6701_v48, %v6661_v56 }
 0x5df   :  { %v6663_v38 = vpop.f32.mrf.mxu1 }
 0x5f7   :  { %v8167_v54 = vpop.f32.mrf.mxu0 }
 0x5f9   :  { %v8168_v47 = vpop.f32.mrf.mxu0 }
 0x5fa   :  { %v8169_v26 = vadd.f32 %v8168_v47, %v8167_v54 }
 0x617   :  { %v8237_v43 = vpop.f32.mrf.mxu0 }
 0x619   :  { %v6740_v42 = vpop.f32.mrf.mxu1  ;;  %v8238_v1 = vpop.f32.mrf.mxu0 }
 0x61a   :  { %v6741_v39 = vadd.f32 %v6740_v42, %v6700_v60  ;;  %v8239_v49 = vadd.f32 %v8238_v1, %v8237_v43 }
 0x61b   :  { %v6742_v23 = vpop.f32.mrf.mxu1 }
 0x61c   :  { %v6753_v44 = vmul.f32 0.70710677, %v6741_v39  ;;  %v6743_v46 = vadd.f32 %v6742_v23, %v6702_v53  ;;  %v6749_v34 = vmul.f32 0.5, %v6741_v39 }
 0x61d   :  { %v6744_v41 = vpop.f32.mrf.mxu1 }
 0x61e   :  { %9045 = verf.f32 %v6753_v44  ;;  %v6754_v29 = vmul.f32 0.70710677, %v6743_v46  ;;  %v6750_v30 = vmul.f32 0.5, %v6743_v46 }
 0x61f   :  { %v6745_v22 = vpop.f32.mrf.mxu1 }
 0x620   :  { %9047 = verf.f32 %v6754_v29 }
 0x62b   :  { %v9046_v57 = vpop.eup %9045 }
 0x62c   :  { %v6761_v36 = vadd.f32 1.0, %v9046_v57 }
 0x62d   :  { %v9048_v24 = vpop.eup %9047 }
 0x62e   :  { %v6762_v0 = vadd.f32 1.0, %v9048_v24  ;;  %v6765_v51 = vmul.f32 %v6761_v36, %v6749_v34 }
 0x630   :  { %v6766_v25 = vmul.f32 %v6762_v0, %v6750_v30 }
 0x632   :  { %7271 = vmatprep.mubr.f32.mxu0 %v6766_v25 }
 0x633   :  { %7272 = vmatmul.mubr.f32.vlgmr.msra.gmra.mxu0 %v6765_v51 }
 0x639   :  { %v8202_v13 = vpop.f32.mrf.mxu1 }
 0x63b   :  { %v8203_v7 = vpop.f32.mrf.mxu1 }
 0x63c   :  { %v8204_v16 = vadd.f32 %v8203_v7, %v8202_v13 }
 0x63e   :  { %v7064_v59 = vadd.f32 %v8204_v16, %v8169_v26 }
 0x640   :  { %v7134_v63 = vadd.f32 %v8239_v49, %v7064_v59 }
 0x673   :  { %v8272_v32 = vpop.f32.mrf.mxu1 }
 0x675   :  { %v8273_v2 = vpop.f32.mrf.mxu1 }
 0x676   :  { %v8274_v3 = vadd.f32 %v8273_v2, %v8272_v32 }
 0x678   :  { %v7204_v28 = vadd.f32 %v8274_v3, %v7134_v63 }
 0x6f3   :  { %v8307_v4 = vpop.f32.mrf.mxu0 }
 0x6f5   :  { %v8308_v5 = vpop.f32.mrf.mxu0 }
 0x6f6   :  { %v8309_v45 = vadd.f32 %v8308_v5, %v8307_v4 }
 0x6f8   :  { %v7274_v31 = vadd.f32 %v8309_v45, %v7204_v28 }
 0x6fa   :  { %v7284_v52 = vadd.f32 %v8134_v6, %v7274_v31 }
 0x6fc   :  { %7286 = vst.msk [vmem:[%s10157_s12] sm:$0x3] %vm7285_vm4, %v7284_v52 }
 0x6fd   :  { %7291 = vsyncpa [#allocation5], 1 }
 0x6fe   :  { %7292 = vsyncpa [#allocation7], 1 }
 0x6ff   :  { %7293 = vsyncpa [#allocation10], 1 }
 0x700   :  { %7294 = vsyncpa [#allocation13], 1 }
 0x701   :  { %7295 = vsyncpa [#allocation16], 1 }

</bundles_post_ra>
